<compile_context>
chip_gen: v7x
topology: tpu7x:2x2x1
jax: 0.10.0
libtpu: 0.0.40
codegen_flags: <defaults>
</compile_context>

<pallas_src>
import functools
import math

import jax
import jax.numpy as jnp
from jax.experimental import pallas as pl
from jax.experimental.pallas import tpu as pltpu  # imported per convention (not needed at this size)


# ----------------------------------------------------------------------------
# In-kernel helpers (operate on plain arrays already loaded from refs)
# ----------------------------------------------------------------------------
def _attention(xq, xkv, wq, wk, wv, wo, bq, bk, bv, bo, mask, num_heads, scale):
    """Multi-head attention over batch-folded rows.

    xq : (Rq, E)  query-side rows (batch folded, batch-major)
    xkv: (Rk, E)  key/value-side rows
    w* : (E, E)   projection weights, pre-transposed to (in, out)
    b* : (1, E)   projection biases
    mask: (Rq, Rk) additive f32 mask (block-diagonal across batches)
    returns (Rq, E) float32
    """
    Rq, E = xq.shape
    Rk = xkv.shape[0]
    Dh = E // num_heads

    q = (jnp.dot(xq, wq, preferred_element_type=jnp.float32) + bq) * scale
    k = jnp.dot(xkv, wk, preferred_element_type=jnp.float32) + bk
    v = jnp.dot(xkv, wv, preferred_element_type=jnp.float32) + bv

    qh = q.reshape(Rq, num_heads, Dh)
    kh = k.reshape(Rk, num_heads, Dh)
    vh = v.reshape(Rk, num_heads, Dh)

    # scores: (H, Rq, Rk) -- one dense contraction, heads as the batch dim
    s = jnp.einsum("qhd,khd->hqk", qh, kh, preferred_element_type=jnp.float32)
    s = s + mask[None, :, :]
    s = s - s.max(axis=-1, keepdims=True)
    p = jnp.exp(s)
    # approx reciprocal runs on the EUP slot (small relative error vs exact divide)
    p = p * pl.reciprocal(p.sum(axis=-1, keepdims=True), approx=True)

    # context: (Rq, H, Dh) -> (Rq, E), head-major along E (matches PyTorch MHA concat)
    ctx = jnp.einsum("hqk,khd->qhd", p, vh, preferred_element_type=jnp.float32)
    ctx = ctx.reshape(Rq, E)
    return jnp.dot(ctx, wo, preferred_element_type=jnp.float32) + bo


def _add_ln(x, y, gamma, beta):
    """(x + y) followed by LayerNorm over the last axis (eps = 1e-5)."""
    z = x + y
    mean = jnp.mean(z, axis=-1, keepdims=True)
    var = jnp.mean(jnp.square(z - mean), axis=-1, keepdims=True)
    return (z - mean) * jax.lax.rsqrt(var + 1e-5) * gamma + beta


# ----------------------------------------------------------------------------
# Single fused kernel: all decoder layers + final vocab projection
# ----------------------------------------------------------------------------
def decoder_kernel(dec_ref, enc_ref, aw_ref, fw1_ref, fw2_ref, fb1_ref, vec_ref,
                   pw_ref, pb_ref, o_ref, *, num_heads, num_layers, batch, seq_q, seq_k):
    Rq = batch * seq_q
    Rk = batch * seq_k
    E = dec_ref.shape[-1]
    Dh = E // num_heads
    scale = 1.0 / math.sqrt(Dh)

    x = dec_ref[...].astype(jnp.float32)      # (Rq, E)  decoder rows
    enc = enc_ref[...].astype(jnp.float32)    # (Rk, E)  encoder rows

    # In-kernel masks (no mask operand / DMA).  Batches are folded into rows, so
    # attention is one dense (H, Rq, Rk) contraction; a block-diagonal additive mask
    # keeps batches independent, plus causality inside each block for self-attention.
    rq = jax.lax.broadcasted_iota(jnp.int32, (Rq, Rq), 0)
    cq = jax.lax.broadcasted_iota(jnp.int32, (Rq, Rq), 1)
    rc = jax.lax.broadcasted_iota(jnp.int32, (Rq, Rk), 0)
    cc = jax.lax.broadcasted_iota(jnp.int32, (Rq, Rk), 1)
    same_self = jnp.zeros((Rq, Rq), dtype=jnp.bool_)
    same_cross = jnp.zeros((Rq, Rk), dtype=jnp.bool_)
    for b in range(batch):
        same_self = same_self | ((rq >= b * seq_q) & (rq < (b + 1) * seq_q) &
                                 (cq >= b * seq_q) & (cq < (b + 1) * seq_q))
        same_cross = same_cross | ((rc >= b * seq_q) & (rc < (b + 1) * seq_q) &
                                   (cc >= b * seq_k) & (cc < (b + 1) * seq_k))
    self_mask = jnp.where(same_self & (cq <= rq), 0.0, -1e9).astype(jnp.float32)
    cross_mask = jnp.where(same_cross, 0.0, -1e9).astype(jnp.float32)

    for l in range(num_layers):
        aw = aw_ref[l]       # (8, E, E): [sa q,k,v,o | ca q,k,v,o], (in,out) layout
        vec = vec_ref[l]     # (15, 1, E): biases / ff_b2 / LayerNorm params
        w1 = fw1_ref[l]      # (E, F)
        w2 = fw2_ref[l]      # (F, E)
        b1 = fb1_ref[l]      # (1, F)

        # --- masked self-attention (+ dropout p=0) -> add & LayerNorm ---
        a1 = _attention(x, x, aw[0], aw[1], aw[2], aw[3],
                        vec[0], vec[1], vec[2], vec[3],
                        self_mask, num_heads, scale)
        x2 = _add_ln(a1, x, vec[9], vec[10])

        # --- cross-attention with encoder output (no causal mask) -> add & LayerNorm ---
        a2 = _attention(x2, enc, aw[4], aw[5], aw[6], aw[7],
                        vec[4], vec[5], vec[6], vec[7],
                        cross_mask, num_heads, scale)
        x4 = _add_ln(x2, a2, vec[11], vec[12])

        # --- feed-forward (Linear -> ReLU -> Linear) -> add & LayerNorm ---
        h = jnp.maximum(jnp.dot(x4, w1, preferred_element_type=jnp.float32) + b1, 0.0)
        f = jnp.dot(h, w2, preferred_element_type=jnp.float32) + vec[8]
        x = _add_ln(x4, f, vec[13], vec[14])

    # --- final projection to the (lane-padded) vocabulary: one lane-dense store ---
    logits = jnp.dot(x, pw_ref[...], preferred_element_type=jnp.float32) + pb_ref[...]
    o_ref[...] = logits.astype(o_ref.dtype)


# ----------------------------------------------------------------------------
# Parameter construction (deterministic, synthetic).  All projection weights are
# stored pre-transposed in (in, out) layout so kernels compute x @ W directly.
#
# vec_e layout along axis 1:
#   0-3  self-attn  bq, bk, bv, bo
#   4-7  cross-attn bq, bk, bv, bo
#   8    ff_b2
#   9/10 ln1 gamma/beta, 11/12 ln2 gamma/beta, 13/14 ln3 gamma/beta
# ----------------------------------------------------------------------------
def make_decoder_params(key, num_layers, emp_dim, ff_dim, vocab_len, lane=128):
    E, F, L = emp_dim, ff_dim, num_layers
    v_pad = ((vocab_len + lane - 1) // lane) * lane
    k_aw, k_f1, k_f2, k_pw = jax.random.split(key, 4)

    attn_w = jax.random.normal(k_aw, (L, 8, E, E), jnp.float32) * 0.1
    ff_w1 = jax.random.normal(k_f1, (L, E, F), jnp.float32) * 0.1
    ff_w2 = jax.random.normal(k_f2, (L, F, E), jnp.float32) * 0.1
    ff_b1 = jnp.zeros((L, 1, F), jnp.float32)

    vec_e = jnp.zeros((L, 15, 1, E), jnp.float32)
    ones = jnp.ones((L, 1, E), jnp.float32)
    vec_e = vec_e.at[:, 9].set(ones).at[:, 11].set(ones).at[:, 13].set(ones)  # LN gammas

    proj_w = jax.random.normal(k_pw, (E, v_pad), jnp.float32) * 0.1
    proj_w = proj_w.at[:, vocab_len:].set(0.0)          # padded vocab columns are zero
    proj_b = jnp.zeros((1, v_pad), jnp.float32)

    return dict(attn_w=attn_w, ff_w1=ff_w1, ff_w2=ff_w2, ff_b1=ff_b1,
                vec_e=vec_e, proj_w=proj_w, proj_b=proj_b)


# ----------------------------------------------------------------------------
# Forward pass (mirrors Decoder.forward): one pallas_call for the whole model
# ----------------------------------------------------------------------------
def decoder_forward(params, dec_inp, enc_inp, *, num_heads, vocab_len):
    N, Kq, E = dec_inp.shape
    Kk = enc_inp.shape[1]
    L = params["attn_w"].shape[0]
    v_pad = params["proj_w"].shape[1]

    kernel = functools.partial(decoder_kernel, num_heads=num_heads, num_layers=L,
                               batch=N, seq_q=Kq, seq_k=Kk)
    logits = pl.pallas_call(
        kernel,
        out_shape=jax.ShapeDtypeStruct((N * Kq, v_pad), dec_inp.dtype),
    )(dec_inp.reshape(N * Kq, E), enc_inp.reshape(N * Kk, E),
      params["attn_w"], params["ff_w1"], params["ff_w2"], params["ff_b1"],
      params["vec_e"], params["proj_w"], params["proj_b"])

    # slice off the lane padding of the vocab projection and restore (N, K, V)
    return logits[:, :vocab_len].reshape(N, Kq, vocab_len)


# ----------------------------------------------------------------------------
# Main
# ----------------------------------------------------------------------------
if __name__ == "__main__":
    num_layers = 2
    num_heads = 4
    emp_dim = 32
    feedforward_dim = 64
    vocab_len = 64
    N, K = 2, 8

    root = jax.random.PRNGKey(0)
    k_dec, k_enc, k_param = jax.random.split(root, 3)

    dec_inp = jax.random.normal(k_dec, (N, K, emp_dim), dtype=jnp.float32)
    enc_inp = jax.random.normal(k_enc, (N, K, emp_dim), dtype=jnp.float32)
    params = make_decoder_params(k_param, num_layers, emp_dim, feedforward_dim, vocab_len)

    fwd = jax.jit(functools.partial(decoder_forward, num_heads=num_heads, vocab_len=vocab_len))
    out = jax.block_until_ready(fwd(params, dec_inp, enc_inp))

    assert out.shape == (N, K, vocab_len)
    assert bool(jnp.all(jnp.isfinite(out)))
    print("KERNEL_OK")
</pallas_src>

<mosaic_0001>
module attributes {stable_mosaic.version = 11 : i64} {
  func.func @decoder_kernel(%arg0: memref<16x32xf32, #tpu.memory_space<vmem>>, %arg1: memref<16x32xf32, #tpu.memory_space<vmem>>, %arg2: memref<2x8x32x32xf32, #tpu.memory_space<vmem>>, %arg3: memref<2x32x64xf32, #tpu.memory_space<vmem>>, %arg4: memref<2x64x32xf32, #tpu.memory_space<vmem>>, %arg5: memref<2x1x64xf32, #tpu.memory_space<vmem>>, %arg6: memref<2x15x1x32xf32, #tpu.memory_space<vmem>>, %arg7: memref<32x128xf32, #tpu.memory_space<vmem>>, %arg8: memref<1x128xf32, #tpu.memory_space<vmem>>, %arg9: memref<16x128xf32, #tpu.memory_space<vmem>>) attributes {dimension_semantics = [], scalar_prefetch = 0 : i64, scratch_operands = 0 : i64, tpu.core_type = #tpu.core_type<tc>} {
    %c0 = arith.constant 0 : index
    %c0_0 = arith.constant 0 : index
    %0 = vector.load %arg0[%c0, %c0_0] : memref<16x32xf32, #tpu.memory_space<vmem>>, vector<16x32xf32>
    %c0_1 = arith.constant 0 : index
    %c0_2 = arith.constant 0 : index
    %1 = vector.load %arg1[%c0_1, %c0_2] : memref<16x32xf32, #tpu.memory_space<vmem>>, vector<16x32xf32>
    %2 = tpu.iota {dimensions = array<i32: 0>} : vector<16x16xi32>
    %3 = tpu.iota {dimensions = array<i32: 1>} : vector<16x16xi32>
    %4 = tpu.iota {dimensions = array<i32: 0>} : vector<16x16xi32>
    %5 = tpu.iota {dimensions = array<i32: 1>} : vector<16x16xi32>
    %false = arith.constant false
    %6 = vector.broadcast %false : i1 to vector<16x16xi1>
    %false_3 = arith.constant false
    %7 = vector.broadcast %false_3 : i1 to vector<16x16xi1>
    %c0_i32 = arith.constant 0 : i32
    %8 = vector.broadcast %c0_i32 : i32 to vector<16x16xi32>
    %9 = arith.cmpi sge, %2, %8 : vector<16x16xi32>
    %c8_i32 = arith.constant 8 : i32
    %10 = vector.broadcast %c8_i32 : i32 to vector<16x16xi32>
    %11 = arith.cmpi slt, %2, %10 : vector<16x16xi32>
    %12 = arith.andi %9, %11 : vector<16x16xi1>
    %c0_i32_4 = arith.constant 0 : i32
    %13 = vector.broadcast %c0_i32_4 : i32 to vector<16x16xi32>
    %14 = arith.cmpi sge, %3, %13 : vector<16x16xi32>
    %15 = arith.andi %12, %14 : vector<16x16xi1>
    %c8_i32_5 = arith.constant 8 : i32
    %16 = vector.broadcast %c8_i32_5 : i32 to vector<16x16xi32>
    %17 = arith.cmpi slt, %3, %16 : vector<16x16xi32>
    %18 = arith.andi %15, %17 : vector<16x16xi1>
    %19 = arith.ori %6, %18 : vector<16x16xi1>
    %c0_i32_6 = arith.constant 0 : i32
    %20 = vector.broadcast %c0_i32_6 : i32 to vector<16x16xi32>
    %21 = arith.cmpi sge, %4, %20 : vector<16x16xi32>
    %c8_i32_7 = arith.constant 8 : i32
    %22 = vector.broadcast %c8_i32_7 : i32 to vector<16x16xi32>
    %23 = arith.cmpi slt, %4, %22 : vector<16x16xi32>
    %24 = arith.andi %21, %23 : vector<16x16xi1>
    %c0_i32_8 = arith.constant 0 : i32
    %25 = vector.broadcast %c0_i32_8 : i32 to vector<16x16xi32>
    %26 = arith.cmpi sge, %5, %25 : vector<16x16xi32>
    %27 = arith.andi %24, %26 : vector<16x16xi1>
    %c8_i32_9 = arith.constant 8 : i32
    %28 = vector.broadcast %c8_i32_9 : i32 to vector<16x16xi32>
    %29 = arith.cmpi slt, %5, %28 : vector<16x16xi32>
    %30 = arith.andi %27, %29 : vector<16x16xi1>
    %31 = arith.ori %7, %30 : vector<16x16xi1>
    %c8_i32_10 = arith.constant 8 : i32
    %32 = vector.broadcast %c8_i32_10 : i32 to vector<16x16xi32>
    %33 = arith.cmpi sge, %2, %32 : vector<16x16xi32>
    %c16_i32 = arith.constant 16 : i32
    %34 = vector.broadcast %c16_i32 : i32 to vector<16x16xi32>
    %35 = arith.cmpi slt, %2, %34 : vector<16x16xi32>
    %36 = arith.andi %33, %35 : vector<16x16xi1>
    %c8_i32_11 = arith.constant 8 : i32
    %37 = vector.broadcast %c8_i32_11 : i32 to vector<16x16xi32>
    %38 = arith.cmpi sge, %3, %37 : vector<16x16xi32>
    %39 = arith.andi %36, %38 : vector<16x16xi1>
    %c16_i32_12 = arith.constant 16 : i32
    %40 = vector.broadcast %c16_i32_12 : i32 to vector<16x16xi32>
    %41 = arith.cmpi slt, %3, %40 : vector<16x16xi32>
    %42 = arith.andi %39, %41 : vector<16x16xi1>
    %43 = arith.ori %19, %42 : vector<16x16xi1>
    %c8_i32_13 = arith.constant 8 : i32
    %44 = vector.broadcast %c8_i32_13 : i32 to vector<16x16xi32>
    %45 = arith.cmpi sge, %4, %44 : vector<16x16xi32>
    %c16_i32_14 = arith.constant 16 : i32
    %46 = vector.broadcast %c16_i32_14 : i32 to vector<16x16xi32>
    %47 = arith.cmpi slt, %4, %46 : vector<16x16xi32>
    %48 = arith.andi %45, %47 : vector<16x16xi1>
    %c8_i32_15 = arith.constant 8 : i32
    %49 = vector.broadcast %c8_i32_15 : i32 to vector<16x16xi32>
    %50 = arith.cmpi sge, %5, %49 : vector<16x16xi32>
    %51 = arith.andi %48, %50 : vector<16x16xi1>
    %c16_i32_16 = arith.constant 16 : i32
    %52 = vector.broadcast %c16_i32_16 : i32 to vector<16x16xi32>
    %53 = arith.cmpi slt, %5, %52 : vector<16x16xi32>
    %54 = arith.andi %51, %53 : vector<16x16xi1>
    %55 = arith.ori %31, %54 : vector<16x16xi1>
    %56 = arith.cmpi sle, %3, %2 : vector<16x16xi32>
    %57 = arith.andi %43, %56 : vector<16x16xi1>
    %cst = arith.constant 0.000000e+00 : f32
    %cst_17 = arith.constant -1.000000e+09 : f32
    %58 = vector.broadcast %cst : f32 to vector<16x16xf32>
    %59 = vector.broadcast %cst_17 : f32 to vector<16x16xf32>
    %60 = arith.select %57, %58, %59 : vector<16x16xi1>, vector<16x16xf32>
    %cst_18 = arith.constant 0.000000e+00 : f32
    %cst_19 = arith.constant -1.000000e+09 : f32
    %61 = vector.broadcast %cst_18 : f32 to vector<16x16xf32>
    %62 = vector.broadcast %cst_19 : f32 to vector<16x16xf32>
    %63 = arith.select %55, %61, %62 : vector<16x16xi1>, vector<16x16xf32>
    %c0_20 = arith.constant 0 : index
    %c0_21 = arith.constant 0 : index
    %c0_22 = arith.constant 0 : index
    %c0_23 = arith.constant 0 : index
    %64 = vector.load %arg2[%c0_20, %c0_21, %c0_22, %c0_23] : memref<2x8x32x32xf32, #tpu.memory_space<vmem>>, vector<1x8x32x32xf32>
    %65 = vector.shape_cast %64 : vector<1x8x32x32xf32> to vector<8x32x32xf32>
    %c0_24 = arith.constant 0 : index
    %c0_25 = arith.constant 0 : index
    %c0_26 = arith.constant 0 : index
    %c0_27 = arith.constant 0 : index
    %66 = vector.load %arg6[%c0_24, %c0_25, %c0_26, %c0_27] : memref<2x15x1x32xf32, #tpu.memory_space<vmem>>, vector<1x15x1x32xf32>
    %67 = vector.shape_cast %66 : vector<1x15x1x32xf32> to vector<15x1x32xf32>
    %c0_28 = arith.constant 0 : index
    %c0_29 = arith.constant 0 : index
    %c0_30 = arith.constant 0 : index
    %68 = vector.load %arg3[%c0_28, %c0_29, %c0_30] : memref<2x32x64xf32, #tpu.memory_space<vmem>>, vector<1x32x64xf32>
    %69 = vector.shape_cast %68 : vector<1x32x64xf32> to vector<32x64xf32>
    %c0_31 = arith.constant 0 : index
    %c0_32 = arith.constant 0 : index
    %c0_33 = arith.constant 0 : index
    %70 = vector.load %arg4[%c0_31, %c0_32, %c0_33] : memref<2x64x32xf32, #tpu.memory_space<vmem>>, vector<1x64x32xf32>
    %71 = vector.shape_cast %70 : vector<1x64x32xf32> to vector<64x32xf32>
    %c0_34 = arith.constant 0 : index
    %c0_35 = arith.constant 0 : index
    %c0_36 = arith.constant 0 : index
    %72 = vector.load %arg5[%c0_34, %c0_35, %c0_36] : memref<2x1x64xf32, #tpu.memory_space<vmem>>, vector<1x1x64xf32>
    %73 = vector.shape_cast %72 : vector<1x1x64xf32> to vector<1x64xf32>
    %74 = vector.extract_strided_slice %65 {offsets = [0, 0, 0], sizes = [1, 32, 32], strides = [1, 1, 1]} : vector<8x32x32xf32> to vector<1x32x32xf32>
    %75 = vector.shape_cast %74 : vector<1x32x32xf32> to vector<32x32xf32>
    %76 = vector.extract_strided_slice %65 {offsets = [1, 0, 0], sizes = [1, 32, 32], strides = [1, 1, 1]} : vector<8x32x32xf32> to vector<1x32x32xf32>
    %77 = vector.shape_cast %76 : vector<1x32x32xf32> to vector<32x32xf32>
    %78 = vector.extract_strided_slice %65 {offsets = [2, 0, 0], sizes = [1, 32, 32], strides = [1, 1, 1]} : vector<8x32x32xf32> to vector<1x32x32xf32>
    %79 = vector.shape_cast %78 : vector<1x32x32xf32> to vector<32x32xf32>
    %80 = vector.extract_strided_slice %65 {offsets = [3, 0, 0], sizes = [1, 32, 32], strides = [1, 1, 1]} : vector<8x32x32xf32> to vector<1x32x32xf32>
    %81 = vector.shape_cast %80 : vector<1x32x32xf32> to vector<32x32xf32>
    %82 = vector.extract_strided_slice %67 {offsets = [0, 0, 0], sizes = [1, 1, 32], strides = [1, 1, 1]} : vector<15x1x32xf32> to vector<1x1x32xf32>
    %83 = vector.shape_cast %82 : vector<1x1x32xf32> to vector<1x32xf32>
    %84 = vector.extract_strided_slice %67 {offsets = [1, 0, 0], sizes = [1, 1, 32], strides = [1, 1, 1]} : vector<15x1x32xf32> to vector<1x1x32xf32>
    %85 = vector.shape_cast %84 : vector<1x1x32xf32> to vector<1x32xf32>
    %86 = vector.extract_strided_slice %67 {offsets = [2, 0, 0], sizes = [1, 1, 32], strides = [1, 1, 1]} : vector<15x1x32xf32> to vector<1x1x32xf32>
    %87 = vector.shape_cast %86 : vector<1x1x32xf32> to vector<1x32xf32>
    %88 = vector.extract_strided_slice %67 {offsets = [3, 0, 0], sizes = [1, 1, 32], strides = [1, 1, 1]} : vector<15x1x32xf32> to vector<1x1x32xf32>
    %89 = vector.shape_cast %88 : vector<1x1x32xf32> to vector<1x32xf32>
    %cst_37 = arith.constant dense<0.000000e+00> : vector<16x32xf32>
    %90 = tpu.matmul %0, %75, %cst_37 {dimension_numbers = #tpu.dot_dimension_numbers<[1], [0], [0], [1], [0, 0, 1, 1], [], []>} : vector<16x32xf32>, vector<32x32xf32>, vector<16x32xf32> -> vector<16x32xf32>
    %91 = vector.broadcast %83 : vector<1x32xf32> to vector<16x32xf32>
    %92 = arith.addf %90, %91 : vector<16x32xf32>
    %cst_38 = arith.constant 0.353553385 : f32
    %93 = vector.broadcast %cst_38 : f32 to vector<16x32xf32>
    %94 = arith.mulf %92, %93 : vector<16x32xf32>
    %cst_39 = arith.constant dense<0.000000e+00> : vector<16x32xf32>
    %95 = tpu.matmul %0, %77, %cst_39 {dimension_numbers = #tpu.dot_dimension_numbers<[1], [0], [0], [1], [0, 0, 1, 1], [], []>} : vector<16x32xf32>, vector<32x32xf32>, vector<16x32xf32> -> vector<16x32xf32>
    %96 = vector.broadcast %85 : vector<1x32xf32> to vector<16x32xf32>
    %97 = arith.addf %95, %96 : vector<16x32xf32>
    %cst_40 = arith.constant dense<0.000000e+00> : vector<16x32xf32>
    %98 = tpu.matmul %0, %79, %cst_40 {dimension_numbers = #tpu.dot_dimension_numbers<[1], [0], [0], [1], [0, 0, 1, 1], [], []>} : vector<16x32xf32>, vector<32x32xf32>, vector<16x32xf32> -> vector<16x32xf32>
    %99 = vector.broadcast %87 : vector<1x32xf32> to vector<16x32xf32>
    %100 = arith.addf %98, %99 : vector<16x32xf32>
    %101 = vector.shape_cast %94 : vector<16x32xf32> to vector<16x4x8xf32>
    %102 = vector.shape_cast %97 : vector<16x32xf32> to vector<16x4x8xf32>
    %103 = vector.shape_cast %100 : vector<16x32xf32> to vector<16x4x8xf32>
    "tpu.trace_start"() <{level = 10 : i32, message = "qhd,khd->hqk"}> : () -> ()
    %cst_41 = arith.constant dense<0.000000e+00> : vector<4x16x16xf32>
    %104 = tpu.matmul %101, %102, %cst_41 {dimension_numbers = #tpu.dot_dimension_numbers<[2], [2], [0], [0], [0, 1, 0, 0, 1, 0], [1], [1]>} : vector<16x4x8xf32>, vector<16x4x8xf32>, vector<4x16x16xf32> -> vector<4x16x16xf32>
    "tpu.trace_stop"() : () -> ()
    %105 = vector.shape_cast %60 : vector<16x16xf32> to vector<1x16x16xf32>
    %106 = vector.broadcast %105 : vector<1x16x16xf32> to vector<4x16x16xf32>
    %107 = arith.addf %104, %106 : vector<4x16x16xf32>
    %cst_42 = arith.constant dense<0xFF800000> : vector<4x16xf32>
    %108 = vector.multi_reduction <maximumf>, %107, %cst_42 [2] : vector<4x16x16xf32> to vector<4x16xf32>
    %109 = vector.shape_cast %108 : vector<4x16xf32> to vector<4x16x1xf32>
    %110 = vector.broadcast %109 : vector<4x16x1xf32> to vector<4x16x16xf32>
    %111 = arith.subf %107, %110 : vector<4x16x16xf32>
    %112 = math.exp %111 : vector<4x16x16xf32>
    %cst_43 = arith.constant dense<0.000000e+00> : vector<4x16xf32>
    %113 = vector.multi_reduction <add>, %112, %cst_43 [2] : vector<4x16x16xf32> to vector<4x16xf32>
    %114 = vector.shape_cast %113 : vector<4x16xf32> to vector<4x16x1xf32>
    %115 = tpu.reciprocal %114 {approx = true} : vector<4x16x1xf32> -> vector<4x16x1xf32>
    %116 = vector.broadcast %115 : vector<4x16x1xf32> to vector<4x16x16xf32>
    %117 = arith.mulf %112, %116 : vector<4x16x16xf32>
    "tpu.trace_start"() <{level = 10 : i32, message = "hqk,khd->qhd"}> : () -> ()
    %cst_44 = arith.constant dense<0.000000e+00> : vector<4x8x16xf32>
    %118 = tpu.matmul %103, %117, %cst_44 {dimension_numbers = #tpu.dot_dimension_numbers<[0], [2], [2], [1], [0, 1, 0, 2, 1, 1], [1], [0]>} : vector<16x4x8xf32>, vector<4x16x16xf32>, vector<4x8x16xf32> -> vector<4x8x16xf32>
    %119 = tpu.transpose %118, [2, 0, 1] : vector<4x8x16xf32> -> vector<16x4x8xf32>
    "tpu.trace_stop"() : () -> ()
    %120 = vector.shape_cast %119 : vector<16x4x8xf32> to vector<16x32xf32>
    %cst_45 = arith.constant dense<0.000000e+00> : vector<16x32xf32>
    %121 = tpu.matmul %120, %81, %cst_45 {dimension_numbers = #tpu.dot_dimension_numbers<[1], [0], [0], [1], [0, 0, 1, 1], [], []>} : vector<16x32xf32>, vector<32x32xf32>, vector<16x32xf32> -> vector<16x32xf32>
    %122 = vector.broadcast %89 : vector<1x32xf32> to vector<16x32xf32>
    %123 = arith.addf %121, %122 : vector<16x32xf32>
    %124 = vector.extract_strided_slice %67 {offsets = [9, 0, 0], sizes = [1, 1, 32], strides = [1, 1, 1]} : vector<15x1x32xf32> to vector<1x1x32xf32>
    %125 = vector.shape_cast %124 : vector<1x1x32xf32> to vector<1x32xf32>
    %126 = vector.extract_strided_slice %67 {offsets = [10, 0, 0], sizes = [1, 1, 32], strides = [1, 1, 1]} : vector<15x1x32xf32> to vector<1x1x32xf32>
    %127 = vector.shape_cast %126 : vector<1x1x32xf32> to vector<1x32xf32>
    %128 = arith.addf %123, %0 : vector<16x32xf32>
    %cst_46 = arith.constant dense<0.000000e+00> : vector<16xf32>
    %129 = vector.multi_reduction <add>, %128, %cst_46 [1] : vector<16x32xf32> to vector<16xf32>
    %130 = vector.shape_cast %129 : vector<16xf32> to vector<16x1xf32>
    %cst_47 = arith.constant 3.200000e+01 : f32
    %131 = vector.broadcast %cst_47 : f32 to vector<16x1xf32>
    %132 = arith.divf %130, %131 : vector<16x1xf32>
    %133 = vector.broadcast %132 : vector<16x1xf32> to vector<16x32xf32>
    %134 = arith.subf %128, %133 : vector<16x32xf32>
    %135 = arith.mulf %134, %134 : vector<16x32xf32>
    %cst_48 = arith.constant dense<0.000000e+00> : vector<16xf32>
    %136 = vector.multi_reduction <add>, %135, %cst_48 [1] : vector<16x32xf32> to vector<16xf32>
    %137 = vector.shape_cast %136 : vector<16xf32> to vector<16x1xf32>
    %cst_49 = arith.constant 3.200000e+01 : f32
    %138 = vector.broadcast %cst_49 : f32 to vector<16x1xf32>
    %139 = arith.divf %137, %138 : vector<16x1xf32>
    %140 = vector.broadcast %132 : vector<16x1xf32> to vector<16x32xf32>
    %141 = arith.subf %128, %140 : vector<16x32xf32>
    %cst_50 = arith.constant 9.99999974E-6 : f32
    %142 = vector.broadcast %cst_50 : f32 to vector<16x1xf32>
    %143 = arith.addf %139, %142 : vector<16x1xf32>
    %144 = math.rsqrt %143 : vector<16x1xf32>
    %145 = vector.broadcast %144 : vector<16x1xf32> to vector<16x32xf32>
    %146 = arith.mulf %141, %145 : vector<16x32xf32>
    %147 = vector.broadcast %125 : vector<1x32xf32> to vector<16x32xf32>
    %148 = arith.mulf %146, %147 : vector<16x32xf32>
    %149 = vector.broadcast %127 : vector<1x32xf32> to vector<16x32xf32>
    %150 = arith.addf %148, %149 : vector<16x32xf32>
    %151 = vector.extract_strided_slice %65 {offsets = [4, 0, 0], sizes = [1, 32, 32], strides = [1, 1, 1]} : vector<8x32x32xf32> to vector<1x32x32xf32>
    %152 = vector.shape_cast %151 : vector<1x32x32xf32> to vector<32x32xf32>
    %153 = vector.extract_strided_slice %65 {offsets = [5, 0, 0], sizes = [1, 32, 32], strides = [1, 1, 1]} : vector<8x32x32xf32> to vector<1x32x32xf32>
    %154 = vector.shape_cast %153 : vector<1x32x32xf32> to vector<32x32xf32>
    %155 = vector.extract_strided_slice %65 {offsets = [6, 0, 0], sizes = [1, 32, 32], strides = [1, 1, 1]} : vector<8x32x32xf32> to vector<1x32x32xf32>
    %156 = vector.shape_cast %155 : vector<1x32x32xf32> to vector<32x32xf32>
    %157 = vector.extract_strided_slice %65 {offsets = [7, 0, 0], sizes = [1, 32, 32], strides = [1, 1, 1]} : vector<8x32x32xf32> to vector<1x32x32xf32>
    %158 = vector.shape_cast %157 : vector<1x32x32xf32> to vector<32x32xf32>
    %159 = vector.extract_strided_slice %67 {offsets = [4, 0, 0], sizes = [1, 1, 32], strides = [1, 1, 1]} : vector<15x1x32xf32> to vector<1x1x32xf32>
    %160 = vector.shape_cast %159 : vector<1x1x32xf32> to vector<1x32xf32>
    %161 = vector.extract_strided_slice %67 {offsets = [5, 0, 0], sizes = [1, 1, 32], strides = [1, 1, 1]} : vector<15x1x32xf32> to vector<1x1x32xf32>
    %162 = vector.shape_cast %161 : vector<1x1x32xf32> to vector<1x32xf32>
    %163 = vector.extract_strided_slice %67 {offsets = [6, 0, 0], sizes = [1, 1, 32], strides = [1, 1, 1]} : vector<15x1x32xf32> to vector<1x1x32xf32>
    %164 = vector.shape_cast %163 : vector<1x1x32xf32> to vector<1x32xf32>
    %165 = vector.extract_strided_slice %67 {offsets = [7, 0, 0], sizes = [1, 1, 32], strides = [1, 1, 1]} : vector<15x1x32xf32> to vector<1x1x32xf32>
    %166 = vector.shape_cast %165 : vector<1x1x32xf32> to vector<1x32xf32>
    %cst_51 = arith.constant dense<0.000000e+00> : vector<16x32xf32>
    %167 = tpu.matmul %150, %152, %cst_51 {dimension_numbers = #tpu.dot_dimension_numbers<[1], [0], [0], [1], [0, 0, 1, 1], [], []>} : vector<16x32xf32>, vector<32x32xf32>, vector<16x32xf32> -> vector<16x32xf32>
    %168 = vector.broadcast %160 : vector<1x32xf32> to vector<16x32xf32>
    %169 = arith.addf %167, %168 : vector<16x32xf32>
    %cst_52 = arith.constant 0.353553385 : f32
    %170 = vector.broadcast %cst_52 : f32 to vector<16x32xf32>
    %171 = arith.mulf %169, %170 : vector<16x32xf32>
    %cst_53 = arith.constant dense<0.000000e+00> : vector<16x32xf32>
    %172 = tpu.matmul %1, %154, %cst_53 {dimension_numbers = #tpu.dot_dimension_numbers<[1], [0], [0], [1], [0, 0, 1, 1], [], []>} : vector<16x32xf32>, vector<32x32xf32>, vector<16x32xf32> -> vector<16x32xf32>
    %173 = vector.broadcast %162 : vector<1x32xf32> to vector<16x32xf32>
    %174 = arith.addf %172, %173 : vector<16x32xf32>
    %cst_54 = arith.constant dense<0.000000e+00> : vector<16x32xf32>
    %175 = tpu.matmul %1, %156, %cst_54 {dimension_numbers = #tpu.dot_dimension_numbers<[1], [0], [0], [1], [0, 0, 1, 1], [], []>} : vector<16x32xf32>, vector<32x32xf32>, vector<16x32xf32> -> vector<16x32xf32>
    %176 = vector.broadcast %164 : vector<1x32xf32> to vector<16x32xf32>
    %177 = arith.addf %175, %176 : vector<16x32xf32>
    %178 = vector.shape_cast %171 : vector<16x32xf32> to vector<16x4x8xf32>
    %179 = vector.shape_cast %174 : vector<16x32xf32> to vector<16x4x8xf32>
    %180 = vector.shape_cast %177 : vector<16x32xf32> to vector<16x4x8xf32>
    "tpu.trace_start"() <{level = 10 : i32, message = "qhd,khd->hqk"}> : () -> ()
    %cst_55 = arith.constant dense<0.000000e+00> : vector<4x16x16xf32>
    %181 = tpu.matmul %178, %179, %cst_55 {dimension_numbers = #tpu.dot_dimension_numbers<[2], [2], [0], [0], [0, 1, 0, 0, 1, 0], [1], [1]>} : vector<16x4x8xf32>, vector<16x4x8xf32>, vector<4x16x16xf32> -> vector<4x16x16xf32>
    "tpu.trace_stop"() : () -> ()
    %182 = vector.shape_cast %63 : vector<16x16xf32> to vector<1x16x16xf32>
    %183 = vector.broadcast %182 : vector<1x16x16xf32> to vector<4x16x16xf32>
    %184 = arith.addf %181, %183 : vector<4x16x16xf32>
    %cst_56 = arith.constant dense<0xFF800000> : vector<4x16xf32>
    %185 = vector.multi_reduction <maximumf>, %184, %cst_56 [2] : vector<4x16x16xf32> to vector<4x16xf32>
    %186 = vector.shape_cast %185 : vector<4x16xf32> to vector<4x16x1xf32>
    %187 = vector.broadcast %186 : vector<4x16x1xf32> to vector<4x16x16xf32>
    %188 = arith.subf %184, %187 : vector<4x16x16xf32>
    %189 = math.exp %188 : vector<4x16x16xf32>
    %cst_57 = arith.constant dense<0.000000e+00> : vector<4x16xf32>
    %190 = vector.multi_reduction <add>, %189, %cst_57 [2] : vector<4x16x16xf32> to vector<4x16xf32>
    %191 = vector.shape_cast %190 : vector<4x16xf32> to vector<4x16x1xf32>
    %192 = tpu.reciprocal %191 {approx = true} : vector<4x16x1xf32> -> vector<4x16x1xf32>
    %193 = vector.broadcast %192 : vector<4x16x1xf32> to vector<4x16x16xf32>
    %194 = arith.mulf %189, %193 : vector<4x16x16xf32>
    "tpu.trace_start"() <{level = 10 : i32, message = "hqk,khd->qhd"}> : () -> ()
    %cst_58 = arith.constant dense<0.000000e+00> : vector<4x8x16xf32>
    %195 = tpu.matmul %180, %194, %cst_58 {dimension_numbers = #tpu.dot_dimension_numbers<[0], [2], [2], [1], [0, 1, 0, 2, 1, 1], [1], [0]>} : vector<16x4x8xf32>, vector<4x16x16xf32>, vector<4x8x16xf32> -> vector<4x8x16xf32>
    %196 = tpu.transpose %195, [2, 0, 1] : vector<4x8x16xf32> -> vector<16x4x8xf32>
    "tpu.trace_stop"() : () -> ()
    %197 = vector.shape_cast %196 : vector<16x4x8xf32> to vector<16x32xf32>
    %cst_59 = arith.constant dense<0.000000e+00> : vector<16x32xf32>
    %198 = tpu.matmul %197, %158, %cst_59 {dimension_numbers = #tpu.dot_dimension_numbers<[1], [0], [0], [1], [0, 0, 1, 1], [], []>} : vector<16x32xf32>, vector<32x32xf32>, vector<16x32xf32> -> vector<16x32xf32>
    %199 = vector.broadcast %166 : vector<1x32xf32> to vector<16x32xf32>
    %200 = arith.addf %198, %199 : vector<16x32xf32>
    %201 = vector.extract_strided_slice %67 {offsets = [11, 0, 0], sizes = [1, 1, 32], strides = [1, 1, 1]} : vector<15x1x32xf32> to vector<1x1x32xf32>
    %202 = vector.shape_cast %201 : vector<1x1x32xf32> to vector<1x32xf32>
    %203 = vector.extract_strided_slice %67 {offsets = [12, 0, 0], sizes = [1, 1, 32], strides = [1, 1, 1]} : vector<15x1x32xf32> to vector<1x1x32xf32>
    %204 = vector.shape_cast %203 : vector<1x1x32xf32> to vector<1x32xf32>
    %205 = arith.addf %150, %200 : vector<16x32xf32>
    %cst_60 = arith.constant dense<0.000000e+00> : vector<16xf32>
    %206 = vector.multi_reduction <add>, %205, %cst_60 [1] : vector<16x32xf32> to vector<16xf32>
    %207 = vector.shape_cast %206 : vector<16xf32> to vector<16x1xf32>
    %cst_61 = arith.constant 3.200000e+01 : f32
    %208 = vector.broadcast %cst_61 : f32 to vector<16x1xf32>
    %209 = arith.divf %207, %208 : vector<16x1xf32>
    %210 = vector.broadcast %209 : vector<16x1xf32> to vector<16x32xf32>
    %211 = arith.subf %205, %210 : vector<16x32xf32>
    %212 = arith.mulf %211, %211 : vector<16x32xf32>
    %cst_62 = arith.constant dense<0.000000e+00> : vector<16xf32>
    %213 = vector.multi_reduction <add>, %212, %cst_62 [1] : vector<16x32xf32> to vector<16xf32>
    %214 = vector.shape_cast %213 : vector<16xf32> to vector<16x1xf32>
    %cst_63 = arith.constant 3.200000e+01 : f32
    %215 = vector.broadcast %cst_63 : f32 to vector<16x1xf32>
    %216 = arith.divf %214, %215 : vector<16x1xf32>
    %217 = vector.broadcast %209 : vector<16x1xf32> to vector<16x32xf32>
    %218 = arith.subf %205, %217 : vector<16x32xf32>
    %cst_64 = arith.constant 9.99999974E-6 : f32
    %219 = vector.broadcast %cst_64 : f32 to vector<16x1xf32>
    %220 = arith.addf %216, %219 : vector<16x1xf32>
    %221 = math.rsqrt %220 : vector<16x1xf32>
    %222 = vector.broadcast %221 : vector<16x1xf32> to vector<16x32xf32>
    %223 = arith.mulf %218, %222 : vector<16x32xf32>
    %224 = vector.broadcast %202 : vector<1x32xf32> to vector<16x32xf32>
    %225 = arith.mulf %223, %224 : vector<16x32xf32>
    %226 = vector.broadcast %204 : vector<1x32xf32> to vector<16x32xf32>
    %227 = arith.addf %225, %226 : vector<16x32xf32>
    %cst_65 = arith.constant dense<0.000000e+00> : vector<16x64xf32>
    %228 = tpu.matmul %227, %69, %cst_65 {dimension_numbers = #tpu.dot_dimension_numbers<[1], [0], [0], [1], [0, 0, 1, 1], [], []>} : vector<16x32xf32>, vector<32x64xf32>, vector<16x64xf32> -> vector<16x64xf32>
    %229 = vector.broadcast %73 : vector<1x64xf32> to vector<16x64xf32>
    %230 = arith.addf %228, %229 : vector<16x64xf32>
    %cst_66 = arith.constant 0.000000e+00 : f32
    %231 = vector.broadcast %cst_66 : f32 to vector<16x64xf32>
    %232 = arith.maximumf %230, %231 : vector<16x64xf32>
    %cst_67 = arith.constant dense<0.000000e+00> : vector<16x32xf32>
    %233 = tpu.matmul %232, %71, %cst_67 {dimension_numbers = #tpu.dot_dimension_numbers<[1], [0], [0], [1], [0, 0, 1, 1], [], []>} : vector<16x64xf32>, vector<64x32xf32>, vector<16x32xf32> -> vector<16x32xf32>
    %234 = vector.extract_strided_slice %67 {offsets = [8, 0, 0], sizes = [1, 1, 32], strides = [1, 1, 1]} : vector<15x1x32xf32> to vector<1x1x32xf32>
    %235 = vector.shape_cast %234 : vector<1x1x32xf32> to vector<1x32xf32>
    %236 = vector.broadcast %235 : vector<1x32xf32> to vector<16x32xf32>
    %237 = arith.addf %233, %236 : vector<16x32xf32>
    %238 = vector.extract_strided_slice %67 {offsets = [13, 0, 0], sizes = [1, 1, 32], strides = [1, 1, 1]} : vector<15x1x32xf32> to vector<1x1x32xf32>
    %239 = vector.shape_cast %238 : vector<1x1x32xf32> to vector<1x32xf32>
    %240 = vector.extract_strided_slice %67 {offsets = [14, 0, 0], sizes = [1, 1, 32], strides = [1, 1, 1]} : vector<15x1x32xf32> to vector<1x1x32xf32>
    %241 = vector.shape_cast %240 : vector<1x1x32xf32> to vector<1x32xf32>
    %242 = arith.addf %227, %237 : vector<16x32xf32>
    %cst_68 = arith.constant dense<0.000000e+00> : vector<16xf32>
    %243 = vector.multi_reduction <add>, %242, %cst_68 [1] : vector<16x32xf32> to vector<16xf32>
    %244 = vector.shape_cast %243 : vector<16xf32> to vector<16x1xf32>
    %cst_69 = arith.constant 3.200000e+01 : f32
    %245 = vector.broadcast %cst_69 : f32 to vector<16x1xf32>
    %246 = arith.divf %244, %245 : vector<16x1xf32>
    %247 = vector.broadcast %246 : vector<16x1xf32> to vector<16x32xf32>
    %248 = arith.subf %242, %247 : vector<16x32xf32>
    %249 = arith.mulf %248, %248 : vector<16x32xf32>
    %cst_70 = arith.constant dense<0.000000e+00> : vector<16xf32>
    %250 = vector.multi_reduction <add>, %249, %cst_70 [1] : vector<16x32xf32> to vector<16xf32>
    %251 = vector.shape_cast %250 : vector<16xf32> to vector<16x1xf32>
    %cst_71 = arith.constant 3.200000e+01 : f32
    %252 = vector.broadcast %cst_71 : f32 to vector<16x1xf32>
    %253 = arith.divf %251, %252 : vector<16x1xf32>
    %254 = vector.broadcast %246 : vector<16x1xf32> to vector<16x32xf32>
    %255 = arith.subf %242, %254 : vector<16x32xf32>
    %cst_72 = arith.constant 9.99999974E-6 : f32
    %256 = vector.broadcast %cst_72 : f32 to vector<16x1xf32>
    %257 = arith.addf %253, %256 : vector<16x1xf32>
    %258 = math.rsqrt %257 : vector<16x1xf32>
    %259 = vector.broadcast %258 : vector<16x1xf32> to vector<16x32xf32>
    %260 = arith.mulf %255, %259 : vector<16x32xf32>
    %261 = vector.broadcast %239 : vector<1x32xf32> to vector<16x32xf32>
    %262 = arith.mulf %260, %261 : vector<16x32xf32>
    %263 = vector.broadcast %241 : vector<1x32xf32> to vector<16x32xf32>
    %264 = arith.addf %262, %263 : vector<16x32xf32>
    %c1 = arith.constant 1 : index
    %c0_73 = arith.constant 0 : index
    %c0_74 = arith.constant 0 : index
    %c0_75 = arith.constant 0 : index
    %265 = vector.load %arg2[%c1, %c0_73, %c0_74, %c0_75] : memref<2x8x32x32xf32, #tpu.memory_space<vmem>>, vector<1x8x32x32xf32>
    %266 = vector.shape_cast %265 : vector<1x8x32x32xf32> to vector<8x32x32xf32>
    %c1_76 = arith.constant 1 : index
    %c0_77 = arith.constant 0 : index
    %c0_78 = arith.constant 0 : index
    %c0_79 = arith.constant 0 : index
    %267 = vector.load %arg6[%c1_76, %c0_77, %c0_78, %c0_79] : memref<2x15x1x32xf32, #tpu.memory_space<vmem>>, vector<1x15x1x32xf32>
    %268 = vector.shape_cast %267 : vector<1x15x1x32xf32> to vector<15x1x32xf32>
    %c1_80 = arith.constant 1 : index
    %c0_81 = arith.constant 0 : index
    %c0_82 = arith.constant 0 : index
    %269 = vector.load %arg3[%c1_80, %c0_81, %c0_82] : memref<2x32x64xf32, #tpu.memory_space<vmem>>, vector<1x32x64xf32>
    %270 = vector.shape_cast %269 : vector<1x32x64xf32> to vector<32x64xf32>
    %c1_83 = arith.constant 1 : index
    %c0_84 = arith.constant 0 : index
    %c0_85 = arith.constant 0 : index
    %271 = vector.load %arg4[%c1_83, %c0_84, %c0_85] : memref<2x64x32xf32, #tpu.memory_space<vmem>>, vector<1x64x32xf32>
    %272 = vector.shape_cast %271 : vector<1x64x32xf32> to vector<64x32xf32>
    %c1_86 = arith.constant 1 : index
    %c0_87 = arith.constant 0 : index
    %c0_88 = arith.constant 0 : index
    %273 = vector.load %arg5[%c1_86, %c0_87, %c0_88] : memref<2x1x64xf32, #tpu.memory_space<vmem>>, vector<1x1x64xf32>
    %274 = vector.shape_cast %273 : vector<1x1x64xf32> to vector<1x64xf32>
    %275 = vector.extract_strided_slice %266 {offsets = [0, 0, 0], sizes = [1, 32, 32], strides = [1, 1, 1]} : vector<8x32x32xf32> to vector<1x32x32xf32>
    %276 = vector.shape_cast %275 : vector<1x32x32xf32> to vector<32x32xf32>
    %277 = vector.extract_strided_slice %266 {offsets = [1, 0, 0], sizes = [1, 32, 32], strides = [1, 1, 1]} : vector<8x32x32xf32> to vector<1x32x32xf32>
    %278 = vector.shape_cast %277 : vector<1x32x32xf32> to vector<32x32xf32>
    %279 = vector.extract_strided_slice %266 {offsets = [2, 0, 0], sizes = [1, 32, 32], strides = [1, 1, 1]} : vector<8x32x32xf32> to vector<1x32x32xf32>
    %280 = vector.shape_cast %279 : vector<1x32x32xf32> to vector<32x32xf32>
    %281 = vector.extract_strided_slice %266 {offsets = [3, 0, 0], sizes = [1, 32, 32], strides = [1, 1, 1]} : vector<8x32x32xf32> to vector<1x32x32xf32>
    %282 = vector.shape_cast %281 : vector<1x32x32xf32> to vector<32x32xf32>
    %283 = vector.extract_strided_slice %268 {offsets = [0, 0, 0], sizes = [1, 1, 32], strides = [1, 1, 1]} : vector<15x1x32xf32> to vector<1x1x32xf32>
    %284 = vector.shape_cast %283 : vector<1x1x32xf32> to vector<1x32xf32>
    %285 = vector.extract_strided_slice %268 {offsets = [1, 0, 0], sizes = [1, 1, 32], strides = [1, 1, 1]} : vector<15x1x32xf32> to vector<1x1x32xf32>
    %286 = vector.shape_cast %285 : vector<1x1x32xf32> to vector<1x32xf32>
    %287 = vector.extract_strided_slice %268 {offsets = [2, 0, 0], sizes = [1, 1, 32], strides = [1, 1, 1]} : vector<15x1x32xf32> to vector<1x1x32xf32>
    %288 = vector.shape_cast %287 : vector<1x1x32xf32> to vector<1x32xf32>
    %289 = vector.extract_strided_slice %268 {offsets = [3, 0, 0], sizes = [1, 1, 32], strides = [1, 1, 1]} : vector<15x1x32xf32> to vector<1x1x32xf32>
    %290 = vector.shape_cast %289 : vector<1x1x32xf32> to vector<1x32xf32>
    %cst_89 = arith.constant dense<0.000000e+00> : vector<16x32xf32>
    %291 = tpu.matmul %264, %276, %cst_89 {dimension_numbers = #tpu.dot_dimension_numbers<[1], [0], [0], [1], [0, 0, 1, 1], [], []>} : vector<16x32xf32>, vector<32x32xf32>, vector<16x32xf32> -> vector<16x32xf32>
    %292 = vector.broadcast %284 : vector<1x32xf32> to vector<16x32xf32>
    %293 = arith.addf %291, %292 : vector<16x32xf32>
    %cst_90 = arith.constant 0.353553385 : f32
    %294 = vector.broadcast %cst_90 : f32 to vector<16x32xf32>
    %295 = arith.mulf %293, %294 : vector<16x32xf32>
    %cst_91 = arith.constant dense<0.000000e+00> : vector<16x32xf32>
    %296 = tpu.matmul %264, %278, %cst_91 {dimension_numbers = #tpu.dot_dimension_numbers<[1], [0], [0], [1], [0, 0, 1, 1], [], []>} : vector<16x32xf32>, vector<32x32xf32>, vector<16x32xf32> -> vector<16x32xf32>
    %297 = vector.broadcast %286 : vector<1x32xf32> to vector<16x32xf32>
    %298 = arith.addf %296, %297 : vector<16x32xf32>
    %cst_92 = arith.constant dense<0.000000e+00> : vector<16x32xf32>
    %299 = tpu.matmul %264, %280, %cst_92 {dimension_numbers = #tpu.dot_dimension_numbers<[1], [0], [0], [1], [0, 0, 1, 1], [], []>} : vector<16x32xf32>, vector<32x32xf32>, vector<16x32xf32> -> vector<16x32xf32>
    %300 = vector.broadcast %288 : vector<1x32xf32> to vector<16x32xf32>
    %301 = arith.addf %299, %300 : vector<16x32xf32>
    %302 = vector.shape_cast %295 : vector<16x32xf32> to vector<16x4x8xf32>
    %303 = vector.shape_cast %298 : vector<16x32xf32> to vector<16x4x8xf32>
    %304 = vector.shape_cast %301 : vector<16x32xf32> to vector<16x4x8xf32>
    "tpu.trace_start"() <{level = 10 : i32, message = "qhd,khd->hqk"}> : () -> ()
    %cst_93 = arith.constant dense<0.000000e+00> : vector<4x16x16xf32>
    %305 = tpu.matmul %302, %303, %cst_93 {dimension_numbers = #tpu.dot_dimension_numbers<[2], [2], [0], [0], [0, 1, 0, 0, 1, 0], [1], [1]>} : vector<16x4x8xf32>, vector<16x4x8xf32>, vector<4x16x16xf32> -> vector<4x16x16xf32>
    "tpu.trace_stop"() : () -> ()
    %306 = vector.shape_cast %60 : vector<16x16xf32> to vector<1x16x16xf32>
    %307 = vector.broadcast %306 : vector<1x16x16xf32> to vector<4x16x16xf32>
    %308 = arith.addf %305, %307 : vector<4x16x16xf32>
    %cst_94 = arith.constant dense<0xFF800000> : vector<4x16xf32>
    %309 = vector.multi_reduction <maximumf>, %308, %cst_94 [2] : vector<4x16x16xf32> to vector<4x16xf32>
    %310 = vector.shape_cast %309 : vector<4x16xf32> to vector<4x16x1xf32>
    %311 = vector.broadcast %310 : vector<4x16x1xf32> to vector<4x16x16xf32>
    %312 = arith.subf %308, %311 : vector<4x16x16xf32>
    %313 = math.exp %312 : vector<4x16x16xf32>
    %cst_95 = arith.constant dense<0.000000e+00> : vector<4x16xf32>
    %314 = vector.multi_reduction <add>, %313, %cst_95 [2] : vector<4x16x16xf32> to vector<4x16xf32>
    %315 = vector.shape_cast %314 : vector<4x16xf32> to vector<4x16x1xf32>
    %316 = tpu.reciprocal %315 {approx = true} : vector<4x16x1xf32> -> vector<4x16x1xf32>
    %317 = vector.broadcast %316 : vector<4x16x1xf32> to vector<4x16x16xf32>
    %318 = arith.mulf %313, %317 : vector<4x16x16xf32>
    "tpu.trace_start"() <{level = 10 : i32, message = "hqk,khd->qhd"}> : () -> ()
    %cst_96 = arith.constant dense<0.000000e+00> : vector<4x8x16xf32>
    %319 = tpu.matmul %304, %318, %cst_96 {dimension_numbers = #tpu.dot_dimension_numbers<[0], [2], [2], [1], [0, 1, 0, 2, 1, 1], [1], [0]>} : vector<16x4x8xf32>, vector<4x16x16xf32>, vector<4x8x16xf32> -> vector<4x8x16xf32>
    %320 = tpu.transpose %319, [2, 0, 1] : vector<4x8x16xf32> -> vector<16x4x8xf32>
    "tpu.trace_stop"() : () -> ()
    %321 = vector.shape_cast %320 : vector<16x4x8xf32> to vector<16x32xf32>
    %cst_97 = arith.constant dense<0.000000e+00> : vector<16x32xf32>
    %322 = tpu.matmul %321, %282, %cst_97 {dimension_numbers = #tpu.dot_dimension_numbers<[1], [0], [0], [1], [0, 0, 1, 1], [], []>} : vector<16x32xf32>, vector<32x32xf32>, vector<16x32xf32> -> vector<16x32xf32>
    %323 = vector.broadcast %290 : vector<1x32xf32> to vector<16x32xf32>
    %324 = arith.addf %322, %323 : vector<16x32xf32>
    %325 = vector.extract_strided_slice %268 {offsets = [9, 0, 0], sizes = [1, 1, 32], strides = [1, 1, 1]} : vector<15x1x32xf32> to vector<1x1x32xf32>
    %326 = vector.shape_cast %325 : vector<1x1x32xf32> to vector<1x32xf32>
    %327 = vector.extract_strided_slice %268 {offsets = [10, 0, 0], sizes = [1, 1, 32], strides = [1, 1, 1]} : vector<15x1x32xf32> to vector<1x1x32xf32>
    %328 = vector.shape_cast %327 : vector<1x1x32xf32> to vector<1x32xf32>
    %329 = arith.addf %324, %264 : vector<16x32xf32>
    %cst_98 = arith.constant dense<0.000000e+00> : vector<16xf32>
    %330 = vector.multi_reduction <add>, %329, %cst_98 [1] : vector<16x32xf32> to vector<16xf32>
    %331 = vector.shape_cast %330 : vector<16xf32> to vector<16x1xf32>
    %cst_99 = arith.constant 3.200000e+01 : f32
    %332 = vector.broadcast %cst_99 : f32 to vector<16x1xf32>
    %333 = arith.divf %331, %332 : vector<16x1xf32>
    %334 = vector.broadcast %333 : vector<16x1xf32> to vector<16x32xf32>
    %335 = arith.subf %329, %334 : vector<16x32xf32>
    %336 = arith.mulf %335, %335 : vector<16x32xf32>
    %cst_100 = arith.constant dense<0.000000e+00> : vector<16xf32>
    %337 = vector.multi_reduction <add>, %336, %cst_100 [1] : vector<16x32xf32> to vector<16xf32>
    %338 = vector.shape_cast %337 : vector<16xf32> to vector<16x1xf32>
    %cst_101 = arith.constant 3.200000e+01 : f32
    %339 = vector.broadcast %cst_101 : f32 to vector<16x1xf32>
    %340 = arith.divf %338, %339 : vector<16x1xf32>
    %341 = vector.broadcast %333 : vector<16x1xf32> to vector<16x32xf32>
    %342 = arith.subf %329, %341 : vector<16x32xf32>
    %cst_102 = arith.constant 9.99999974E-6 : f32
    %343 = vector.broadcast %cst_102 : f32 to vector<16x1xf32>
    %344 = arith.addf %340, %343 : vector<16x1xf32>
    %345 = math.rsqrt %344 : vector<16x1xf32>
    %346 = vector.broadcast %345 : vector<16x1xf32> to vector<16x32xf32>
    %347 = arith.mulf %342, %346 : vector<16x32xf32>
    %348 = vector.broadcast %326 : vector<1x32xf32> to vector<16x32xf32>
    %349 = arith.mulf %347, %348 : vector<16x32xf32>
    %350 = vector.broadcast %328 : vector<1x32xf32> to vector<16x32xf32>
    %351 = arith.addf %349, %350 : vector<16x32xf32>
    %352 = vector.extract_strided_slice %266 {offsets = [4, 0, 0], sizes = [1, 32, 32], strides = [1, 1, 1]} : vector<8x32x32xf32> to vector<1x32x32xf32>
    %353 = vector.shape_cast %352 : vector<1x32x32xf32> to vector<32x32xf32>
    %354 = vector.extract_strided_slice %266 {offsets = [5, 0, 0], sizes = [1, 32, 32], strides = [1, 1, 1]} : vector<8x32x32xf32> to vector<1x32x32xf32>
    %355 = vector.shape_cast %354 : vector<1x32x32xf32> to vector<32x32xf32>
    %356 = vector.extract_strided_slice %266 {offsets = [6, 0, 0], sizes = [1, 32, 32], strides = [1, 1, 1]} : vector<8x32x32xf32> to vector<1x32x32xf32>
    %357 = vector.shape_cast %356 : vector<1x32x32xf32> to vector<32x32xf32>
    %358 = vector.extract_strided_slice %266 {offsets = [7, 0, 0], sizes = [1, 32, 32], strides = [1, 1, 1]} : vector<8x32x32xf32> to vector<1x32x32xf32>
    %359 = vector.shape_cast %358 : vector<1x32x32xf32> to vector<32x32xf32>
    %360 = vector.extract_strided_slice %268 {offsets = [4, 0, 0], sizes = [1, 1, 32], strides = [1, 1, 1]} : vector<15x1x32xf32> to vector<1x1x32xf32>
    %361 = vector.shape_cast %360 : vector<1x1x32xf32> to vector<1x32xf32>
    %362 = vector.extract_strided_slice %268 {offsets = [5, 0, 0], sizes = [1, 1, 32], strides = [1, 1, 1]} : vector<15x1x32xf32> to vector<1x1x32xf32>
    %363 = vector.shape_cast %362 : vector<1x1x32xf32> to vector<1x32xf32>
    %364 = vector.extract_strided_slice %268 {offsets = [6, 0, 0], sizes = [1, 1, 32], strides = [1, 1, 1]} : vector<15x1x32xf32> to vector<1x1x32xf32>
    %365 = vector.shape_cast %364 : vector<1x1x32xf32> to vector<1x32xf32>
    %366 = vector.extract_strided_slice %268 {offsets = [7, 0, 0], sizes = [1, 1, 32], strides = [1, 1, 1]} : vector<15x1x32xf32> to vector<1x1x32xf32>
    %367 = vector.shape_cast %366 : vector<1x1x32xf32> to vector<1x32xf32>
    %cst_103 = arith.constant dense<0.000000e+00> : vector<16x32xf32>
    %368 = tpu.matmul %351, %353, %cst_103 {dimension_numbers = #tpu.dot_dimension_numbers<[1], [0], [0], [1], [0, 0, 1, 1], [], []>} : vector<16x32xf32>, vector<32x32xf32>, vector<16x32xf32> -> vector<16x32xf32>
    %369 = vector.broadcast %361 : vector<1x32xf32> to vector<16x32xf32>
    %370 = arith.addf %368, %369 : vector<16x32xf32>
    %cst_104 = arith.constant 0.353553385 : f32
    %371 = vector.broadcast %cst_104 : f32 to vector<16x32xf32>
    %372 = arith.mulf %370, %371 : vector<16x32xf32>
    %cst_105 = arith.constant dense<0.000000e+00> : vector<16x32xf32>
    %373 = tpu.matmul %1, %355, %cst_105 {dimension_numbers = #tpu.dot_dimension_numbers<[1], [0], [0], [1], [0, 0, 1, 1], [], []>} : vector<16x32xf32>, vector<32x32xf32>, vector<16x32xf32> -> vector<16x32xf32>
    %374 = vector.broadcast %363 : vector<1x32xf32> to vector<16x32xf32>
    %375 = arith.addf %373, %374 : vector<16x32xf32>
    %cst_106 = arith.constant dense<0.000000e+00> : vector<16x32xf32>
    %376 = tpu.matmul %1, %357, %cst_106 {dimension_numbers = #tpu.dot_dimension_numbers<[1], [0], [0], [1], [0, 0, 1, 1], [], []>} : vector<16x32xf32>, vector<32x32xf32>, vector<16x32xf32> -> vector<16x32xf32>
    %377 = vector.broadcast %365 : vector<1x32xf32> to vector<16x32xf32>
    %378 = arith.addf %376, %377 : vector<16x32xf32>
    %379 = vector.shape_cast %372 : vector<16x32xf32> to vector<16x4x8xf32>
    %380 = vector.shape_cast %375 : vector<16x32xf32> to vector<16x4x8xf32>
    %381 = vector.shape_cast %378 : vector<16x32xf32> to vector<16x4x8xf32>
    "tpu.trace_start"() <{level = 10 : i32, message = "qhd,khd->hqk"}> : () -> ()
    %cst_107 = arith.constant dense<0.000000e+00> : vector<4x16x16xf32>
    %382 = tpu.matmul %379, %380, %cst_107 {dimension_numbers = #tpu.dot_dimension_numbers<[2], [2], [0], [0], [0, 1, 0, 0, 1, 0], [1], [1]>} : vector<16x4x8xf32>, vector<16x4x8xf32>, vector<4x16x16xf32> -> vector<4x16x16xf32>
    "tpu.trace_stop"() : () -> ()
    %383 = vector.shape_cast %63 : vector<16x16xf32> to vector<1x16x16xf32>
    %384 = vector.broadcast %383 : vector<1x16x16xf32> to vector<4x16x16xf32>
    %385 = arith.addf %382, %384 : vector<4x16x16xf32>
    %cst_108 = arith.constant dense<0xFF800000> : vector<4x16xf32>
    %386 = vector.multi_reduction <maximumf>, %385, %cst_108 [2] : vector<4x16x16xf32> to vector<4x16xf32>
    %387 = vector.shape_cast %386 : vector<4x16xf32> to vector<4x16x1xf32>
    %388 = vector.broadcast %387 : vector<4x16x1xf32> to vector<4x16x16xf32>
    %389 = arith.subf %385, %388 : vector<4x16x16xf32>
    %390 = math.exp %389 : vector<4x16x16xf32>
    %cst_109 = arith.constant dense<0.000000e+00> : vector<4x16xf32>
    %391 = vector.multi_reduction <add>, %390, %cst_109 [2] : vector<4x16x16xf32> to vector<4x16xf32>
    %392 = vector.shape_cast %391 : vector<4x16xf32> to vector<4x16x1xf32>
    %393 = tpu.reciprocal %392 {approx = true} : vector<4x16x1xf32> -> vector<4x16x1xf32>
    %394 = vector.broadcast %393 : vector<4x16x1xf32> to vector<4x16x16xf32>
    %395 = arith.mulf %390, %394 : vector<4x16x16xf32>
    "tpu.trace_start"() <{level = 10 : i32, message = "hqk,khd->qhd"}> : () -> ()
    %cst_110 = arith.constant dense<0.000000e+00> : vector<4x8x16xf32>
    %396 = tpu.matmul %381, %395, %cst_110 {dimension_numbers = #tpu.dot_dimension_numbers<[0], [2], [2], [1], [0, 1, 0, 2, 1, 1], [1], [0]>} : vector<16x4x8xf32>, vector<4x16x16xf32>, vector<4x8x16xf32> -> vector<4x8x16xf32>
    %397 = tpu.transpose %396, [2, 0, 1] : vector<4x8x16xf32> -> vector<16x4x8xf32>
    "tpu.trace_stop"() : () -> ()
    %398 = vector.shape_cast %397 : vector<16x4x8xf32> to vector<16x32xf32>
    %cst_111 = arith.constant dense<0.000000e+00> : vector<16x32xf32>
    %399 = tpu.matmul %398, %359, %cst_111 {dimension_numbers = #tpu.dot_dimension_numbers<[1], [0], [0], [1], [0, 0, 1, 1], [], []>} : vector<16x32xf32>, vector<32x32xf32>, vector<16x32xf32> -> vector<16x32xf32>
    %400 = vector.broadcast %367 : vector<1x32xf32> to vector<16x32xf32>
    %401 = arith.addf %399, %400 : vector<16x32xf32>
    %402 = vector.extract_strided_slice %268 {offsets = [11, 0, 0], sizes = [1, 1, 32], strides = [1, 1, 1]} : vector<15x1x32xf32> to vector<1x1x32xf32>
    %403 = vector.shape_cast %402 : vector<1x1x32xf32> to vector<1x32xf32>
    %404 = vector.extract_strided_slice %268 {offsets = [12, 0, 0], sizes = [1, 1, 32], strides = [1, 1, 1]} : vector<15x1x32xf32> to vector<1x1x32xf32>
    %405 = vector.shape_cast %404 : vector<1x1x32xf32> to vector<1x32xf32>
    %406 = arith.addf %351, %401 : vector<16x32xf32>
    %cst_112 = arith.constant dense<0.000000e+00> : vector<16xf32>
    %407 = vector.multi_reduction <add>, %406, %cst_112 [1] : vector<16x32xf32> to vector<16xf32>
    %408 = vector.shape_cast %407 : vector<16xf32> to vector<16x1xf32>
    %cst_113 = arith.constant 3.200000e+01 : f32
    %409 = vector.broadcast %cst_113 : f32 to vector<16x1xf32>
    %410 = arith.divf %408, %409 : vector<16x1xf32>
    %411 = vector.broadcast %410 : vector<16x1xf32> to vector<16x32xf32>
    %412 = arith.subf %406, %411 : vector<16x32xf32>
    %413 = arith.mulf %412, %412 : vector<16x32xf32>
    %cst_114 = arith.constant dense<0.000000e+00> : vector<16xf32>
    %414 = vector.multi_reduction <add>, %413, %cst_114 [1] : vector<16x32xf32> to vector<16xf32>
    %415 = vector.shape_cast %414 : vector<16xf32> to vector<16x1xf32>
    %cst_115 = arith.constant 3.200000e+01 : f32
    %416 = vector.broadcast %cst_115 : f32 to vector<16x1xf32>
    %417 = arith.divf %415, %416 : vector<16x1xf32>
    %418 = vector.broadcast %410 : vector<16x1xf32> to vector<16x32xf32>
    %419 = arith.subf %406, %418 : vector<16x32xf32>
    %cst_116 = arith.constant 9.99999974E-6 : f32
    %420 = vector.broadcast %cst_116 : f32 to vector<16x1xf32>
    %421 = arith.addf %417, %420 : vector<16x1xf32>
    %422 = math.rsqrt %421 : vector<16x1xf32>
    %423 = vector.broadcast %422 : vector<16x1xf32> to vector<16x32xf32>
    %424 = arith.mulf %419, %423 : vector<16x32xf32>
    %425 = vector.broadcast %403 : vector<1x32xf32> to vector<16x32xf32>
    %426 = arith.mulf %424, %425 : vector<16x32xf32>
    %427 = vector.broadcast %405 : vector<1x32xf32> to vector<16x32xf32>
    %428 = arith.addf %426, %427 : vector<16x32xf32>
    %cst_117 = arith.constant dense<0.000000e+00> : vector<16x64xf32>
    %429 = tpu.matmul %428, %270, %cst_117 {dimension_numbers = #tpu.dot_dimension_numbers<[1], [0], [0], [1], [0, 0, 1, 1], [], []>} : vector<16x32xf32>, vector<32x64xf32>, vector<16x64xf32> -> vector<16x64xf32>
    %430 = vector.broadcast %274 : vector<1x64xf32> to vector<16x64xf32>
    %431 = arith.addf %429, %430 : vector<16x64xf32>
    %cst_118 = arith.constant 0.000000e+00 : f32
    %432 = vector.broadcast %cst_118 : f32 to vector<16x64xf32>
    %433 = arith.maximumf %431, %432 : vector<16x64xf32>
    %cst_119 = arith.constant dense<0.000000e+00> : vector<16x32xf32>
    %434 = tpu.matmul %433, %272, %cst_119 {dimension_numbers = #tpu.dot_dimension_numbers<[1], [0], [0], [1], [0, 0, 1, 1], [], []>} : vector<16x64xf32>, vector<64x32xf32>, vector<16x32xf32> -> vector<16x32xf32>
    %435 = vector.extract_strided_slice %268 {offsets = [8, 0, 0], sizes = [1, 1, 32], strides = [1, 1, 1]} : vector<15x1x32xf32> to vector<1x1x32xf32>
    %436 = vector.shape_cast %435 : vector<1x1x32xf32> to vector<1x32xf32>
    %437 = vector.broadcast %436 : vector<1x32xf32> to vector<16x32xf32>
    %438 = arith.addf %434, %437 : vector<16x32xf32>
    %439 = vector.extract_strided_slice %268 {offsets = [13, 0, 0], sizes = [1, 1, 32], strides = [1, 1, 1]} : vector<15x1x32xf32> to vector<1x1x32xf32>
    %440 = vector.shape_cast %439 : vector<1x1x32xf32> to vector<1x32xf32>
    %441 = vector.extract_strided_slice %268 {offsets = [14, 0, 0], sizes = [1, 1, 32], strides = [1, 1, 1]} : vector<15x1x32xf32> to vector<1x1x32xf32>
    %442 = vector.shape_cast %441 : vector<1x1x32xf32> to vector<1x32xf32>
    %443 = arith.addf %428, %438 : vector<16x32xf32>
    %cst_120 = arith.constant dense<0.000000e+00> : vector<16xf32>
    %444 = vector.multi_reduction <add>, %443, %cst_120 [1] : vector<16x32xf32> to vector<16xf32>
    %445 = vector.shape_cast %444 : vector<16xf32> to vector<16x1xf32>
    %cst_121 = arith.constant 3.200000e+01 : f32
    %446 = vector.broadcast %cst_121 : f32 to vector<16x1xf32>
    %447 = arith.divf %445, %446 : vector<16x1xf32>
    %448 = vector.broadcast %447 : vector<16x1xf32> to vector<16x32xf32>
    %449 = arith.subf %443, %448 : vector<16x32xf32>
    %450 = arith.mulf %449, %449 : vector<16x32xf32>
    %cst_122 = arith.constant dense<0.000000e+00> : vector<16xf32>
    %451 = vector.multi_reduction <add>, %450, %cst_122 [1] : vector<16x32xf32> to vector<16xf32>
    %452 = vector.shape_cast %451 : vector<16xf32> to vector<16x1xf32>
    %cst_123 = arith.constant 3.200000e+01 : f32
    %453 = vector.broadcast %cst_123 : f32 to vector<16x1xf32>
    %454 = arith.divf %452, %453 : vector<16x1xf32>
    %455 = vector.broadcast %447 : vector<16x1xf32> to vector<16x32xf32>
    %456 = arith.subf %443, %455 : vector<16x32xf32>
    %cst_124 = arith.constant 9.99999974E-6 : f32
    %457 = vector.broadcast %cst_124 : f32 to vector<16x1xf32>
    %458 = arith.addf %454, %457 : vector<16x1xf32>
    %459 = math.rsqrt %458 : vector<16x1xf32>
    %460 = vector.broadcast %459 : vector<16x1xf32> to vector<16x32xf32>
    %461 = arith.mulf %456, %460 : vector<16x32xf32>
    %462 = vector.broadcast %440 : vector<1x32xf32> to vector<16x32xf32>
    %463 = arith.mulf %461, %462 : vector<16x32xf32>
    %464 = vector.broadcast %442 : vector<1x32xf32> to vector<16x32xf32>
    %465 = arith.addf %463, %464 : vector<16x32xf32>
    %c0_125 = arith.constant 0 : index
    %c0_126 = arith.constant 0 : index
    %466 = vector.load %arg7[%c0_125, %c0_126] : memref<32x128xf32, #tpu.memory_space<vmem>>, vector<32x128xf32>
    %cst_127 = arith.constant dense<0.000000e+00> : vector<16x128xf32>
    %467 = tpu.matmul %465, %466, %cst_127 {dimension_numbers = #tpu.dot_dimension_numbers<[1], [0], [0], [1], [0, 0, 1, 1], [], []>} : vector<16x32xf32>, vector<32x128xf32>, vector<16x128xf32> -> vector<16x128xf32>
    %c0_128 = arith.constant 0 : index
    %c0_129 = arith.constant 0 : index
    %468 = vector.load %arg8[%c0_128, %c0_129] : memref<1x128xf32, #tpu.memory_space<vmem>>, vector<1x128xf32>
    %469 = vector.broadcast %468 : vector<1x128xf32> to vector<16x128xf32>
    %470 = arith.addf %467, %469 : vector<16x128xf32>
    %c0_130 = arith.constant 0 : index
    %c0_131 = arith.constant 0 : index
    %471 = vector.load %arg9[%c0_130, %c0_131] : memref<16x128xf32, #tpu.memory_space<vmem>>, vector<16x128xf32>
    tpu.vector_store %arg9[%c0_130, %c0_131], %470 {strides = array<i32>} : memref<16x128xf32, #tpu.memory_space<vmem>>, vector<16x128xf32>,
    return
  }
}

</mosaic_0001>

<bundles_post_ra>
// kernel: decoder_forward.1
= control target key start
LH: loop header
LB: loop body
LE: loop exit
PB: predicated region body
PF: predicated region fallthrough
CT: control target
= control target key end

     0   :  { %14 = vsyncpa [#allocation3], 0  ;;  %s9441_s30 = smov [#allocation2]   ;;  %s10468_s0 = inlined_call_operand.vmem [shape: f32[16,32], index: 0, kind: input, shape index: {}]   ;;  %s10469_s1 = inlined_call_operand.vmem [shape: f32[16,32], index: 1, kind: input, shape index: {}]   ;;  %s10470_s2 = inlined_call_operand.hbm [shape: f32[2,8,32,32], index: 2, kind: input, shape index: {}]   ;;  %s10471_s3 = inlined_call_operand.vmem [shape: f32[2,32,64], index: 3, kind: input, shape index: {}]   ;;  %s10472_s4 = inlined_call_operand.vmem [shape: f32[2,64,32], index: 4, kind: input, shape index: {}]   ;;  %s10473_s5 = inlined_call_operand.vmem [shape: f32[2,1,64], index: 5, kind: input, shape index: {}]   ;;  %s10474_s6 = inlined_call_operand.vmem [shape: f32[2,15,1,32], index: 6, kind: input, shape index: {}]   ;;  %s10475_s7 = inlined_call_operand.vmem [shape: f32[32,128], index: 7, kind: input, shape index: {}]   ;;  %s10476_s8 = inlined_call_operand.vmem [shape: f32[1,128], index: 8, kind: input, shape index: {}]   ;;  %s10477_s9 = inlined_call_operand.vmem [shape: f32[16,128], index: 9, kind: output, shape index: {}]  }
   0x1   :  { %s24_s10 = sshll.u32 %s9441_s30, 4  ;;  %s9417_s13 = scalar_lea.hbm %s10470_s2, 8192  ;;  %s25_s10 = int_to_ptr.vmem [resolvable:$true] %s24_s10 }
   0x2   :  { %p9418_p0 = scmp.ne.s32.totalorder %s10470_s2, %s9417_s13  ;;  %p9421_p1 = scmp.lt.u32.totalorder %s9417_s13, %s10470_s2 }
   0x4   :  { %p9423_p2 = pnand %p9421_p1, %p9418_p0 }
   0x6   :  { %9426 = shalt.err (!%p9423_p2)
}
   0x7   :  { %s9427_s18 = scalar_lea.vmem %s25_s10, 8192  ;;  %p9432_p4 = scmp.lt.s32.totalorder %s25_s10, %s25_s10 }
   0x8   :  { %p9428_p3 = scmp.ne.s32.totalorder %s25_s10, %s9427_s18  ;;  %p9433_p5 = scmp.lt.s32.totalorder %s9427_s18, %s9427_s18 }
   0xa   :  { %p9434_p6 = por %p9433_p5, %p9432_p4 }
   0xc   :  { %p9435_p7 = pnand %p9434_p6, %p9428_p3 }
   0xe   :  { %9438 = shalt.err (!%p9435_p7)
}
   0xf   :  { %s9442_s19 = smov 128   ;;  %s9443_s20 = smov 8  }
  0x10   :  { %30 = dma.hbm_to_vmem [thread:$0]  %s10470_s2, 8192, %s25_s10, [#allocation3], %s9442_s19, %s9442_s19, %s9443_s20  }
  0x11   :  { %9439 = dma.done.wait [#allocation3], 8192  }
  0x12   :  { %9440 = vsyncadd [#allocation3], 4294959104  ;;  %vm155_vm0 = vcmask 261120   ;;  %v93_v0 = vld [vmem:[#allocation2 + $0x20] sm:$0xff]  ;;  %v94_v1 = vld [vmem:[#allocation2 + $0x28] sm:$0xff]  ;;  %s9444_s29 = smov 112   ;;  %v50_v50 = vlaneseq }
  0x13   :  { %v95_v2 = vld [vmem:[#allocation2 + $0x30] sm:$0xff]  ;;  %v9009_v3 = vpack.c.bf16 %v94_v1, %v93_v0  ;;  %v96_v4 = vld [vmem:[#allocation2 + $0x38] sm:$0xff]  ;;  %v9521_v5 = vld [vmem:[%s10468_s0] sm:$0xff]  ;;  %s9445_s30 = smov 120   ;;  %vm583_vm1 = vcmask 64512   ;;  %s9446_s10 = smov 104  }
  0x14   :  { %v9013_v6 = vpack.c.bf16 %v96_v4, %v95_v2  ;;  %8581 = vmatprep.mubr.msk.f32.mxu1 %vm155_vm0, %v9521_v5  ;;  %v89_v7 = vld [vmem:[#allocation2] sm:$0xff]  ;;  %v90_v8 = vld [vmem:[#allocation2 + $0x8] sm:$0xff]  ;;  %v91_v9 = vld [vmem:[#allocation2 + $0x10] sm:$0xff]  ;;  %8570 = vmatprep.mubr.msk.f32.mxu0 %vm155_vm0, %v9521_v5  ;;  %v9566_v51 = vshrl.u32 %v50_v50, 7  ;;  %v9568_v52 = vand.u32 127, %v50_v50  ;;  %vm900_vm10 = vcmask 130048  }
  0x15   :  { %9010 = vmatprep.subr.bf16.mxu1 %v9009_v3  ;;  %v9001_v10 = vpack.c.bf16 %v90_v8, %v89_v7  ;;  %v92_v11 = vld [vmem:[#allocation2 + $0x18] sm:$0xff]  ;;  %v9530_v13 = vld [vmem:[%s10468_s0 + $0x8] sm:$0xff]  ;;  %v8136_v14 = vld [vmem:[%s10474_s6 + $0x1] ss:$0 sm:$0xff]  ;;  %v9447_v55 = vmov -1e+09  }
  0x16   :  { %9012 = vmatpush3.bf16.msra.mxu1 %v9009_v3  ;;  %v9005_v12 = vpack.c.bf16 %v92_v11, %v91_v9  ;;  %v8133_v18 = vld [vmem:[%s10474_s6] ss:$0 sm:$0xff]  ;;  %v98_v33 = vld [vmem:[#allocation2 + $0x48] sm:$0xff]  ;;  %v99_v34 = vld [vmem:[#allocation2 + $0x50] sm:$0xff]  ;;  %v52_v53 = vadd.s32 8, %v9566_v51  ;;  %vm73_vm2 = vcmp.ge.s32.totalorder %v9568_v52, 8  ;;  %vm81_vm7 = vcmp.le.s32.totalorder %v9568_v52, %v9566_v51 }
  0x17   :  { %9014 = vmatprep.subr.bf16.mxu1 %v9013_v6  ;;  %9002 = vmatprep.subr.bf16.mxu0 %v9001_v10  ;;  %v97_v32 = vld [vmem:[#allocation2 + $0x40] sm:$0xff]  ;;  %v100_v36 = vld [vmem:[#allocation2 + $0x58] sm:$0xff]  ;;  %vm76_vm3 = vcmp.lt.s32.totalorder %v9568_v52, 16  ;;  %vm64_vm6 = vcmp.lt.s32.totalorder %v9568_v52, 8  ;;  %vm9449_vm11 = vmmov 0   ;;  %vm9661_vm12 = vmpackc.low %vm900_vm10, %vm900_vm10  ;;  %s9453_s13 = smov 16  }
  0x18   :  { %9004 = vmatpush3.bf16.msra.mxu0 %v9001_v10  ;;  %v9017_v35 = vpack.c.bf16 %v98_v33, %v97_v32  ;;  %v9021_v37 = vpack.c.bf16 %v100_v36, %v99_v34  ;;  %vm9573_vm4 = vmand %vm73_vm2, %vm76_vm3  ;;  %vm82_vm5 = vcmp.le.s32.totalorder %v9568_v52, %v52_v53  ;;  %v9448_v33 = vmov 0.0|0.0   ;;  %s9454_s14 = smov 24  }
  0x19   :  { %9006 = vmatprep.subr.bf16.mxu0 %v9005_v12  ;;  %vm84_vm8 = vmand %vm9573_vm4, %vm82_vm5  ;;  %vm1861_vm13 = vcmask 195584   ;;  %vm3939_vm14 = vcmask 523264  }
  0x1a   :  { %9016 = vmatpush3.bf16.msra.mxu1 %v9013_v6  ;;  %vm83_vm9 = vmand %vm64_vm6, %vm81_vm7  ;;  %v9586_v56 = vsel %vm84_vm8, 0.0, %v9447_v55 }
  0x1b   :  { %v9589_v57 = vsel %vm83_vm9, 0.0, %v9447_v55 }
  0x1c   :  { %9008 = vmatpush3.bf16.msra.mxu0 %v9005_v12 }
  0x1d   :  { %8582 = vmatmul.mubr.msk.f32.vlgmr.msra.gmra.mrb[0].mxu1 %vm155_vm0, %v9530_v13  ;;  %9018 = vmatprep.subr.bf16.mxu0 %v9017_v35 }
  0x1f   :  { %8571 = vmatmul.mubr.msk.f32.vlgmr.msra.gmra.mrb[0].mxu0 %vm155_vm0, %v9530_v13 }
  0x20   :  { %8592 = vmatprep.mubr.msk.f32.mxu0 %vm155_vm0, %v9521_v5  ;;  %9020 = vmatpush3.bf16.msra.mxu0 %v9017_v35 }
  0x21   :  { %9022 = vmatprep.subr.bf16.mxu0 %v9021_v37 }
  0x24   :  { %9024 = vmatpush3.bf16.msra.mxu0 %v9021_v37 }
  0x25   :  { %9025 = vmatprep.subr.bf16.mxu0 %v9448_v33 }
  0x27   :  { %8593 = vmatmul.mubr.msk.f32.vlgmr.msra.gmra.mrb[2].mxu0 %vm155_vm0, %v9530_v13 }
  0xf0   :  { %v8583_v15 = vpop.f32.mrb[0].mxu1 }
  0xf1   :  { %v317_v16 = vadd.f32 %v8583_v15, %v8136_v14  ;;  %v311_v17 = vpop.f32.mrb[1].mxu1 }
  0xf2   :  { %v312_v19 = vadd.f32 %v8136_v14, %v311_v17  ;;  %v8572_v20 = vpop.f32.mrb[0].mxu0 }
  0xf3   :  { %425 = vrot.lane.b32.xlu1 %v317_v16, %s9444_s29  ;;  %v228_v21 = vpop.f32.mrb[1].mxu0  ;;  %v234_v24 = vadd.f32 %v8572_v20, %v8133_v18  ;;  %v8139_v20 = vld [vmem:[%s10474_s6 + $0x2] ss:$0 sm:$0xff] }
  0xf4   :  { %417 = vrot.lane.b32.xlu0 %v312_v19, %s9445_s30  ;;  %v229_v22 = vadd.f32 %v8133_v18, %v228_v21 }
  0xf5   :  { %v238_v25 = vmul.f32 0.35355338, %v234_v24 }
  0xf6   :  { %v237_v23 = vmul.f32 0.35355338, %v229_v22 }
  0xf7   :  { %431 = vrot.lane.b32.xlu1 %v317_v16, %s9446_s10 }
  0xf8   :  { %419 = vrot.lane.b32.xlu0 %v317_v16, %s9445_s30  ;;  %8597 = vmatprep.mubr.msk.f32.mxu1 %vm583_vm1, %v237_v23 }
  0xfa   :  { %v8594_v48 = vpop.f32.mrb[2].mxu0 }
  0xfb   :  { %423 = vrot.lane.b32.xlu1 %v312_v19, %s9444_s29  ;;  %v392_v49 = vpop.f32.mrb[3].mxu0  ;;  %v9612_v22 = vadd.f32 %v8594_v48, %v8139_v20 }
  0xfc   :  { %429 = vrot.lane.b32.xlu0 %v312_v19, %s9446_s10  ;;  %v9610_v21 = vadd.f32 %v8139_v20, %v392_v49 }
  0xff   :  { %405 = vrot.lane.b32.xlu1 %v238_v25, %s9445_s30 }
 0x100   :  { %403 = vrot.lane.b32.xlu0 %v237_v23, %s9445_s30 }
 0x103   :  { %409 = vrot.lane.b32.xlu1 %v238_v25, %s9444_s29 }
 0x104   :  { %407 = vrot.lane.b32.xlu0 %v237_v23, %s9444_s29 }
 0x107   :  { %413 = vrot.lane.b32.xlu1 %v238_v25, %s9446_s10 }
 0x108   :  { %411 = vrot.lane.b32.xlu0 %v237_v23, %s9446_s10 }
 0x126   :  { %455 = vxpose.xlu0.b32.start [1/2] (short) (narrow) %v312_v19, 8 }
 0x12a   :  { %456 = vxpose.xlu0.b32.end [2/2] (short) (narrow) %v317_v16, 8 }
 0x165   :  { %v426_v26 = vpop.permute.xlu1 %425 }
 0x166   :  { %v418_v27 = vpop.permute.xlu0 %417 }
 0x167   :  { %487 = vxpose.xlu1.b32.start [1/2] (short) (narrow) %v418_v27, 8 }
 0x169   :  { %v432_v28 = vpop.permute.xlu1 %431 }
 0x16a   :  { %v420_v29 = vpop.permute.xlu0 %419 }
 0x16b   :  { %488 = vxpose.xlu1.b32.end [2/2] (short) (narrow) %v420_v29, 8 }
 0x16d   :  { %v424_v30 = vpop.permute.xlu1 %423 }
 0x16e   :  { %519 = vxpose.xlu0.b32.start [1/2] (short) (narrow) %v424_v30, 8  ;;  %v430_v31 = vpop.permute.xlu0 %429 }
 0x171   :  { %v406_v42 = vpop.permute.xlu1 %405 }
 0x172   :  { %520 = vxpose.xlu0.b32.end [2/2] (short) (narrow) %v426_v26, 8  ;;  %v404_v38 = vpop.permute.xlu0 %403 }
 0x175   :  { %v410_v43 = vpop.permute.xlu1 %409 }
 0x176   :  { %551 = vxpose.xlu0.b32.start [1/2] (short) (narrow) %v430_v31, 8  ;;  %v408_v39 = vpop.permute.xlu0 %407 }
 0x179   :  { %v414_v44 = vpop.permute.xlu1 %413 }
 0x17a   :  { %552 = vxpose.xlu0.b32.end [2/2] (short) (narrow) %v432_v28, 8  ;;  %v412_v40 = vpop.permute.xlu0 %411 }
 0x1a6   :  { %v471_v41 = vpop.trf.xlu0 }
 0x1a7   :  { %8595 = vmatprep.subr.mxu1 %v471_v41 }
 0x1a8   :  { %8596 = vmatpush3.msra.mxu1 %v471_v41 }
 0x1a9   :  { %8598 = vmatmul.mubr.msk.f32.vlgmr.msra.gmra.mrb[2].mxu1 %vm583_vm1, %v238_v25 }
 0x1aa   :  { %8602 = vmatprep.mubr.msk.f32.mxu1 %vm583_vm1, %v404_v38 }
 0x1e7   :  { %v503_v45 = vpop.trf.xlu1 }
 0x1e8   :  { %8600 = vmatprep.subr.mxu1 %v503_v45 }
 0x1e9   :  { %8601 = vmatpush3.msra.mxu1 %v503_v45 }
 0x1ea   :  { %8603 = vmatmul.mubr.msk.f32.vlgmr.msra.gmra.mrb[4].mxu1 %vm583_vm1, %v406_v42 }
 0x1eb   :  { %8607 = vmatprep.mubr.msk.f32.mxu1 %vm583_vm1, %v408_v39 }
 0x1ee   :  { %v535_v46 = vpop.trf.xlu0 }
 0x1ef   :  { %8605 = vmatprep.subr.mxu1 %v535_v46 }
 0x1f0   :  { %8606 = vmatpush3.msra.mxu1 %v535_v46 }
 0x1f1   :  { %8608 = vmatmul.mubr.msk.f32.vlgmr.msra.gmra.mrb[6].mxu1 %vm583_vm1, %v410_v43 }
 0x1f2   :  { %8612 = vmatprep.mubr.msk.f32.mxu1 %vm583_vm1, %v412_v40 }
 0x1f6   :  { %v567_v47 = vpop.trf.xlu0 }
 0x1f7   :  { %8610 = vmatprep.subr.mxu1 %v567_v47 }
 0x1f8   :  { %8611 = vmatpush3.msra.mxu1 %v567_v47 }
 0x1f9   :  { %8613 = vmatmul.mubr.msk.f32.vlgmr.msra.gmra.mrb[8].mxu1 %vm583_vm1, %v414_v44  ;;  %9029 = vmatprep.subr.bf16.mxu1 %v9448_v33 }
 0x27c   :  { %v8599_v58 = vpop.f32.mrb[2].mxu1 }
 0x27d   :  { %v660_v59 = vadd.f32 %v8599_v58, %v9586_v56  ;;  %v654_v60 = vpop.f32.mrb[3].mxu1 }
 0x27e   :  { %v655_v61 = vadd.f32 %v654_v60, %v9589_v57 }
 0x27f   :  { %v904_v62 = vsel %vm900_vm10, %v660_v59, -inf }
 0x280   :  { %905 = vmax.xlane.f32.xlu0 %v904_v62  ;;  %v901_v63 = vsel %vm900_vm10, %v655_v61, -inf }
 0x281   :  { %902 = vmax.xlane.f32.xlu1 %v901_v63 }
 0x2bd   :  { %v8604_v0 = vpop.f32.mrb[4].mxu1 }
 0x2be   :  { %v739_v1 = vadd.f32 %v8604_v0, %v9586_v56  ;;  %v733_v2 = vpop.f32.mrb[5].mxu1 }
 0x2bf   :  { %v734_v3 = vadd.f32 %v733_v2, %v9589_v57 }
 0x2c0   :  { %v910_v4 = vsel %vm900_vm10, %v739_v1, -inf }
 0x2c1   :  { %911 = vmax.xlane.f32.xlu1 %v910_v4  ;;  %v907_v7 = vsel %vm900_vm10, %v734_v3, -inf }
 0x2c4   :  { %v8609_v6 = vpop.f32.mrb[6].mxu1 }
 0x2c5   :  { %v818_v8 = vadd.f32 %v8609_v6, %v9586_v56  ;;  %v812_v9 = vpop.f32.mrb[7].mxu1  ;;  %908 = vmax.xlane.f32.xlu1 %v907_v7  ;;  %v9450_v7 = vmov 0.0  }
 0x2c6   :  { %v813_v10 = vadd.f32 %v812_v9, %v9589_v57  ;;  %8626 = vmatprep.mubr.msk.f32.mxu1 %vm9449_vm11, %v9450_v7  ;;  %8619 = vmatprep.mubr.msk.f32.mxu0 %vm9449_vm11, %v9450_v7 }
 0x2c7   :  { %v916_v11 = vsel %vm900_vm10, %v818_v8, -inf }
 0x2c8   :  { %917 = vmax.xlane.f32.xlu0 %v916_v11  ;;  %v913_v12 = vsel %vm900_vm10, %v813_v10, -inf }
 0x2c9   :  { %914 = vmax.xlane.f32.xlu1 %v913_v12 }
 0x2cc   :  { %v8614_v14 = vpop.f32.mrb[8].mxu1 }
 0x2cd   :  { %v897_v15 = vadd.f32 %v8614_v14, %v9586_v56  ;;  %v891_v16 = vpop.f32.mrb[9].mxu1 }
 0x2ce   :  { %v892_v17 = vadd.f32 %v891_v16, %v9589_v57 }
 0x2cf   :  { %v922_v18 = vsel %vm900_vm10, %v897_v15, -inf }
 0x2d0   :  { %923 = vmax.xlane.f32.xlu0 %v922_v18  ;;  %v919_v19 = vsel %vm900_vm10, %v892_v17, -inf }
 0x2d1   :  { %920 = vmax.xlane.f32.xlu1 %v919_v19 }
 0x2e2   :  { %437 = vrot.lane.b32.xlu1 %v9610_v21, %s9445_s30 }
 0x2e6   :  { %443 = vrot.lane.b32.xlu0 %v9610_v21, %s9444_s29  ;;  %439 = vrot.lane.b32.xlu1 %v9612_v22, %s9445_s30 }
 0x2ea   :  { %449 = vrot.lane.b32.xlu1 %v9610_v21, %s9446_s10 }
 0x2ee   :  { %445 = vrot.lane.b32.xlu1 %v9612_v22, %s9444_s29 }
 0x30d   :  { %v906_v23 = vpop.xlane.xlu0 %905 }
 0x30e   :  { %v926_v24 = vsub.f32 %v660_v59, %v906_v23  ;;  %v903_v25 = vpop.xlane.xlu1 %902 }
 0x30f   :  { %v925_v26 = vsub.f32 %v655_v61, %v903_v25 }
 0x310   :  { %v935_v27 = vmul.f32 1.442695, %v926_v24 }
 0x311   :  { %v933_v28 = vmul.f32 1.442695, %v925_v26 }
 0x312   :  { %9263 = vpow2.f32 %v935_v27 }
 0x313   :  { %9265 = vpow2.f32 %v933_v28 }
 0x31c   :  { %v9624_v29 = vpop.eup %9263 }
 0x31d   :  { %v952_v30 = vsel %vm900_vm10, %v9624_v29, 0.0  ;;  %v9628_v31 = vpop.eup %9265 }
 0x31e   :  { %953 = vadd.xlane.f32.xlu0 %v952_v30  ;;  %v949_v32 = vsel %vm900_vm10, %v9628_v31, 0.0 }
 0x322   :  { %950 = vadd.xlane.f32.xlu0 %v949_v32 }
 0x34e   :  { %v912_v34 = vpop.xlane.xlu1 %911 }
 0x34f   :  { %v928_v35 = vsub.f32 %v739_v1, %v912_v34 }
 0x351   :  { %v939_v36 = vmul.f32 1.442695, %v928_v35 }
 0x352   :  { %v909_v37 = vpop.xlane.xlu1 %908 }
 0x353   :  { %9267 = vpow2.f32 %v939_v36  ;;  %v927_v38 = vsub.f32 %v734_v3, %v909_v37 }
 0x355   :  { %v937_v39 = vmul.f32 1.442695, %v927_v38  ;;  %v918_v40 = vpop.xlane.xlu0 %917 }
 0x356   :  { %v930_v41 = vsub.f32 %v818_v8, %v918_v40  ;;  %v915_v42 = vpop.xlane.xlu1 %914 }
 0x357   :  { %9269 = vpow2.f32 %v937_v39  ;;  %v929_v43 = vsub.f32 %v813_v10, %v915_v42 }
 0x358   :  { %v943_v44 = vmul.f32 1.442695, %v930_v41 }
 0x359   :  { %v941_v45 = vmul.f32 1.442695, %v929_v43 }
 0x35a   :  { %9271 = vpow2.f32 %v943_v44 }
 0x35b   :  { %9273 = vpow2.f32 %v941_v45 }
 0x35d   :  { %v9634_v46 = vpop.eup %9267  ;;  %v924_v47 = vpop.xlane.xlu0 %923 }
 0x35e   :  { %v932_v48 = vsub.f32 %v897_v15, %v924_v47  ;;  %v921_v49 = vpop.xlane.xlu1 %920  ;;  %v958_v50 = vsel %vm900_vm10, %v9634_v46, 0.0 }
 0x35f   :  { %v931_v53 = vsub.f32 %v892_v17, %v921_v49  ;;  %959 = vadd.xlane.f32.xlu0 %v958_v50 }
 0x360   :  { %v947_v58 = vmul.f32 1.442695, %v932_v48 }
 0x361   :  { %v9270_v59 = vpop.eup %9269  ;;  %v945_v60 = vmul.f32 1.442695, %v931_v53  ;;  %v444_v11 = vpop.permute.xlu0 %443 }
 0x362   :  { %9275 = vpow2.f32 %v947_v58  ;;  %v955_v61 = vsel %vm900_vm10, %v9270_v59, 0.0  ;;  %v438_v8 = vpop.permute.xlu1 %437 }
 0x363   :  { %956 = vadd.xlane.f32.xlu0 %v955_v61  ;;  %9277 = vpow2.f32 %v945_v60 }
 0x364   :  { %v9639_v62 = vpop.eup %9271 }
 0x365   :  { %v9641_v63 = vpop.eup %9273  ;;  %v964_v0 = vsel %vm900_vm10, %v9639_v62, 0.0 }
 0x366   :  { %v961_v1 = vsel %vm900_vm10, %v9641_v63, 0.0  ;;  %v440_v9 = vpop.permute.xlu1 %439 }
 0x367   :  { %965 = vadd.xlane.f32.xlu0 %v964_v0  ;;  %962 = vadd.xlane.f32.xlu1 %v961_v1 }
 0x36a   :  { %v450_v10 = vpop.permute.xlu1 %449 }
 0x36c   :  { %v9276_v2 = vpop.eup %9275 }
 0x36d   :  { %v970_v3 = vsel %vm900_vm10, %v9276_v2, 0.0  ;;  %v9278_v4 = vpop.eup %9277 }
 0x36e   :  { %971 = vadd.xlane.f32.xlu1 %v970_v3  ;;  %v967_v6 = vsel %vm900_vm10, %v9278_v4, 0.0  ;;  %v446_v12 = vpop.permute.xlu1 %445 }
 0x372   :  { %968 = vadd.xlane.f32.xlu1 %v967_v6 }
 0x37d   :  { %451 = vrot.lane.b32.xlu0 %v9612_v22, %s9446_s10 }
 0x39b   :  { %1021 = vxpose.xlu0.b32.start [1/2] (short) (narrow) %v438_v8, 8 }
 0x39f   :  { %1022 = vxpose.xlu0.b32.end [2/2] (short) (narrow) %v440_v9, 8 }
 0x3a3   :  { %1053 = vxpose.xlu0.b32.start [1/2] (short) (narrow) %v444_v11, 8 }
 0x3a5   :  { %989 = vxpose.xlu1.b32.start [1/2] (short) (narrow) %v9610_v21, 8 }
 0x3a7   :  { %1054 = vxpose.xlu0.b32.end [2/2] (short) (narrow) %v446_v12, 8 }
 0x3a9   :  { %990 = vxpose.xlu1.b32.end [2/2] (short) (narrow) %v9612_v22, 8 }
 0x3ab   :  { %v954_v14 = vpop.xlane.xlu0 %953 }
 0x3ac   :  { %9279 = vrcp.f32 %v954_v14 }
 0x3ad   :  { %1085 = vxpose.xlu1.b32.start [1/2] (short) (narrow) %v450_v10, 8 }
 0x3af   :  { %v951_v15 = vpop.xlane.xlu0 %950 }
 0x3b0   :  { %9281 = vrcp.f32 %v951_v15 }
 0x3b6   :  { %v9280_v16 = vpop.eup %9279 }
 0x3b7   :  { %v982_v18 = vmul.f32 %v9280_v16, %v9624_v29 }
 0x3ba   :  { %v9282_v17 = vpop.eup %9281 }
 0x3bb   :  { %v981_v19 = vmul.f32 %v9282_v17, %v9628_v31 }
 0x3bd   :  { %v9026_v21 = vpack.c.bf16 %v982_v18, %v981_v19 }
 0x3bf   :  { %9028 = vmatpush3.bf16.xpose.msk.msra.mxu0 %vm9661_vm12, %v9026_v21 }
 0x3c0   :  { %9033 = vmatprep.subr.bf16.mxu0 %v9448_v33 }
 0x3ec   :  { %v960_v22 = vpop.xlane.xlu0 %959 }
 0x3ed   :  { %9283 = vrcp.f32 %v960_v22 }
 0x3f0   :  { %v957_v23 = vpop.xlane.xlu0 %956 }
 0x3f1   :  { %9285 = vrcp.f32 %v957_v23 }
 0x3f4   :  { %v966_v24 = vpop.xlane.xlu0 %965  ;;  %v963_v30 = vpop.xlane.xlu1 %962 }
 0x3f7   :  { %v9284_v26 = vpop.eup %9283 }
 0x3f8   :  { %v452_v25 = vpop.permute.xlu0 %451  ;;  %v984_v28 = vmul.f32 %v9284_v26, %v9634_v46 }
 0x3f9   :  { %1086 = vxpose.xlu1.b32.end [2/2] (short) (narrow) %v452_v25, 8 }
 0x3fb   :  { %v9286_v27 = vpop.eup %9285  ;;  %v972_v32 = vpop.xlane.xlu1 %971 }
 0x3fc   :  { %v983_v29 = vmul.f32 %v9286_v27, %v9270_v59 }
 0x3fe   :  { %v9030_v31 = vpack.c.bf16 %v984_v28, %v983_v29 }
 0x3ff   :  { %v969_v34 = vpop.xlane.xlu1 %968 }
 0x400   :  { %9032 = vmatpush3.bf16.xpose.msk.msra.mxu1 %vm9661_vm12, %v9030_v31  ;;  %9287 = vrcp.f32 %v969_v34 }
 0x401   :  { %9037 = vmatprep.subr.bf16.mxu1 %v9448_v33  ;;  %9289 = vrcp.f32 %v972_v32 }
 0x402   :  { %9291 = vrcp.f32 %v966_v24 }
 0x403   :  { %9293 = vrcp.f32 %v963_v30 }
 0x40a   :  { %v9288_v35 = vpop.eup %9287 }
 0x40b   :  { %v9290_v36 = vpop.eup %9289  ;;  %v987_v37 = vmul.f32 %v9288_v35, %v9278_v4  ;;  %v9452_v4 = vmov 1934713408  }
 0x40c   :  { %v988_v38 = vmul.f32 %v9290_v36, %v9276_v2  ;;  %v9292_v41 = vpop.eup %9291  ;;  %v9451_v2 = vmov 1983009808   ;;  %v1596_v6 = vunpack.c.l.s4 %v9452_v4 }
 0x40d   :  { %v9294_v42 = vpop.eup %9293  ;;  %v986_v43 = vmul.f32 %v9292_v41, %v9639_v62  ;;  %v1564_v3 = vunpack.c.l.s4 %v9451_v2 }
 0x40e   :  { %v9038_v40 = vpack.c.bf16 %v988_v38, %v987_v37  ;;  %v985_v44 = vmul.f32 %v9294_v42, %v9641_v63  ;;  %v1597_v11 = vunpack.c.0.s8 %v1596_v6 }
 0x40f   :  { %v1565_v9 = vunpack.c.0.s8 %v1564_v3 }
 0x410   :  { %v9034_v46 = vpack.c.bf16 %v986_v43, %v985_v44  ;;  %v9690_v21 = vsub.s32 %v1597_v11, %v9566_v51 }
 0x411   :  { %v9687_v12 = vsub.s32 %v1565_v9, %v9566_v51 }
 0x41b   :  { %v1037_v39 = vpop.trf.xlu0 }
 0x41c   :  { %8627 = vmatmul.mubr.msk.f32.vlgmr.msra.gmra.mrb[10].mxu1 %vm900_vm10, %v1037_v39 }
 0x41d   :  { %9040 = vmatpush3.bf16.xpose.msk.msra.mxu1 %vm9661_vm12, %v9038_v40  ;;  %8640 = vmatprep.mubr.msk.f32.mxu1 %vm9449_vm11, %v9450_v7 }
 0x423   :  { %v1069_v47 = vpop.trf.xlu0 }
 0x425   :  { %v1005_v45 = vpop.trf.xlu1 }
 0x426   :  { %8620 = vmatmul.mubr.msk.f32.vlgmr.msra.gmra.mrb[4].mxu0 %vm900_vm10, %v1005_v45 }
 0x427   :  { %9036 = vmatpush3.bf16.xpose.msk.msra.mxu0 %vm9661_vm12, %v9034_v46  ;;  %8633 = vmatprep.mubr.msk.f32.mxu0 %vm9449_vm11, %v9450_v7 }
 0x42e   :  { %8634 = vmatmul.mubr.msk.f32.vlgmr.msra.gmra.mrb[6].mxu0 %vm900_vm10, %v1069_v47 }
 0x475   :  { %v1101_v48 = vpop.trf.xlu1 }
 0x476   :  { %8641 = vmatmul.mubr.msk.f32.vlgmr.msra.gmra.mrb[12].mxu1 %vm900_vm10, %v1101_v48 }
 0x4ef   :  { %v1271_v49 = vpop.f32.mrb[10].mxu1 }
 0x4f0   :  { %v8628_v50 = vpop.f32.mrb[11].mxu1  ;;  %1465 = vxpose.xlu1.b32.start.end [1/1] (short) (narrow) %v1271_v49, 16 }
 0x4f9   :  { %v1192_v53 = vpop.f32.mrb[4].mxu0 }
 0x4fa   :  { %1433 = vxpose.xlu0.b32.start.end [1/1] (short) (narrow) %v1192_v53, 16  ;;  %v8621_v58 = vpop.f32.mrb[5].mxu0 }
 0x501   :  { %v1350_v59 = vpop.f32.mrb[6].mxu0 }
 0x502   :  { %1497 = vxpose.xlu0.b32.start.end [1/1] (short) (narrow) %v1350_v59, 16  ;;  %v8635_v60 = vpop.f32.mrb[7].mxu0 }
 0x549   :  { %v1429_v61 = vpop.f32.mrb[12].mxu1 }
 0x54a   :  { %1529 = vxpose.xlu1.b32.start.end [1/1] (short) (narrow) %v1429_v61, 16  ;;  %v8642_v62 = vpop.f32.mrb[13].mxu1 }
 0x570   :  { %v1481_v0 = vpop.trf.xlu1 }
 0x574   :  { %v1482_v8 = vpop.trf.xlu1 }
 0x57a   :  { %v1449_v63 = vpop.trf.xlu0 }
 0x57e   :  { %v1450_v1 = vpop.trf.xlu0 }
 0x582   :  { %v1513_v10 = vpop.trf.xlu0 }
 0x583   :  { %v1561_v14 = vcombine.low %v1449_v63, %v1513_v10  ;;  %v1562_v15 = vcombine.high %v1449_v63, %v1513_v10 }
 0x585   :  { %v1569_v22 = vrot.slane %v1561_v14, %v9687_v12  ;;  %v1576_v23 = vrot.slane %v1562_v15, %v9687_v12 }
 0x586   :  { %v1514_v17 = vpop.trf.xlu0 }
 0x587   :  { %v1629_v26 = vcombine.low %v1450_v1, %v1514_v17  ;;  %v1630_v27 = vcombine.high %v1450_v1, %v1514_v17  ;;  %v101_v17 = vld [vmem:[#allocation2 + $0x60] sm:$0xff] }
 0x589   :  { %v1637_v39 = vrot.slane %v1629_v26, %v9687_v12  ;;  %v1644_v40 = vrot.slane %v1630_v27, %v9687_v12  ;;  %v104_v26 = vld [vmem:[#allocation2 + $0x78] sm:$0xff] }
 0x5ca   :  { %v1545_v16 = vpop.trf.xlu1 }
 0x5cb   :  { %v1577_v18 = vcombine.low %v1481_v0, %v1545_v16  ;;  %v1578_v19 = vcombine.high %v1481_v0, %v1545_v16 }
 0x5cd   :  { %v1585_v24 = vrot.slane %v1577_v18, %v9687_v12  ;;  %v1592_v25 = vrot.slane %v1578_v19, %v9687_v12 }
 0x5ce   :  { %v1546_v28 = vpop.trf.xlu1 }
 0x5cf   :  { %v1593_v29 = vcombine.low %v1569_v22, %v1585_v24  ;;  %v1594_v30 = vcombine.high %v1569_v22, %v1585_v24  ;;  %v1609_v31 = vcombine.low %v1576_v23, %v1592_v25  ;;  %v1610_v32 = vcombine.high %v1576_v23, %v1592_v25  ;;  %v102_v24 = vld [vmem:[#allocation2 + $0x68] sm:$0xff]  ;;  %v103_v25 = vld [vmem:[#allocation2 + $0x70] sm:$0xff] }
 0x5d0   :  { %v1645_v34 = vcombine.low %v1482_v8, %v1546_v28  ;;  %v1646_v35 = vcombine.high %v1482_v8, %v1546_v28 }
 0x5d1   :  { %v1601_v51 = vrot.slane %v1593_v29, %v9690_v21  ;;  %v1608_v36 = vrot.slane %v1594_v30, %v9690_v21  ;;  %v1617_v37 = vrot.slane %v1609_v31, %v9690_v21  ;;  %v1624_v38 = vrot.slane %v1610_v32, %v9690_v21 }
 0x5d2   :  { %v1653_v41 = vrot.slane %v1645_v34, %v9687_v12  ;;  %v1660_v42 = vrot.slane %v1646_v35, %v9687_v12  ;;  %v9041_v35 = vpack.c.bf16 %v102_v24, %v101_v17 }
 0x5d3   :  { %v1697_v43 = vcombine.low %v1601_v51, %v1608_v36  ;;  %v8162_v44 = vcombine.high %v1601_v51, %v1608_v36  ;;  %v1713_v45 = vcombine.low %v1617_v37, %v1624_v38  ;;  %v8163_v46 = vcombine.high %v1617_v37, %v1624_v38 }
 0x5d4   :  { %v1661_v47 = vcombine.low %v1637_v39, %v1653_v41  ;;  %v1662_v48 = vcombine.high %v1637_v39, %v1653_v41  ;;  %v1677_v49 = vcombine.low %v1644_v40, %v1660_v42  ;;  %v1678_v50 = vcombine.high %v1644_v40, %v1660_v42  ;;  %9042 = vmatprep.subr.bf16.mxu0 %v9041_v35 }
 0x5d5   :  { %v1704_v53 = vrot.slane %v1697_v43, %v9687_v12  ;;  %v1712_v58 = vrot.slane %v8162_v44, %v9687_v12  ;;  %v1720_v59 = vrot.slane %v1713_v45, %v9687_v12  ;;  %v1728_v60 = vrot.slane %v8163_v46, %v9687_v12  ;;  %9044 = vmatpush3.bf16.msra.mxu0 %v9041_v35  ;;  %v108_v35 = vld [vmem:[#allocation2 + $0x98] sm:$0xff] }
 0x5d6   :  { %v1669_v61 = vrot.slane %v1661_v47, %v9690_v21  ;;  %v1676_v62 = vrot.slane %v1662_v48, %v9690_v21  ;;  %v1685_v63 = vrot.slane %v1677_v49, %v9690_v21  ;;  %v1692_v0 = vrot.slane %v1678_v50, %v9690_v21 }
 0x5d7   :  { %v1730_v1 = vcombine.high %v1704_v53, %v1712_v58  ;;  %v1746_v2 = vcombine.high %v1720_v59, %v1728_v60  ;;  %v1729_v3 = vcombine.low %v1704_v53, %v1712_v58  ;;  %v1745_v4 = vcombine.low %v1720_v59, %v1728_v60 }
 0x5d8   :  { %v1765_v6 = vcombine.low %v1669_v61, %v1676_v62  ;;  %v8164_v8 = vcombine.high %v1669_v61, %v1676_v62  ;;  %v1781_v9 = vcombine.low %v1685_v63, %v1692_v0  ;;  %v8165_v10 = vcombine.high %v1685_v63, %v1692_v0  ;;  %v8166_v63 = vld [vmem:[%s10474_s6 + $0x3] ss:$0 sm:$0xff] }
 0x5d9   :  { %v1744_v11 = vrot.slane %v1730_v1, %v9690_v21  ;;  %v1760_v14 = vrot.slane %v1746_v2, %v9690_v21  ;;  %v1737_v15 = vrot.slane %v1729_v3, %v9690_v21  ;;  %v1753_v16 = vrot.slane %v1745_v4, %v9690_v21 }
 0x5da   :  { %v1772_v18 = vrot.slane %v1765_v6, %v9687_v12  ;;  %v1780_v19 = vrot.slane %v8164_v8, %v9687_v12  ;;  %v1788_v22 = vrot.slane %v1781_v9, %v9687_v12  ;;  %v1796_v23 = vrot.slane %v8165_v10, %v9687_v12  ;;  %v109_v10 = vld [vmem:[#allocation2 + $0xa0] sm:$0xff] }
 0x5db   :  { %v1763_v27 = vcombine.low %v1744_v11, %v1760_v14  ;;  %v1762_v28 = vcombine.high %v1737_v15, %v1753_v16  ;;  %v1761_v29 = vcombine.low %v1737_v15, %v1753_v16  ;;  %v9045_v51 = vpack.c.bf16 %v104_v26, %v103_v25  ;;  %v111_v15 = vld [vmem:[#allocation2 + $0xb0] sm:$0xff]  ;;  %v112_v16 = vld [vmem:[#allocation2 + $0xb8] sm:$0xff] }
 0x5dc   :  { %v1797_v30 = vcombine.low %v1772_v18, %v1780_v19  ;;  %v1813_v31 = vcombine.low %v1788_v22, %v1796_v23  ;;  %v1798_v32 = vcombine.high %v1772_v18, %v1780_v19  ;;  %v1814_v34 = vcombine.high %v1788_v22, %v1796_v23 }
 0x5dd   :  { %1843 = vrot.lane.b32.xlu1 %v1763_v27, %s9453_s13  ;;  %1835 = vrot.lane.b32.xlu0 %v1762_v28, %s9443_s20  ;;  %v1764_v38 = vcombine.high %v1744_v11, %v1760_v14  ;;  %v110_v11 = vld [vmem:[#allocation2 + $0xa8] sm:$0xff]  ;;  %v9061_v17 = vpack.c.bf16 %v112_v16, %v111_v15 }
 0x5de   :  { %v1805_v36 = vrot.slane %v1797_v30, %v9690_v21  ;;  %v1821_v37 = vrot.slane %v1813_v31, %v9690_v21  ;;  %v1812_v41 = vrot.slane %v1798_v32, %v9690_v21  ;;  %v1828_v42 = vrot.slane %v1814_v34, %v9690_v21  ;;  %9046 = vmatprep.subr.bf16.mxu0 %v9045_v51  ;;  %v105_v30 = vld [vmem:[#allocation2 + $0x80] sm:$0xff]  ;;  %v106_v31 = vld [vmem:[#allocation2 + $0x88] sm:$0xff]  ;;  %v107_v32 = vld [vmem:[#allocation2 + $0x90] sm:$0xff] }
 0x5df   :  { %9048 = vmatpush3.bf16.msra.mxu0 %v9045_v51  ;;  %v9057_v14 = vpack.c.bf16 %v110_v11, %v109_v10  ;;  %v9049_v34 = vpack.c.bf16 %v106_v31, %v105_v30  ;;  %v9053_v51 = vpack.c.bf16 %v108_v35, %v107_v32  ;;  %v8171_v10 = vld [vmem:[%s10474_s6 + $0x4] ss:$0 sm:$0xff]  ;;  %v9810_v32 = vsel %vm9573_vm4, 0.0, %v9447_v55 }
 0x5e0   :  { %v1830_v39 = vcombine.high %v1805_v36, %v1821_v37  ;;  %v1829_v40 = vcombine.low %v1805_v36, %v1821_v37  ;;  %v1831_v43 = vcombine.low %v1812_v41, %v1828_v42  ;;  %v1832_v44 = vcombine.high %v1812_v41, %v1828_v42  ;;  %v8174_v36 = vld [vmem:[%s10474_s6 + $0x5] ss:$0 sm:$0xff] }
 0x5e1   :  { %1851 = vrot.lane.b32.xlu0 %v1764_v38, %s9454_s14  ;;  %9058 = vmatprep.subr.bf16.mxu0 %v9057_v14 }
 0x5e2   :  { %1837 = vrot.lane.b32.xlu1 %v1830_v39, %s9443_s20  ;;  %9050 = vmatprep.subr.bf16.mxu1 %v9049_v34 }
 0x5e3   :  { %9052 = vmatpush3.bf16.msra.mxu1 %v9049_v34  ;;  %v9815_v34 = vsel %vm64_vm6, 0.0, %v9447_v55 }
 0x5e4   :  { %9054 = vmatprep.subr.bf16.mxu1 %v9053_v51 }
 0x5e6   :  { %1845 = vrot.lane.b32.xlu1 %v1831_v43, %s9453_s13 }
 0x5e7   :  { %9056 = vmatpush3.bf16.msra.mxu1 %v9053_v51 }
 0x5ea   :  { %1853 = vrot.lane.b32.xlu1 %v1832_v44, %s9454_s14 }
 0x64f   :  { %v1836_v45 = vpop.permute.xlu0 %1835  ;;  %v1844_v46 = vpop.permute.xlu1 %1843 }
 0x650   :  { %v1857_v47 = vsel %vm583_vm1, %v1761_v29, %v1836_v45 }
 0x651   :  { %v1859_v48 = vsel %vm900_vm10, %v1857_v47, %v1844_v46 }
 0x653   :  { %v1852_v49 = vpop.permute.xlu0 %1851 }
 0x654   :  { %v1862_v50 = vsel %vm1861_vm13, %v1859_v48, %v1852_v49  ;;  %v1838_v53 = vpop.permute.xlu1 %1837  ;;  %v8169_v48 = vld [vmem:[%s10474_s6 + $0x9] ss:$0 sm:$0xff] }
 0x655   :  { %8651 = vmatprep.mubr.msk.f32.mxu0 %vm155_vm0, %v1862_v50  ;;  %v1858_v59 = vsel %vm583_vm1, %v1829_v40, %v1838_v53  ;;  %v8170_v50 = vld [vmem:[%s10474_s6 + $0xa] ss:$0 sm:$0xff] }
 0x658   :  { %v1846_v58 = vpop.permute.xlu1 %1845 }
 0x659   :  { %v1860_v60 = vsel %vm900_vm10, %v1858_v59, %v1846_v58 }
 0x65c   :  { %v1854_v61 = vpop.permute.xlu1 %1853 }
 0x65d   :  { %v1863_v62 = vsel %vm1861_vm13, %v1860_v60, %v1854_v61 }
 0x65e   :  { %8652 = vmatmul.mubr.msk.f32.vlgmr.msra.gmra.mrb[8].mxu0 %vm155_vm0, %v1863_v62 }
 0x65f   :  { %9060 = vmatpush3.bf16.msra.mxu0 %v9057_v14 }
 0x660   :  { %9062 = vmatprep.subr.bf16.mxu0 %v9061_v17 }
 0x663   :  { %9064 = vmatpush3.bf16.msra.mxu0 %v9061_v17 }
 0x731   :  { %v8653_v0 = vpop.f32.mrb[8].mxu0 }
 0x732   :  { %v1948_v1 = vadd.f32 %v8653_v0, %v8166_v63  ;;  %v1942_v2 = vpop.f32.mrb[9].mxu0 }
 0x733   :  { %v1943_v3 = vadd.f32 %v8166_v63, %v1942_v2  ;;  %v113_v2 = vld [vmem:[#allocation2 + $0xc0] sm:$0xff] }
 0x734   :  { %v1952_v4 = vadd.f32 %v1948_v1, %v9530_v13  ;;  %v9751_v13 = vld [vmem:[%s10469_s1 + $0x8] sm:$0xff] }
 0x735   :  { %v1951_v6 = vadd.f32 %v1943_v3, %v9521_v5  ;;  %v48_v5 = vld [vmem:[%s10469_s1] sm:$0xff]  ;;  %v114_v3 = vld [vmem:[#allocation2 + $0xc8] sm:$0xff] }
 0x736   :  { %v1956_v8 = vsel %vm155_vm0, %v1952_v4, 0.0  ;;  %8673 = vmatprep.mubr.msk.f32.mxu0 %vm155_vm0, %v48_v5 }
 0x737   :  { %1957 = vadd.xlane.f32.xlu1 %v1956_v8  ;;  %v1953_v9 = vsel %vm155_vm0, %v1951_v6, 0.0  ;;  %8674 = vmatmul.mubr.msk.f32.vlgmr.msra.gmra.mrb[10].mxu0 %vm155_vm0, %v9751_v13  ;;  %v116_v8 = vld [vmem:[#allocation2 + $0xd8] sm:$0xff] }
 0x738   :  { %1954 = vadd.xlane.f32.xlu0 %v1953_v9 }
 0x7c4   :  { %v1958_v18 = vpop.xlane.xlu1 %1957 }
 0x7c5   :  { %v1961_v19 = vmul.f32 0.03125, %v1958_v18  ;;  %v1955_v22 = vpop.xlane.xlu0 %1954 }
 0x7c6   :  { %v1960_v23 = vmul.f32 0.03125, %v1955_v22 }
 0x7c7   :  { %v1963_v24 = vsub.f32 %v1952_v4, %v1961_v19  ;;  %v115_v4 = vld [vmem:[#allocation2 + $0xd0] sm:$0xff] }
 0x7c8   :  { %v1962_v25 = vsub.f32 %v1951_v6, %v1960_v23  ;;  %v9065_v6 = vpack.c.bf16 %v114_v3, %v113_v2  ;;  %v9069_v9 = vpack.c.bf16 %v116_v8, %v115_v4 }
 0x7c9   :  { %v1965_v28 = vmul.f32 %v1963_v24, %v1963_v24 }
 0x7ca   :  { %v1964_v26 = vmul.f32 %v1962_v25, %v1962_v25  ;;  %9066 = vmatprep.subr.bf16.mxu1 %v9065_v6 }
 0x7cb   :  { %v1969_v29 = vsel %vm155_vm0, %v1965_v28, 0.0 }
 0x7cc   :  { %v1966_v27 = vsel %vm155_vm0, %v1964_v26, 0.0 }
 0x7cd   :  { %1967 = vadd.xlane.f32.xlu0 %v1966_v27 }
 0x7d1   :  { %1970 = vadd.xlane.f32.xlu0 %v1969_v29 }
 0x80a   :  { %v8675_v37 = vpop.f32.mrb[10].mxu0 }
 0x80b   :  { %v2169_v38 = vadd.f32 %v8675_v37, %v8174_v36  ;;  %v2163_v39 = vpop.f32.mrb[11].mxu0 }
 0x80c   :  { %v2164_v40 = vadd.f32 %v8174_v36, %v2163_v39 }
 0x80d   :  { %2271 = vrot.lane.b32.xlu0 %v2169_v38, %s9445_s30 }
 0x80e   :  { %2269 = vrot.lane.b32.xlu1 %v2164_v40, %s9445_s30 }
 0x811   :  { %2277 = vrot.lane.b32.xlu0 %v2169_v38, %s9444_s29 }
 0x812   :  { %2275 = vrot.lane.b32.xlu1 %v2164_v40, %s9444_s29 }
 0x816   :  { %2281 = vrot.lane.b32.xlu1 %v2164_v40, %s9446_s10 }
 0x81a   :  { %2283 = vrot.lane.b32.xlu1 %v2169_v38, %s9446_s10 }
 0x82f   :  { %2307 = vxpose.xlu0.b32.start [1/2] (short) (narrow) %v2164_v40, 8 }
 0x833   :  { %2308 = vxpose.xlu0.b32.end [2/2] (short) (narrow) %v2169_v38, 8 }
 0x85a   :  { %v1968_v41 = vpop.xlane.xlu0 %1967 }
 0x85b   :  { %v1972_v42 = vmul.f32 0.03125, %v1968_v41 }
 0x85d   :  { %v1974_v43 = vadd.f32 1e-05, %v1972_v42 }
 0x85e   :  { %v1971_v44 = vpop.xlane.xlu0 %1970 }
 0x85f   :  { %9295 = vrsqrt.f32 %v1974_v43  ;;  %v1973_v45 = vmul.f32 0.03125, %v1971_v44 }
 0x861   :  { %v1975_v46 = vadd.f32 1e-05, %v1973_v45 }
 0x863   :  { %9297 = vrsqrt.f32 %v1975_v46 }
 0x869   :  { %v9296_v47 = vpop.eup %9295 }
 0x86a   :  { %v1978_v49 = vmul.f32 %v9296_v47, %v1962_v25 }
 0x86c   :  { %v1986_v53 = vmul.f32 %v8169_v48, %v1978_v49 }
 0x86d   :  { %v9298_v58 = vpop.eup %9297 }
 0x86e   :  { %v1979_v59 = vmul.f32 %v9298_v58, %v1963_v24  ;;  %v9773_v60 = vadd.f32 %v8170_v50, %v1986_v53 }
 0x870   :  { %v1987_v61 = vmul.f32 %v8169_v48, %v1979_v59  ;;  %8662 = vmatprep.mubr.msk.f32.mxu1 %vm155_vm0, %v9773_v60 }
 0x872   :  { %v9777_v62 = vadd.f32 %v8170_v50, %v1987_v61 }
 0x874   :  { %8663 = vmatmul.mubr.msk.f32.vlgmr.msra.gmra.mrb[14].mxu1 %vm155_vm0, %v9777_v62 }
 0x875   :  { %8684 = vmatprep.mubr.msk.f32.mxu1 %vm155_vm0, %v48_v5  ;;  %9068 = vmatpush3.bf16.msra.mxu1 %v9065_v6 }
 0x876   :  { %9070 = vmatprep.subr.bf16.mxu1 %v9069_v9 }
 0x879   :  { %9072 = vmatpush3.bf16.msra.mxu1 %v9069_v9 }
 0x87c   :  { %8685 = vmatmul.mubr.msk.f32.vlgmr.msra.gmra.mrb[16].mxu1 %vm155_vm0, %v9751_v13 }
 0x87f   :  { %v2272_v63 = vpop.permute.xlu0 %2271 }
 0x880   :  { %v2270_v13 = vpop.permute.xlu1 %2269 }
 0x883   :  { %v2278_v0 = vpop.permute.xlu0 %2277 }
 0x884   :  { %v2276_v18 = vpop.permute.xlu1 %2275 }
 0x888   :  { %v2282_v19 = vpop.permute.xlu1 %2281 }
 0x88c   :  { %v2284_v22 = vpop.permute.xlu1 %2283 }
 0x8af   :  { %v2323_v1 = vpop.trf.xlu0 }
 0x8b0   :  { %8687 = vmatprep.subr.mxu0 %v2323_v1 }
 0x8b1   :  { %8688 = vmatpush3.msra.mxu0 %v2323_v1  ;;  %v8177_v1 = vld [vmem:[%s10474_s6 + $0x6] ss:$0 sm:$0xff] }
 0x947   :  { %v8664_v11 = vpop.f32.mrb[14].mxu1 }
 0x948   :  { %v2080_v14 = vadd.f32 %v8664_v11, %v8171_v10  ;;  %v2074_v15 = vpop.f32.mrb[15].mxu1 }
 0x949   :  { %v2075_v16 = vadd.f32 %v8171_v10, %v2074_v15 }
 0x94a   :  { %v2084_v17 = vmul.f32 0.35355338, %v2080_v14 }
 0x94b   :  { %v2083_v5 = vmul.f32 0.35355338, %v2075_v16 }
 0x94c   :  { %2261 = vrot.lane.b32.xlu0 %v2084_v17, %s9444_s29  ;;  %2257 = vrot.lane.b32.xlu1 %v2084_v17, %s9445_s30 }
 0x94d   :  { %8689 = vmatprep.mubr.msk.f32.mxu0 %vm583_vm1, %v2083_v5 }
 0x94e   :  { %8690 = vmatmul.mubr.msk.f32.vlgmr.msra.gmra.mrb[12].mxu0 %vm583_vm1, %v2084_v17 }
 0x94f   :  { %v8686_v54 = vpop.f32.mrb[16].mxu1 }
 0x950   :  { %2265 = vrot.lane.b32.xlu1 %v2084_v17, %s9446_s10  ;;  %2255 = vrot.lane.b32.xlu0 %v2083_v5, %s9445_s30  ;;  %v2244_v40 = vpop.f32.mrb[17].mxu1  ;;  %v9842_v3 = vadd.f32 %v8686_v54, %v8177_v1 }
 0x951   :  { %v9836_v2 = vadd.f32 %v8177_v1, %v2244_v40 }
 0x954   :  { %2263 = vrot.lane.b32.xlu1 %v2083_v5, %s9446_s10  ;;  %2259 = vrot.lane.b32.xlu0 %v2083_v5, %s9444_s29 }
 0x972   :  { %2371 = vxpose.xlu0.b32.start [1/2] (short) (narrow) %v2276_v18, 8 }
 0x976   :  { %2372 = vxpose.xlu0.b32.end [2/2] (short) (narrow) %v2278_v0, 8 }
 0x97a   :  { %2403 = vxpose.xlu0.b32.start [1/2] (short) (narrow) %v2282_v19, 8 }
 0x97d   :  { %2339 = vxpose.xlu1.b32.start [1/2] (short) (narrow) %v2270_v13, 8 }
 0x97e   :  { %2404 = vxpose.xlu0.b32.end [2/2] (short) (narrow) %v2284_v22, 8 }
 0x981   :  { %2340 = vxpose.xlu1.b32.end [2/2] (short) (narrow) %v2272_v63, 8 }
 0x9be   :  { %v2262_v23 = vpop.permute.xlu0 %2261  ;;  %v2258_v26 = vpop.permute.xlu1 %2257 }
 0x9c2   :  { %v2256_v24 = vpop.permute.xlu0 %2255  ;;  %v2266_v28 = vpop.permute.xlu1 %2265 }
 0x9c3   :  { %8694 = vmatprep.mubr.msk.f32.mxu1 %vm583_vm1, %v2256_v24 }
 0x9c6   :  { %v2260_v25 = vpop.permute.xlu0 %2259  ;;  %v2264_v29 = vpop.permute.xlu1 %2263 }
 0x9c7   :  { %8699 = vmatprep.mubr.msk.f32.mxu0 %vm583_vm1, %v2260_v25 }
 0x9f2   :  { %v2387_v27 = vpop.trf.xlu0 }
 0x9f3   :  { %8697 = vmatprep.subr.mxu0 %v2387_v27 }
 0x9f4   :  { %8698 = vmatpush3.msra.mxu0 %v2387_v27 }
 0x9f5   :  { %8700 = vmatmul.mubr.msk.f32.vlgmr.msra.gmra.mrb[14].mxu0 %vm583_vm1, %v2262_v23  ;;  %9073 = vmatprep.subr.bf16.mxu0 %v9448_v33 }
 0x9f6   :  { %8711 = vmatprep.mubr.msk.f32.mxu0 %vm9449_vm11, %v9450_v7 }
 0x9fa   :  { %v2419_v31 = vpop.trf.xlu0 }
 0x9fd   :  { %v2355_v30 = vpop.trf.xlu1 }
 0x9fe   :  { %8692 = vmatprep.subr.mxu1 %v2355_v30 }
 0x9ff   :  { %8693 = vmatpush3.msra.mxu1 %v2355_v30 }
 0xa00   :  { %8695 = vmatmul.mubr.msk.f32.vlgmr.msra.gmra.mrb[18].mxu1 %vm583_vm1, %v2258_v26  ;;  %8702 = vmatprep.subr.mxu1 %v2419_v31 }
 0xa01   :  { %8704 = vmatprep.mubr.msk.f32.mxu1 %vm583_vm1, %v2264_v29  ;;  %8703 = vmatpush3.msra.mxu1 %v2419_v31 }
 0xa02   :  { %9077 = vmatprep.subr.bf16.mxu1 %v9448_v33 }
 0xa04   :  { %8705 = vmatmul.mubr.msk.f32.vlgmr.msra.gmra.mrb[20].mxu1 %vm583_vm1, %v2266_v28 }
 0xa05   :  { %8718 = vmatprep.mubr.msk.f32.mxu1 %vm9449_vm11, %v9450_v7 }
 0xa21   :  { %v8691_v35 = vpop.f32.mrb[12].mxu0 }
 0xa22   :  { %v2511_v51 = vadd.f32 %v8691_v35, %v9810_v32  ;;  %v2505_v36 = vpop.f32.mrb[13].mxu0 }
 0xa23   :  { %v2506_v37 = vadd.f32 %v2505_v36, %v9815_v34 }
 0xa24   :  { %v2754_v38 = vsel %vm900_vm10, %v2511_v51, -inf }
 0xa25   :  { %2755 = vmax.xlane.f32.xlu0 %v2754_v38  ;;  %v2751_v39 = vsel %vm900_vm10, %v2506_v37, -inf }
 0xa26   :  { %2752 = vmax.xlane.f32.xlu1 %v2751_v39 }
 0xab2   :  { %v2756_v4 = vpop.xlane.xlu0 %2755 }
 0xab3   :  { %v2776_v6 = vsub.f32 %v2511_v51, %v2756_v4  ;;  %v2753_v8 = vpop.xlane.xlu1 %2752 }
 0xab4   :  { %v2775_v10 = vsub.f32 %v2506_v37, %v2753_v8 }
 0xab5   :  { %v2785_v9 = vmul.f32 1.442695, %v2776_v6 }
 0xab6   :  { %v2783_v11 = vmul.f32 1.442695, %v2775_v10 }
 0xab7   :  { %9299 = vpow2.f32 %v2785_v9 }
 0xab8   :  { %9301 = vpow2.f32 %v2783_v11 }
 0xac1   :  { %v9300_v14 = vpop.eup %9299 }
 0xac2   :  { %v2802_v15 = vsel %vm900_vm10, %v9300_v14, 0.0  ;;  %v9302_v16 = vpop.eup %9301 }
 0xac3   :  { %v2799_v17 = vsel %vm900_vm10, %v9302_v16, 0.0 }
 0xac8   :  { %v8701_v41 = vpop.f32.mrb[14].mxu0 }
 0xac9   :  { %v2669_v42 = vadd.f32 %v8701_v41, %v9810_v32  ;;  %v2663_v52 = vpop.f32.mrb[15].mxu0 }
 0xaca   :  { %v2664_v53 = vadd.f32 %v2663_v52, %v9815_v34 }
 0xacb   :  { %v2766_v55 = vsel %vm900_vm10, %v2669_v42, -inf }
 0xacc   :  { %2767 = vmax.xlane.f32.xlu0 %v2766_v55  ;;  %v2763_v63 = vsel %vm900_vm10, %v2664_v53, -inf }
 0xad3   :  { %v8696_v43 = vpop.f32.mrb[18].mxu1 }
 0xad4   :  { %v2590_v44 = vadd.f32 %v8696_v43, %v9810_v32  ;;  %v2584_v45 = vpop.f32.mrb[19].mxu1 }
 0xad5   :  { %v2585_v46 = vadd.f32 %v2584_v45, %v9815_v34 }
 0xad6   :  { %v2760_v47 = vsel %vm900_vm10, %v2590_v44, -inf }
 0xad7   :  { %2761 = vmax.xlane.f32.xlu1 %v2760_v47  ;;  %v8706_v48 = vpop.f32.mrb[20].mxu1  ;;  %v2757_v58 = vsel %vm900_vm10, %v2585_v46, -inf }
 0xad8   :  { %v2748_v49 = vadd.f32 %v8706_v48, %v9810_v32  ;;  %v2742_v50 = vpop.f32.mrb[21].mxu1 }
 0xad9   :  { %v2743_v61 = vadd.f32 %v2742_v50, %v9815_v34 }
 0xada   :  { %v2772_v59 = vsel %vm900_vm10, %v2748_v49, -inf }
 0xadb   :  { %2758 = vmax.xlane.f32.xlu1 %v2757_v58  ;;  %2773 = vmax.xlane.f32.xlu0 %v2772_v59  ;;  %v2769_v0 = vsel %vm900_vm10, %v2743_v61, -inf }
 0xadf   :  { %2764 = vmax.xlane.f32.xlu1 %v2763_v63 }
 0xae3   :  { %2770 = vmax.xlane.f32.xlu1 %v2769_v0 }
 0xaf1   :  { %2295 = vrot.lane.b32.xlu0 %v9836_v2, %s9444_s29 }
 0xaf4   :  { %2289 = vrot.lane.b32.xlu1 %v9836_v2, %s9445_s30 }
 0xaf8   :  { %2291 = vrot.lane.b32.xlu1 %v9842_v3, %s9445_s30 }
 0xafc   :  { %2301 = vrot.lane.b32.xlu1 %v9836_v2, %s9446_s10 }
 0xb00   :  { %2297 = vrot.lane.b32.xlu1 %v9842_v3, %s9444_s29 }
 0xb10   :  { %2803 = vadd.xlane.f32.xlu0 %v2802_v15 }
 0xb14   :  { %2800 = vadd.xlane.f32.xlu0 %v2799_v17 }
 0xb59   :  { %v2768_v5 = vpop.xlane.xlu0 %2767 }
 0xb5a   :  { %v2780_v13 = vsub.f32 %v2669_v42, %v2768_v5 }
 0xb5c   :  { %v2793_v22 = vmul.f32 1.442695, %v2780_v13 }
 0xb64   :  { %v2762_v18 = vpop.xlane.xlu1 %2761 }
 0xb65   :  { %v2778_v19 = vsub.f32 %v2590_v44, %v2762_v18 }
 0xb67   :  { %v2789_v23 = vmul.f32 1.442695, %v2778_v19 }
 0xb68   :  { %v2759_v24 = vpop.xlane.xlu1 %2758  ;;  %v2774_v25 = vpop.xlane.xlu0 %2773 }
 0xb69   :  { %9303 = vpow2.f32 %v2789_v23  ;;  %v2777_v26 = vsub.f32 %v2585_v46, %v2759_v24  ;;  %v2782_v28 = vsub.f32 %v2748_v49, %v2774_v25 }
 0xb6a   :  { %9305 = vpow2.f32 %v2793_v22 }
 0xb6b   :  { %v2787_v27 = vmul.f32 1.442695, %v2777_v26  ;;  %v2797_v31 = vmul.f32 1.442695, %v2782_v28 }
 0xb6c   :  { %v2765_v29 = vpop.xlane.xlu1 %2764  ;;  %v2296_v47 = vpop.permute.xlu0 %2295 }
 0xb6d   :  { %v2779_v30 = vsub.f32 %v2664_v53, %v2765_v29  ;;  %9307 = vpow2.f32 %v2787_v27 }
 0xb6f   :  { %v2791_v35 = vmul.f32 1.442695, %v2779_v30 }
 0xb70   :  { %v2771_v51 = vpop.xlane.xlu1 %2770 }
 0xb71   :  { %9309 = vpow2.f32 %v2791_v35  ;;  %v2781_v36 = vsub.f32 %v2743_v61, %v2771_v51 }
 0xb72   :  { %9311 = vpow2.f32 %v2797_v31 }
 0xb73   :  { %v9304_v37 = vpop.eup %9303  ;;  %v2795_v38 = vmul.f32 1.442695, %v2781_v36 }
 0xb74   :  { %v2808_v39 = vsel %vm900_vm10, %v9304_v37, 0.0  ;;  %v9853_v54 = vpop.eup %9305  ;;  %v2290_v53 = vpop.permute.xlu1 %2289 }
 0xb75   :  { %2809 = vadd.xlane.f32.xlu0 %v2808_v39  ;;  %9313 = vpow2.f32 %v2795_v38  ;;  %v2814_v40 = vsel %vm900_vm10, %v9853_v54, 0.0 }
 0xb77   :  { %v9308_v41 = vpop.eup %9307 }
 0xb78   :  { %v2805_v55 = vsel %vm900_vm10, %v9308_v41, 0.0  ;;  %v2292_v0 = vpop.permute.xlu1 %2291 }
 0xb79   :  { %2815 = vadd.xlane.f32.xlu0 %v2814_v40 }
 0xb7b   :  { %v9857_v42 = vpop.eup %9309 }
 0xb7c   :  { %v2811_v52 = vsel %vm900_vm10, %v9857_v42, 0.0  ;;  %v9312_v43 = vpop.eup %9311  ;;  %v2302_v1 = vpop.permute.xlu1 %2301 }
 0xb7d   :  { %2812 = vadd.xlane.f32.xlu1 %v2811_v52  ;;  %2806 = vadd.xlane.f32.xlu0 %v2805_v55  ;;  %v2820_v44 = vsel %vm900_vm10, %v9312_v43, 0.0 }
 0xb7f   :  { %v9314_v45 = vpop.eup %9313 }
 0xb80   :  { %v2817_v46 = vsel %vm900_vm10, %v9314_v45, 0.0  ;;  %v2298_v4 = vpop.permute.xlu1 %2297 }
 0xb81   :  { %2821 = vadd.xlane.f32.xlu1 %v2820_v44 }
 0xb85   :  { %2818 = vadd.xlane.f32.xlu1 %v2817_v46 }
 0xb93   :  { %2303 = vrot.lane.b32.xlu0 %v9842_v3, %s9446_s10 }
 0xb9d   :  { %v2804_v48 = vpop.xlane.xlu0 %2803 }
 0xb9e   :  { %9315 = vrcp.f32 %v2804_v48 }
 0xba1   :  { %v2801_v49 = vpop.xlane.xlu0 %2800 }
 0xba2   :  { %9317 = vrcp.f32 %v2801_v49 }
 0xba8   :  { %v9316_v50 = vpop.eup %9315 }
 0xba9   :  { %v2832_v59 = vmul.f32 %v9316_v50, %v9300_v14 }
 0xbac   :  { %v9318_v58 = vpop.eup %9317 }
 0xbad   :  { %v2831_v61 = vmul.f32 %v9318_v58, %v9302_v16 }
 0xbaf   :  { %v9074_v63 = vpack.c.bf16 %v2832_v59, %v2831_v61 }
 0xbb1   :  { %2871 = vxpose.xlu0.b32.start [1/2] (short) (narrow) %v2290_v53, 8  ;;  %9076 = vmatpush3.bf16.xpose.msk.msra.mxu0 %vm9661_vm12, %v9074_v63 }
 0xbb2   :  { %9081 = vmatprep.subr.bf16.mxu0 %v9448_v33 }
 0xbb5   :  { %2872 = vxpose.xlu0.b32.end [2/2] (short) (narrow) %v2292_v0, 8 }
 0xbb8   :  { %2839 = vxpose.xlu1.b32.start [1/2] (short) (narrow) %v9836_v2, 8 }
 0xbb9   :  { %2903 = vxpose.xlu0.b32.start [1/2] (short) (narrow) %v2296_v47, 8 }
 0xbbc   :  { %2840 = vxpose.xlu1.b32.end [2/2] (short) (narrow) %v9842_v3, 8 }
 0xbbd   :  { %2904 = vxpose.xlu0.b32.end [2/2] (short) (narrow) %v2298_v4, 8 }
 0xbc0   :  { %2935 = vxpose.xlu1.b32.start [1/2] (short) (narrow) %v2302_v1, 8 }
 0xc02   :  { %v2810_v6 = vpop.xlane.xlu0 %2809 }
 0xc03   :  { %9319 = vrcp.f32 %v2810_v6 }
 0xc06   :  { %v2816_v8 = vpop.xlane.xlu0 %2815 }
 0xc0a   :  { %v2807_v9 = vpop.xlane.xlu0 %2806  ;;  %v2813_v11 = vpop.xlane.xlu1 %2812 }
 0xc0b   :  { %9321 = vrcp.f32 %v2807_v9 }
 0xc0d   :  { %v9320_v14 = vpop.eup %9319 }
 0xc0e   :  { %v2304_v10 = vpop.permute.xlu0 %2303  ;;  %v2834_v16 = vmul.f32 %v9320_v14, %v9304_v37  ;;  %v2822_v5 = vpop.xlane.xlu1 %2821 }
 0xc0f   :  { %2936 = vxpose.xlu1.b32.end [2/2] (short) (narrow) %v2304_v10, 8 }
 0xc12   :  { %v2819_v3 = vpop.xlane.xlu1 %2818 }
 0xc13   :  { %9323 = vrcp.f32 %v2819_v3 }
 0xc14   :  { %9325 = vrcp.f32 %v2822_v5 }
 0xc15   :  { %v9322_v15 = vpop.eup %9321  ;;  %9327 = vrcp.f32 %v2813_v11 }
 0xc16   :  { %v2833_v17 = vmul.f32 %v9322_v15, %v9308_v41  ;;  %9329 = vrcp.f32 %v2816_v8 }
 0xc18   :  { %v9078_v2 = vpack.c.bf16 %v2834_v16, %v2833_v17 }
 0xc1a   :  { %9080 = vmatpush3.bf16.xpose.msk.msra.mxu1 %vm9661_vm12, %v9078_v2 }
 0xc1b   :  { %9085 = vmatprep.subr.bf16.mxu1 %v9448_v33 }
 0xc1d   :  { %v9324_v13 = vpop.eup %9323 }
 0xc1e   :  { %v9326_v18 = vpop.eup %9325  ;;  %v2837_v19 = vmul.f32 %v9324_v13, %v9314_v45 }
 0xc1f   :  { %v2838_v22 = vmul.f32 %v9326_v18, %v9312_v43  ;;  %v9328_v23 = vpop.eup %9327 }
 0xc20   :  { %v9330_v26 = vpop.eup %9329  ;;  %v2835_v27 = vmul.f32 %v9328_v23, %v9857_v42 }
 0xc21   :  { %v9086_v25 = vpack.c.bf16 %v2838_v22, %v2837_v19  ;;  %v2836_v28 = vmul.f32 %v9330_v26, %v9853_v54 }
 0xc23   :  { %v9082_v30 = vpack.c.bf16 %v2836_v28, %v2835_v27 }
 0xc31   :  { %v2887_v24 = vpop.trf.xlu0 }
 0xc32   :  { %8719 = vmatmul.mubr.msk.f32.vlgmr.msra.gmra.mrb[22].mxu1 %vm900_vm10, %v2887_v24 }
 0xc33   :  { %9088 = vmatpush3.bf16.xpose.msk.msra.mxu1 %vm9661_vm12, %v9086_v25  ;;  %8732 = vmatprep.mubr.msk.f32.mxu1 %vm9449_vm11, %v9450_v7 }
 0xc38   :  { %v2855_v29 = vpop.trf.xlu1 }
 0xc39   :  { %8712 = vmatmul.mubr.msk.f32.vlgmr.msra.gmra.mrb[16].mxu0 %vm900_vm10, %v2855_v29  ;;  %v2919_v31 = vpop.trf.xlu0 }
 0xc3a   :  { %9084 = vmatpush3.bf16.xpose.msk.msra.mxu0 %vm9661_vm12, %v9082_v30  ;;  %8725 = vmatprep.mubr.msk.f32.mxu0 %vm9449_vm11, %v9450_v7 }
 0xc41   :  { %8726 = vmatmul.mubr.msk.f32.vlgmr.msra.gmra.mrb[18].mxu0 %vm900_vm10, %v2919_v31 }
 0xc8b   :  { %v2951_v35 = vpop.trf.xlu1 }
 0xc8c   :  { %8733 = vmatmul.mubr.msk.f32.vlgmr.msra.gmra.mrb[24].mxu1 %vm900_vm10, %v2951_v35 }
 0xd05   :  { %v3121_v51 = vpop.f32.mrb[22].mxu1 }
 0xd06   :  { %v8720_v36 = vpop.f32.mrb[23].mxu1  ;;  %3315 = vxpose.xlu1.b32.start.end [1/1] (short) (narrow) %v3121_v51, 16 }
 0xd0c   :  { %v3042_v37 = vpop.f32.mrb[16].mxu0 }
 0xd0d   :  { %3283 = vxpose.xlu0.b32.start.end [1/1] (short) (narrow) %v3042_v37, 16  ;;  %v8713_v38 = vpop.f32.mrb[17].mxu0 }
 0xd14   :  { %v3200_v39 = vpop.f32.mrb[18].mxu0 }
 0xd15   :  { %3347 = vxpose.xlu0.b32.start.end [1/1] (short) (narrow) %v3200_v39, 16  ;;  %v8727_v54 = vpop.f32.mrb[19].mxu0 }
 0xd5f   :  { %v3279_v40 = vpop.f32.mrb[24].mxu1 }
 0xd60   :  { %3379 = vxpose.xlu1.b32.start.end [1/1] (short) (narrow) %v3279_v40, 16  ;;  %v8734_v41 = vpop.f32.mrb[25].mxu1 }
 0xd86   :  { %v3331_v52 = vpop.trf.xlu1 }
 0xd8a   :  { %v3332_v43 = vpop.trf.xlu1 }
 0xd8d   :  { %v3299_v42 = vpop.trf.xlu0 }
 0xd91   :  { %v3300_v55 = vpop.trf.xlu0 }
 0xd95   :  { %v3363_v44 = vpop.trf.xlu0 }
 0xd96   :  { %v3411_v45 = vcombine.low %v3299_v42, %v3363_v44  ;;  %v3412_v46 = vcombine.high %v3299_v42, %v3363_v44 }
 0xd98   :  { %v3419_v53 = vrot.slane %v3411_v45, %v9687_v12  ;;  %v3426_v58 = vrot.slane %v3412_v46, %v9687_v12 }
 0xd99   :  { %v3364_v48 = vpop.trf.xlu0 }
 0xd9a   :  { %v3479_v63 = vcombine.low %v3300_v55, %v3364_v48  ;;  %v3480_v0 = vcombine.high %v3300_v55, %v3364_v48 }
 0xd9c   :  { %v3487_v5 = vrot.slane %v3479_v63, %v9687_v12  ;;  %v3494_v2 = vrot.slane %v3480_v0, %v9687_v12 }
 0xde0   :  { %v3395_v47 = vpop.trf.xlu1 }
 0xde1   :  { %v3427_v49 = vcombine.low %v3331_v52, %v3395_v47  ;;  %v3428_v50 = vcombine.high %v3331_v52, %v3395_v47  ;;  %v117_v47 = vld [vmem:[#allocation2 + $0xe0] sm:$0xff] }
 0xde3   :  { %v3435_v59 = vrot.slane %v3427_v49, %v9687_v12  ;;  %v3442_v61 = vrot.slane %v3428_v50, %v9687_v12 }
 0xde4   :  { %v3396_v1 = vpop.trf.xlu1 }
 0xde5   :  { %v3443_v4 = vcombine.low %v3419_v53, %v3435_v59  ;;  %v3444_v6 = vcombine.high %v3419_v53, %v3435_v59  ;;  %v3459_v8 = vcombine.low %v3426_v58, %v3442_v61  ;;  %v3460_v9 = vcombine.high %v3426_v58, %v3442_v61  ;;  %v118_v58 = vld [vmem:[#allocation2 + $0xe8] sm:$0xff]  ;;  %v119_v59 = vld [vmem:[#allocation2 + $0xf0] sm:$0xff]  ;;  %v120_v61 = vld [vmem:[#allocation2 + $0xf8] sm:$0xff] }
 0xde6   :  { %v3495_v10 = vcombine.low %v3332_v43, %v3396_v1  ;;  %v3496_v11 = vcombine.high %v3332_v43, %v3396_v1 }
 0xde7   :  { %v3451_v14 = vrot.slane %v3443_v4, %v9690_v21  ;;  %v3458_v15 = vrot.slane %v3444_v6, %v9690_v21  ;;  %v3467_v16 = vrot.slane %v3459_v8, %v9690_v21  ;;  %v3474_v17 = vrot.slane %v3460_v9, %v9690_v21 }
 0xde8   :  { %v3503_v3 = vrot.slane %v3495_v10, %v9687_v12  ;;  %v3510_v13 = vrot.slane %v3496_v11, %v9687_v12  ;;  %v9089_v10 = vpack.c.bf16 %v118_v58, %v117_v47  ;;  %v9093_v11 = vpack.c.bf16 %v120_v61, %v119_v59  ;;  %v139_v59 = vld [vmem:[%s10471_s3 + $0x18] sm:$0xff] }
 0xde9   :  { %v3547_v18 = vcombine.low %v3451_v14, %v3458_v15  ;;  %v8200_v19 = vcombine.high %v3451_v14, %v3458_v15  ;;  %v3563_v22 = vcombine.low %v3467_v16, %v3474_v17  ;;  %v8201_v23 = vcombine.high %v3467_v16, %v3474_v17 }
 0xdea   :  { %v3511_v24 = vcombine.low %v3487_v5, %v3503_v3  ;;  %v3512_v25 = vcombine.high %v3487_v5, %v3503_v3  ;;  %v3527_v26 = vcombine.low %v3494_v2, %v3510_v13  ;;  %v3528_v27 = vcombine.high %v3494_v2, %v3510_v13  ;;  %9090 = vmatprep.subr.bf16.mxu0 %v9089_v10 }
 0xdeb   :  { %v3554_v28 = vrot.slane %v3547_v18, %v9687_v12  ;;  %v3562_v29 = vrot.slane %v8200_v19, %v9687_v12  ;;  %v3570_v30 = vrot.slane %v3563_v22, %v9687_v12  ;;  %v3578_v31 = vrot.slane %v8201_v23, %v9687_v12  ;;  %9092 = vmatpush3.bf16.msra.mxu0 %v9089_v10  ;;  %v145_v10 = vld [vmem:[%s10472_s4 + $0x28] sm:$0xff] }
 0xdec   :  { %v3519_v35 = vrot.slane %v3511_v24, %v9690_v21  ;;  %v3526_v51 = vrot.slane %v3512_v25, %v9690_v21  ;;  %v3535_v36 = vrot.slane %v3527_v26, %v9690_v21  ;;  %v3542_v37 = vrot.slane %v3528_v27, %v9690_v21  ;;  %9094 = vmatprep.subr.bf16.mxu0 %v9093_v11 }
 0xded   :  { %v3580_v38 = vcombine.high %v3554_v28, %v3562_v29  ;;  %v3596_v39 = vcombine.high %v3570_v30, %v3578_v31  ;;  %v3579_v54 = vcombine.low %v3554_v28, %v3562_v29  ;;  %v3595_v40 = vcombine.low %v3570_v30, %v3578_v31 }
 0xdee   :  { %v3615_v41 = vcombine.low %v3519_v35, %v3526_v51  ;;  %v8202_v42 = vcombine.high %v3519_v35, %v3526_v51  ;;  %v3631_v52 = vcombine.low %v3535_v36, %v3542_v37  ;;  %v8203_v55 = vcombine.high %v3535_v36, %v3542_v37  ;;  %v8204_v51 = vld [vmem:[%s10474_s6 + $0x7] ss:$0 sm:$0xff] }
 0xdef   :  { %v3594_v43 = vrot.slane %v3580_v38, %v9690_v21  ;;  %v3610_v44 = vrot.slane %v3596_v39, %v9690_v21  ;;  %v3587_v45 = vrot.slane %v3579_v54, %v9690_v21  ;;  %v3603_v46 = vrot.slane %v3595_v40, %v9690_v21  ;;  %9096 = vmatpush3.bf16.msra.mxu0 %v9093_v11 }
 0xdf0   :  { %v3622_v48 = vrot.slane %v3615_v41, %v9687_v12  ;;  %v3630_v49 = vrot.slane %v8202_v42, %v9687_v12  ;;  %v3638_v50 = vrot.slane %v3631_v52, %v9687_v12  ;;  %v3646_v53 = vrot.slane %v8203_v55, %v9687_v12 }
 0xdf1   :  { %v3613_v63 = vcombine.low %v3594_v43, %v3610_v44  ;;  %v3612_v0 = vcombine.high %v3587_v45, %v3603_v46  ;;  %v3611_v1 = vcombine.low %v3587_v45, %v3603_v46  ;;  %v3614_v16 = vcombine.high %v3594_v43, %v3610_v44 }
 0xdf2   :  { %v3647_v4 = vcombine.low %v3622_v48, %v3630_v49  ;;  %v3663_v6 = vcombine.low %v3638_v50, %v3646_v53  ;;  %v3648_v8 = vcombine.high %v3622_v48, %v3630_v49  ;;  %v3664_v9 = vcombine.high %v3638_v50, %v3646_v53  ;;  %v137_v50 = vld [vmem:[%s10471_s3 + $0x8] sm:$0xff]  ;;  %v138_v53 = vld [vmem:[%s10471_s3 + $0x10] sm:$0xff] }
 0xdf3   :  { %3693 = vrot.lane.b32.xlu1 %v3613_v63, %s9453_s13  ;;  %3685 = vrot.lane.b32.xlu0 %v3612_v0, %s9443_s20  ;;  %v9101_v61 = vpack.c.bf16 %v139_v59, %v138_v53  ;;  %v140_v63 = vld [vmem:[%s10472_s4] sm:$0xff]  ;;  %v141_v0 = vld [vmem:[%s10472_s4 + $0x8] sm:$0xff] }
 0xdf4   :  { %v3655_v14 = vrot.slane %v3647_v4, %v9690_v21  ;;  %v3671_v15 = vrot.slane %v3663_v6, %v9690_v21  ;;  %v3662_v5 = vrot.slane %v3648_v8, %v9690_v21  ;;  %v3678_v2 = vrot.slane %v3664_v9, %v9690_v21  ;;  %v143_v6 = vld [vmem:[%s10472_s4 + $0x18] sm:$0xff]  ;;  %v144_v9 = vld [vmem:[%s10472_s4 + $0x20] sm:$0xff] }
 0xdf5   :  { %v9105_v4 = vpack.c.bf16 %v141_v0, %v140_v63  ;;  %v9113_v11 = vpack.c.bf16 %v145_v10, %v144_v9  ;;  %v4067_v63 = vld [vmem:[#allocation2 + $0x108] sm:$0xff]  ;;  %v4074_v0 = vld [vmem:[#allocation2 + $0x140] sm:$0xff] }
 0xdf6   :  { %v3680_v17 = vcombine.high %v3655_v14, %v3671_v15  ;;  %v3679_v3 = vcombine.low %v3655_v14, %v3671_v15  ;;  %v3681_v13 = vcombine.low %v3662_v5, %v3678_v2  ;;  %v3682_v18 = vcombine.high %v3662_v5, %v3678_v2 }
 0xdf7   :  { %3701 = vrot.lane.b32.xlu0 %v3614_v16, %s9454_s14  ;;  %9106 = vmatprep.subr.bf16.mxu0 %v9105_v4 }
 0xdf8   :  { %3687 = vrot.lane.b32.xlu1 %v3680_v17, %s9443_s20 }
 0xdfc   :  { %3695 = vrot.lane.b32.xlu1 %v3681_v13, %s9453_s13  ;;  %v8207_v13 = vld [vmem:[%s10474_s6 + $0xb] ss:$0 sm:$0xff] }
 0xe00   :  { %3703 = vrot.lane.b32.xlu1 %v3682_v18, %s9454_s14 }
 0xe65   :  { %v3694_v19 = vpop.permute.xlu1 %3693  ;;  %v3686_v22 = vpop.permute.xlu0 %3685 }
 0xe66   :  { %v3707_v23 = vsel %vm583_vm1, %v3611_v1, %v3686_v22  ;;  %v142_v1 = vld [vmem:[%s10472_s4 + $0x10] sm:$0xff] }
 0xe67   :  { %v3709_v24 = vsel %vm900_vm10, %v3707_v23, %v3694_v19  ;;  %v9109_v8 = vpack.c.bf16 %v143_v6, %v142_v1  ;;  %v8208_v19 = vld [vmem:[%s10474_s6 + $0xc] ss:$0 sm:$0xff]  ;;  %v4068_v6 = vld [vmem:[#allocation2 + $0x110] sm:$0xff] }
 0xe69   :  { %v3702_v25 = vpop.permute.xlu0 %3701 }
 0xe6a   :  { %v3688_v26 = vpop.permute.xlu1 %3687  ;;  %v3711_v27 = vsel %vm1861_vm13, %v3709_v24, %v3702_v25 }
 0xe6b   :  { %8743 = vmatprep.mubr.msk.f32.mxu0 %vm155_vm0, %v3711_v27  ;;  %v3708_v29 = vsel %vm583_vm1, %v3679_v3, %v3688_v26 }
 0xe6e   :  { %v3696_v28 = vpop.permute.xlu1 %3695 }
 0xe6f   :  { %v3710_v30 = vsel %vm900_vm10, %v3708_v29, %v3696_v28  ;;  %v146_v28 = vld [vmem:[%s10472_s4 + $0x30] sm:$0xff]  ;;  %v147_v29 = vld [vmem:[%s10472_s4 + $0x38] sm:$0xff] }
 0xe72   :  { %v3704_v31 = vpop.permute.xlu1 %3703 }
 0xe73   :  { %v3712_v35 = vsel %vm1861_vm13, %v3710_v30, %v3704_v31  ;;  %v9117_v30 = vpack.c.bf16 %v147_v29, %v146_v28  ;;  %v8209_v31 = vld [vmem:[%s10473_s5] ss:$0 sm:$0xff]  ;;  %v8216_v28 = vld [vmem:[%s10474_s6 + $0xe] ss:$0 sm:$0xff] }
 0xe74   :  { %8744 = vmatmul.mubr.msk.f32.vlgmr.msra.gmra.mrb[20].mxu0 %vm155_vm0, %v3712_v35 }
 0xe75   :  { %9108 = vmatpush3.bf16.msra.mxu0 %v9105_v4  ;;  %v4075_v4 = vld [vmem:[#allocation2 + $0x148] sm:$0xff] }
 0xe76   :  { %9110 = vmatprep.subr.bf16.mxu0 %v9109_v8  ;;  %v9137_v9 = vpack.c.bf16 %v4075_v4, %v4074_v0 }
 0xe79   :  { %9112 = vmatpush3.bf16.msra.mxu0 %v9109_v8  ;;  %v4069_v8 = vld [vmem:[#allocation2 + $0x118] sm:$0xff] }
 0xe7a   :  { %9114 = vmatprep.subr.bf16.mxu0 %v9113_v11  ;;  %v9125_v10 = vpack.c.bf16 %v4069_v8, %v4068_v6 }
 0xe7d   :  { %9116 = vmatpush3.bf16.msra.mxu0 %v9113_v11  ;;  %v4076_v11 = vld [vmem:[#allocation2 + $0x150] sm:$0xff] }
 0xe7e   :  { %9118 = vmatprep.subr.bf16.mxu0 %v9117_v30 }
 0xe81   :  { %9120 = vmatpush3.bf16.msra.mxu0 %v9117_v30 }
 0xe82   :  { %9138 = vmatprep.subr.bf16.mxu0 %v9137_v9 }
 0xf47   :  { %v8745_v36 = vpop.f32.mrb[20].mxu0 }
 0xf48   :  { %v3797_v37 = vadd.f32 %v8745_v36, %v8204_v51  ;;  %v3791_v38 = vpop.f32.mrb[21].mxu0 }
 0xf49   :  { %v3792_v39 = vadd.f32 %v8204_v51, %v3791_v38 }
 0xf4a   :  { %v3801_v54 = vadd.f32 %v3797_v37, %v9777_v62 }
 0xf4b   :  { %v3800_v40 = vadd.f32 %v3792_v39, %v9773_v60  ;;  %v136_v60 = vld [vmem:[%s10471_s3] sm:$0xff] }
 0xf4c   :  { %v3805_v41 = vsel %vm155_vm0, %v3801_v54, 0.0  ;;  %v9097_v58 = vpack.c.bf16 %v137_v50, %v136_v60 }
 0xf4d   :  { %3806 = vadd.xlane.f32.xlu1 %v3805_v41  ;;  %v3802_v42 = vsel %vm155_vm0, %v3800_v40, 0.0 }
 0xf4e   :  { %3803 = vadd.xlane.f32.xlu0 %v3802_v42  ;;  %9098 = vmatprep.subr.bf16.mxu1 %v9097_v58 }
 0xf4f   :  { %9100 = vmatpush3.bf16.msra.mxu1 %v9097_v58 }
 0xf50   :  { %9102 = vmatprep.subr.bf16.mxu1 %v9101_v61 }
 0xf53   :  { %9104 = vmatpush3.bf16.msra.mxu1 %v9101_v61  ;;  %v4066_v61 = vld [vmem:[#allocation2 + $0x100] sm:$0xff] }
 0xf54   :  { %v9121_v1 = vpack.c.bf16 %v4067_v63, %v4066_v61 }
 0xf56   :  { %9122 = vmatprep.subr.bf16.mxu1 %v9121_v1 }
 0xfda   :  { %v3807_v52 = vpop.xlane.xlu1 %3806 }
 0xfdb   :  { %v3809_v55 = vmul.f32 0.03125, %v3807_v52  ;;  %v3804_v43 = vpop.xlane.xlu0 %3803 }
 0xfdc   :  { %v3808_v44 = vmul.f32 0.03125, %v3804_v43 }
 0xfdd   :  { %v3811_v45 = vsub.f32 %v3801_v54, %v3809_v55  ;;  %v8212_v54 = vld [vmem:[%s10474_s6 + $0x8] ss:$0 sm:$0xff] }
 0xfde   :  { %v3810_v46 = vsub.f32 %v3800_v40, %v3808_v44 }
 0xfdf   :  { %v3813_v49 = vmul.f32 %v3811_v45, %v3811_v45 }
 0xfe0   :  { %v3812_v47 = vmul.f32 %v3810_v46, %v3810_v46 }
 0xfe1   :  { %v3817_v62 = vsel %vm155_vm0, %v3813_v49, 0.0 }
 0xfe2   :  { %v3814_v48 = vsel %vm155_vm0, %v3812_v47, 0.0 }
 0xfe3   :  { %3815 = vadd.xlane.f32.xlu0 %v3814_v48 }
 0xfe7   :  { %3818 = vadd.xlane.f32.xlu0 %v3817_v62 }
0x1070   :  { %v3816_v14 = vpop.xlane.xlu0 %3815 }
0x1071   :  { %v3820_v15 = vmul.f32 0.03125, %v3816_v14  ;;  %v4077_v14 = vld [vmem:[#allocation2 + $0x158] sm:$0xff] }
0x1073   :  { %v3822_v16 = vadd.f32 1e-05, %v3820_v15  ;;  %v9141_v15 = vpack.c.bf16 %v4077_v14, %v4076_v11 }
0x1074   :  { %v3819_v17 = vpop.xlane.xlu0 %3818 }
0x1075   :  { %9331 = vrsqrt.f32 %v3822_v16  ;;  %v3821_v5 = vmul.f32 0.03125, %v3819_v17  ;;  %v4070_v16 = vld [vmem:[#allocation2 + $0x120] sm:$0xff]  ;;  %v4071_v17 = vld [vmem:[#allocation2 + $0x128] sm:$0xff] }
0x1077   :  { %v3823_v2 = vadd.f32 1e-05, %v3821_v5  ;;  %v9129_v5 = vpack.c.bf16 %v4071_v17, %v4070_v16 }
0x1079   :  { %9333 = vrsqrt.f32 %v3823_v2 }
0x107f   :  { %v9332_v3 = vpop.eup %9331 }
0x1080   :  { %v3826_v18 = vmul.f32 %v9332_v3, %v3810_v46 }
0x1082   :  { %v3834_v22 = vmul.f32 %v8207_v13, %v3826_v18 }
0x1083   :  { %v9334_v23 = vpop.eup %9333 }
0x1084   :  { %v3827_v24 = vmul.f32 %v9334_v23, %v3811_v45  ;;  %v3842_v25 = vadd.f32 %v8208_v19, %v3834_v22 }
0x1086   :  { %v3835_v26 = vmul.f32 %v8207_v13, %v3827_v24  ;;  %8754 = vmatprep.mubr.msk.f32.mxu1 %vm155_vm0, %v3842_v25  ;;  %v8215_v24 = vld [vmem:[%s10474_s6 + $0xd] ss:$0 sm:$0xff] }
0x1088   :  { %v3843_v27 = vadd.f32 %v8208_v19, %v3835_v26 }
0x108a   :  { %8755 = vmatmul.mubr.msk.f32.vlgmr.msra.gmra.mrb[26].mxu1 %vm155_vm0, %v3843_v27 }
0x108b   :  { %9124 = vmatpush3.bf16.msra.mxu1 %v9121_v1 }
0x108c   :  { %9126 = vmatprep.subr.bf16.mxu1 %v9125_v10 }
0x108f   :  { %9128 = vmatpush3.bf16.msra.mxu1 %v9125_v10 }
0x1090   :  { %9130 = vmatprep.subr.bf16.mxu1 %v9129_v5 }
0x115d   :  { %v8756_v35 = vpop.f32.mrb[26].mxu1 }
0x115e   :  { %v3928_v51 = vadd.f32 %v8756_v35, %v8209_v31  ;;  %v3922_v36 = vpop.f32.mrb[27].mxu1  ;;  %v4073_v35 = vld [vmem:[#allocation2 + $0x138] sm:$0xff] }
0x115f   :  { %v3923_v37 = vadd.f32 %v8209_v31, %v3922_v36  ;;  %v4072_v31 = vld [vmem:[#allocation2 + $0x130] sm:$0xff] }
0x1160   :  { %v3932_v39 = vmax.f32 %v3928_v51, 0.0 }
0x1161   :  { %v3931_v38 = vmax.f32 %v3923_v37, 0.0  ;;  %v9133_v37 = vpack.c.bf16 %v4073_v35, %v4072_v31 }
0x1163   :  { %8773 = vmatprep.mubr.msk.f32.mxu0 %vm3939_vm14, %v3931_v38  ;;  %v8245_v38 = vld [vmem:[%s10474_s6 + $0xf] ss:$0 sm:$0xff] }
0x1164   :  { %8774 = vmatmul.mubr.msk.f32.vlgmr.msra.gmra.mrb[22].mxu0 %vm3939_vm14, %v3932_v39 }
0x1165   :  { %9140 = vmatpush3.bf16.msra.mxu0 %v9137_v9 }
0x1166   :  { %9142 = vmatprep.subr.bf16.mxu0 %v9141_v15 }
0x1169   :  { %9144 = vmatpush3.bf16.msra.mxu0 %v9141_v15 }
0x1237   :  { %v8775_v40 = vpop.f32.mrb[22].mxu0 }
0x1238   :  { %v4018_v41 = vadd.f32 %v8775_v40, %v8212_v54  ;;  %v4012_v42 = vpop.f32.mrb[23].mxu0 }
0x1239   :  { %v4013_v52 = vadd.f32 %v8212_v54, %v4012_v42 }
0x123a   :  { %v4022_v55 = vadd.f32 %v4018_v41, %v3843_v27 }
0x123b   :  { %v4021_v43 = vadd.f32 %v4013_v52, %v3842_v25 }
0x123c   :  { %v4026_v44 = vsel %vm155_vm0, %v4022_v55, 0.0 }
0x123d   :  { %4027 = vadd.xlane.f32.xlu0 %v4026_v44  ;;  %v4023_v45 = vsel %vm155_vm0, %v4021_v43, 0.0  ;;  %v8248_v44 = vld [vmem:[%s10474_s6 + $0x10] ss:$0 sm:$0xff] }
0x123e   :  { %4024 = vadd.xlane.f32.xlu1 %v4023_v45 }
0x12ca   :  { %v4028_v46 = vpop.xlane.xlu0 %4027 }
0x12cb   :  { %v4030_v47 = vmul.f32 0.03125, %v4028_v46  ;;  %v4025_v48 = vpop.xlane.xlu1 %4024 }
0x12cc   :  { %v4029_v49 = vmul.f32 0.03125, %v4025_v48 }
0x12cd   :  { %v4032_v62 = vsub.f32 %v4022_v55, %v4030_v47 }
0x12ce   :  { %v4031_v60 = vsub.f32 %v4021_v43, %v4029_v49 }
0x12cf   :  { %v4034_v50 = vmul.f32 %v4032_v62, %v4032_v62 }
0x12d0   :  { %v4033_v53 = vmul.f32 %v4031_v60, %v4031_v60 }
0x12d1   :  { %v4038_v58 = vsel %vm155_vm0, %v4034_v50, 0.0 }
0x12d2   :  { %4039 = vadd.xlane.f32.xlu0 %v4038_v58  ;;  %v4035_v59 = vsel %vm155_vm0, %v4033_v53, 0.0 }
0x12d3   :  { %4036 = vadd.xlane.f32.xlu1 %v4035_v59 }
0x135f   :  { %v4040_v2 = vpop.xlane.xlu0 %4039 }
0x1360   :  { %v4042_v3 = vmul.f32 0.03125, %v4040_v2  ;;  %v4037_v13 = vpop.xlane.xlu1 %4036 }
0x1361   :  { %v4041_v18 = vmul.f32 0.03125, %v4037_v13 }
0x1362   :  { %v4044_v19 = vadd.f32 1e-05, %v4042_v3 }
0x1363   :  { %v4043_v22 = vadd.f32 1e-05, %v4041_v18 }
0x1364   :  { %9335 = vrsqrt.f32 %v4044_v19 }
0x1365   :  { %9337 = vrsqrt.f32 %v4043_v22 }
0x136e   :  { %v9336_v23 = vpop.eup %9335 }
0x136f   :  { %v9338_v25 = vpop.eup %9337  ;;  %v4048_v26 = vmul.f32 %v9336_v23, %v4032_v62 }
0x1370   :  { %v4047_v27 = vmul.f32 %v9338_v25, %v4031_v60 }
0x1371   :  { %v4056_v29 = vmul.f32 %v8215_v24, %v4048_v26 }
0x1372   :  { %v4055_v30 = vmul.f32 %v8215_v24, %v4047_v27 }
0x1373   :  { %v10007_v36 = vadd.f32 %v8216_v28, %v4056_v29 }
0x1374   :  { %v10005_v51 = vadd.f32 %v8216_v28, %v4055_v30 }
0x1376   :  { %8784 = vmatprep.mubr.msk.f32.mxu1 %vm155_vm0, %v10005_v51  ;;  %8806 = vmatprep.mubr.msk.f32.mxu0 %vm155_vm0, %v10005_v51 }
0x1377   :  { %8785 = vmatmul.mubr.msk.f32.vlgmr.msra.gmra.mrb[28].mxu1 %vm155_vm0, %v10007_v36  ;;  %8807 = vmatmul.mubr.msk.f32.vlgmr.msra.gmra.mrb[24].mxu0 %vm155_vm0, %v10007_v36 }
0x1378   :  { %9132 = vmatpush3.bf16.msra.mxu1 %v9129_v5  ;;  %8795 = vmatprep.mubr.msk.f32.mxu1 %vm155_vm0, %v10005_v51 }
0x1379   :  { %9134 = vmatprep.subr.bf16.mxu1 %v9133_v37 }
0x137c   :  { %9136 = vmatpush3.bf16.msra.mxu1 %v9133_v37 }
0x137f   :  { %8796 = vmatmul.mubr.msk.f32.vlgmr.msra.gmra.mrb[30].mxu1 %vm155_vm0, %v10007_v36 }
0x144a   :  { %v8786_v39 = vpop.f32.mrb[28].mxu1  ;;  %v10024_v54 = vpop.f32.mrb[24].mxu0 }
0x144b   :  { %v4214_v40 = vadd.f32 %v8786_v39, %v8245_v38  ;;  %v4208_v41 = vpop.f32.mrb[29].mxu1  ;;  %v10026_v42 = vpop.f32.mrb[25].mxu0  ;;  %v8251_v39 = vld [vmem:[%s10474_s6 + $0x11] ss:$0 sm:$0xff] }
0x144c   :  { %v4209_v52 = vadd.f32 %v8245_v38, %v4208_v41 }
0x144d   :  { %v4218_v55 = vmul.f32 0.35355338, %v4214_v40  ;;  %v10077_v40 = vadd.f32 %v8251_v39, %v10026_v42 }
0x144e   :  { %v4217_v43 = vmul.f32 0.35355338, %v4209_v52 }
0x144f   :  { %4385 = vrot.lane.b32.xlu1 %v4218_v55, %s9445_s30 }
0x1450   :  { %8811 = vmatprep.mubr.msk.f32.mxu1 %vm583_vm1, %v4217_v43 }
0x1452   :  { %v8797_v45 = vpop.f32.mrb[30].mxu1 }
0x1453   :  { %v4297_v46 = vadd.f32 %v8797_v45, %v8248_v44  ;;  %v4291_v47 = vpop.f32.mrb[31].mxu1 }
0x1454   :  { %v4292_v48 = vadd.f32 %v8248_v44, %v4291_v47 }
0x1455   :  { %4411 = vrot.lane.b32.xlu1 %v4297_v46, %s9446_s10  ;;  %4399 = vrot.lane.b32.xlu0 %v4297_v46, %s9445_s30 }
0x1459   :  { %4397 = vrot.lane.b32.xlu1 %v4292_v48, %s9445_s30  ;;  %4383 = vrot.lane.b32.xlu0 %v4217_v43, %s9445_s30 }
0x145d   :  { %4403 = vrot.lane.b32.xlu1 %v4292_v48, %s9444_s29  ;;  %4405 = vrot.lane.b32.xlu0 %v4297_v46, %s9444_s29 }
0x1461   :  { %4409 = vrot.lane.b32.xlu1 %v4292_v48, %s9446_s10  ;;  %4387 = vrot.lane.b32.xlu0 %v4217_v43, %s9444_s29 }
0x1465   :  { %4391 = vrot.lane.b32.xlu1 %v4217_v43, %s9446_s10  ;;  %4389 = vrot.lane.b32.xlu0 %v4218_v55, %s9444_s29 }
0x1469   :  { %4393 = vrot.lane.b32.xlu1 %v4218_v55, %s9446_s10 }
0x1483   :  { %4435 = vxpose.xlu0.b32.start [1/2] (short) (narrow) %v4292_v48, 8 }
0x1487   :  { %4436 = vxpose.xlu0.b32.end [2/2] (short) (narrow) %v4297_v46, 8 }
0x14c1   :  { %v4386_v49 = vpop.permute.xlu1 %4385 }
0x14c7   :  { %v4412_v62 = vpop.permute.xlu1 %4411  ;;  %v4400_v60 = vpop.permute.xlu0 %4399 }
0x14cb   :  { %v4398_v50 = vpop.permute.xlu1 %4397  ;;  %v4384_v53 = vpop.permute.xlu0 %4383 }
0x14cc   :  { %4467 = vxpose.xlu1.b32.start [1/2] (short) (narrow) %v4398_v50, 8 }
0x14cf   :  { %v4404_v58 = vpop.permute.xlu1 %4403  ;;  %v4406_v59 = vpop.permute.xlu0 %4405 }
0x14d0   :  { %4468 = vxpose.xlu1.b32.end [2/2] (short) (narrow) %v4400_v60, 8  ;;  %4499 = vxpose.xlu0.b32.start [1/2] (short) (narrow) %v4404_v58, 8 }
0x14d3   :  { %v4388_v61 = vpop.permute.xlu0 %4387  ;;  %v4410_v63 = vpop.permute.xlu1 %4409 }
0x14d4   :  { %4500 = vxpose.xlu0.b32.end [2/2] (short) (narrow) %v4406_v59, 8  ;;  %8821 = vmatprep.mubr.msk.f32.mxu0 %vm583_vm1, %v4388_v61 }
0x14d7   :  { %v4390_v0 = vpop.permute.xlu0 %4389  ;;  %v4392_v4 = vpop.permute.xlu1 %4391 }
0x14d8   :  { %4531 = vxpose.xlu0.b32.start [1/2] (short) (narrow) %v4410_v63, 8 }
0x14db   :  { %v4394_v6 = vpop.permute.xlu1 %4393 }
0x14dc   :  { %4532 = vxpose.xlu0.b32.end [2/2] (short) (narrow) %v4412_v62, 8 }
0x1503   :  { %v4451_v1 = vpop.trf.xlu0 }
0x1504   :  { %8809 = vmatprep.subr.mxu1 %v4451_v1 }
0x1505   :  { %8810 = vmatpush3.msra.mxu1 %v4451_v1 }
0x1506   :  { %8812 = vmatmul.mubr.msk.f32.vlgmr.msra.gmra.mrb[32].mxu1 %vm583_vm1, %v4218_v55 }
0x1507   :  { %8816 = vmatprep.mubr.msk.f32.mxu1 %vm583_vm1, %v4384_v53 }
0x154c   :  { %v4483_v8 = vpop.trf.xlu1 }
0x154d   :  { %8814 = vmatprep.subr.mxu1 %v4483_v8 }
0x154e   :  { %8815 = vmatpush3.msra.mxu1 %v4483_v8 }
0x154f   :  { %8817 = vmatmul.mubr.msk.f32.vlgmr.msra.gmra.mrb[34].mxu1 %vm583_vm1, %v4386_v49 }
0x1550   :  { %v4515_v9 = vpop.trf.xlu0  ;;  %8826 = vmatprep.mubr.msk.f32.mxu1 %vm583_vm1, %v4392_v4 }
0x1551   :  { %8819 = vmatprep.subr.mxu0 %v4515_v9 }
0x1552   :  { %8820 = vmatpush3.msra.mxu0 %v4515_v9 }
0x1553   :  { %8822 = vmatmul.mubr.msk.f32.vlgmr.msra.gmra.mrb[26].mxu0 %vm583_vm1, %v4390_v0  ;;  %9145 = vmatprep.subr.bf16.mxu0 %v9448_v33 }
0x1554   :  { %8833 = vmatprep.mubr.msk.f32.mxu0 %vm9449_vm11, %v9450_v7 }
0x1558   :  { %v4547_v10 = vpop.trf.xlu0 }
0x1559   :  { %8824 = vmatprep.subr.mxu1 %v4547_v10 }
0x155a   :  { %8825 = vmatpush3.msra.mxu1 %v4547_v10 }
0x155b   :  { %8827 = vmatmul.mubr.msk.f32.vlgmr.msra.gmra.mrb[36].mxu1 %vm583_vm1, %v4394_v6  ;;  %9149 = vmatprep.subr.bf16.mxu1 %v9448_v33 }
0x155c   :  { %8840 = vmatprep.mubr.msk.f32.mxu1 %vm9449_vm11, %v9450_v7 }
0x15d9   :  { %v8813_v11 = vpop.f32.mrb[32].mxu1 }
0x15da   :  { %v4639_v14 = vadd.f32 %v8813_v11, %v9586_v56  ;;  %v4633_v15 = vpop.f32.mrb[33].mxu1 }
0x15db   :  { %v4634_v16 = vadd.f32 %v4633_v15, %v9589_v57 }
0x15dc   :  { %v4882_v17 = vsel %vm900_vm10, %v4639_v14, -inf }
0x15dd   :  { %4883 = vmax.xlane.f32.xlu0 %v4882_v17  ;;  %v4879_v5 = vsel %vm900_vm10, %v4634_v16, -inf }
0x15de   :  { %4880 = vmax.xlane.f32.xlu1 %v4879_v5 }
0x1622   :  { %v8818_v2 = vpop.f32.mrb[34].mxu1 }
0x1623   :  { %v4718_v3 = vadd.f32 %v8818_v2, %v9586_v56  ;;  %v4712_v13 = vpop.f32.mrb[35].mxu1 }
0x1624   :  { %v4713_v18 = vadd.f32 %v4712_v13, %v9589_v57 }
0x1625   :  { %v4888_v19 = vsel %vm900_vm10, %v4718_v3, -inf }
0x1626   :  { %v8823_v22 = vpop.f32.mrb[26].mxu0  ;;  %4889 = vmax.xlane.f32.xlu1 %v4888_v19  ;;  %v4885_v27 = vsel %vm900_vm10, %v4713_v18, -inf }
0x1627   :  { %v4797_v23 = vadd.f32 %v8823_v22, %v9586_v56  ;;  %v4791_v24 = vpop.f32.mrb[27].mxu0 }
0x1628   :  { %v4792_v25 = vadd.f32 %v4791_v24, %v9589_v57 }
0x1629   :  { %v4894_v26 = vsel %vm900_vm10, %v4797_v23, -inf }
0x162a   :  { %4895 = vmax.xlane.f32.xlu0 %v4894_v26  ;;  %4886 = vmax.xlane.f32.xlu1 %v4885_v27  ;;  %v4891_v28 = vsel %vm900_vm10, %v4792_v25, -inf }
0x162e   :  { %v8828_v29 = vpop.f32.mrb[36].mxu1  ;;  %4892 = vmax.xlane.f32.xlu1 %v4891_v28 }
0x162f   :  { %v4876_v30 = vadd.f32 %v8828_v29, %v9586_v56  ;;  %v4870_v31 = vpop.f32.mrb[37].mxu1  ;;  %v10082_v56 = vadd.f32 %v10024_v54, %v8251_v39 }
0x1630   :  { %v4871_v35 = vadd.f32 %v4870_v31, %v9589_v57 }
0x1631   :  { %v4900_v37 = vsel %vm900_vm10, %v4876_v30, -inf }
0x1632   :  { %4901 = vmax.xlane.f32.xlu0 %v4900_v37  ;;  %v4897_v38 = vsel %vm900_vm10, %v4871_v35, -inf }
0x1633   :  { %4898 = vmax.xlane.f32.xlu1 %v4897_v38 }
0x1644   :  { %4417 = vrot.lane.b32.xlu1 %v10077_v40, %s9445_s30 }
0x1648   :  { %4423 = vrot.lane.b32.xlu0 %v10077_v40, %s9444_s29  ;;  %4419 = vrot.lane.b32.xlu1 %v10082_v56, %s9445_s30 }
0x164c   :  { %4429 = vrot.lane.b32.xlu1 %v10077_v40, %s9446_s10 }
0x1650   :  { %4425 = vrot.lane.b32.xlu1 %v10082_v56, %s9444_s29 }
0x166a   :  { %v4884_v57 = vpop.xlane.xlu0 %4883 }
0x166b   :  { %v4904_v41 = vsub.f32 %v4639_v14, %v4884_v57  ;;  %v4881_v42 = vpop.xlane.xlu1 %4880 }
0x166c   :  { %v4903_v52 = vsub.f32 %v4634_v16, %v4881_v42 }
0x166d   :  { %v4913_v55 = vmul.f32 1.442695, %v4904_v41 }
0x166e   :  { %v4911_v43 = vmul.f32 1.442695, %v4903_v52 }
0x166f   :  { %9339 = vpow2.f32 %v4913_v55 }
0x1670   :  { %9341 = vpow2.f32 %v4911_v43 }
0x1679   :  { %v10092_v54 = vpop.eup %9339 }
0x167a   :  { %v4930_v44 = vsel %vm900_vm10, %v10092_v54, 0.0  ;;  %v10096_v45 = vpop.eup %9341 }
0x167b   :  { %4931 = vadd.xlane.f32.xlu0 %v4930_v44  ;;  %v4927_v46 = vsel %vm900_vm10, %v10096_v45, 0.0 }
0x167f   :  { %4928 = vadd.xlane.f32.xlu0 %v4927_v46 }
0x16b3   :  { %v4890_v47 = vpop.xlane.xlu1 %4889 }
0x16b4   :  { %v4906_v48 = vsub.f32 %v4718_v3, %v4890_v47 }
0x16b6   :  { %v4917_v49 = vmul.f32 1.442695, %v4906_v48 }
0x16b7   :  { %v4896_v62 = vpop.xlane.xlu0 %4895  ;;  %v4887_v60 = vpop.xlane.xlu1 %4886 }
0x16b8   :  { %9343 = vpow2.f32 %v4917_v49  ;;  %v4908_v50 = vsub.f32 %v4797_v23, %v4896_v62  ;;  %v4905_v53 = vsub.f32 %v4713_v18, %v4887_v60 }
0x16ba   :  { %v4921_v58 = vmul.f32 1.442695, %v4908_v50  ;;  %v4915_v59 = vmul.f32 1.442695, %v4905_v53 }
0x16bb   :  { %v4893_v61 = vpop.xlane.xlu1 %4892 }
0x16bc   :  { %9345 = vpow2.f32 %v4921_v58  ;;  %v4907_v63 = vsub.f32 %v4792_v25, %v4893_v61 }
0x16bd   :  { %9347 = vpow2.f32 %v4915_v59 }
0x16be   :  { %v4919_v0 = vmul.f32 1.442695, %v4907_v63 }
0x16bf   :  { %v4902_v1 = vpop.xlane.xlu0 %4901 }
0x16c0   :  { %9349 = vpow2.f32 %v4919_v0  ;;  %v4910_v4 = vsub.f32 %v4876_v30, %v4902_v1  ;;  %v4899_v6 = vpop.xlane.xlu1 %4898 }
0x16c1   :  { %v4909_v8 = vsub.f32 %v4871_v35, %v4899_v6 }
0x16c2   :  { %v9344_v9 = vpop.eup %9343  ;;  %v4925_v10 = vmul.f32 1.442695, %v4910_v4 }
0x16c3   :  { %v4923_v11 = vmul.f32 1.442695, %v4909_v8  ;;  %v4936_v14 = vsel %vm900_vm10, %v9344_v9, 0.0  ;;  %v4424_v25 = vpop.permute.xlu0 %4423 }
0x16c4   :  { %9351 = vpow2.f32 %v4925_v10  ;;  %4937 = vadd.xlane.f32.xlu0 %v4936_v14  ;;  %v4418_v23 = vpop.permute.xlu1 %4417 }
0x16c5   :  { %9353 = vpow2.f32 %v4923_v11 }
0x16c6   :  { %v10101_v15 = vpop.eup %9345 }
0x16c7   :  { %v4942_v16 = vsel %vm900_vm10, %v10101_v15, 0.0  ;;  %v9348_v17 = vpop.eup %9347 }
0x16c8   :  { %4943 = vadd.xlane.f32.xlu0 %v4942_v16  ;;  %v4933_v2 = vsel %vm900_vm10, %v9348_v17, 0.0  ;;  %v4420_v24 = vpop.permute.xlu1 %4419 }
0x16ca   :  { %v10105_v5 = vpop.eup %9349 }
0x16cb   :  { %v4939_v3 = vsel %vm900_vm10, %v10105_v5, 0.0 }
0x16cc   :  { %4934 = vadd.xlane.f32.xlu0 %v4933_v2  ;;  %4940 = vadd.xlane.f32.xlu1 %v4939_v3  ;;  %v4430_v26 = vpop.permute.xlu1 %4429 }
0x16ce   :  { %v9352_v13 = vpop.eup %9351 }
0x16cf   :  { %v4948_v18 = vsel %vm900_vm10, %v9352_v13, 0.0  ;;  %v9354_v19 = vpop.eup %9353 }
0x16d0   :  { %4949 = vadd.xlane.f32.xlu1 %v4948_v18  ;;  %v4945_v22 = vsel %vm900_vm10, %v9354_v19, 0.0  ;;  %v4426_v28 = vpop.permute.xlu1 %4425 }
0x16d4   :  { %4946 = vadd.xlane.f32.xlu1 %v4945_v22 }
0x16e2   :  { %4431 = vrot.lane.b32.xlu0 %v10082_v56, %s9446_s10 }
0x1700   :  { %4999 = vxpose.xlu0.b32.start [1/2] (short) (narrow) %v4418_v23, 8 }
0x1704   :  { %5000 = vxpose.xlu0.b32.end [2/2] (short) (narrow) %v4420_v24, 8 }
0x1707   :  { %4967 = vxpose.xlu1.b32.start [1/2] (short) (narrow) %v10077_v40, 8 }
0x1708   :  { %v4932_v27 = vpop.xlane.xlu0 %4931  ;;  %5031 = vxpose.xlu0.b32.start [1/2] (short) (narrow) %v4424_v25, 8 }
0x1709   :  { %9355 = vrcp.f32 %v4932_v27 }
0x170b   :  { %4968 = vxpose.xlu1.b32.end [2/2] (short) (narrow) %v10082_v56, 8 }
0x170c   :  { %v4929_v29 = vpop.xlane.xlu0 %4928  ;;  %5032 = vxpose.xlu0.b32.end [2/2] (short) (narrow) %v4426_v28, 8 }
0x170d   :  { %9357 = vrcp.f32 %v4929_v29 }
0x170f   :  { %5063 = vxpose.xlu1.b32.start [1/2] (short) (narrow) %v4430_v26, 8 }
0x1713   :  { %v9356_v30 = vpop.eup %9355 }
0x1714   :  { %v4960_v35 = vmul.f32 %v9356_v30, %v10092_v54 }
0x1717   :  { %v9358_v31 = vpop.eup %9357 }
0x1718   :  { %v4959_v37 = vmul.f32 %v9358_v31, %v10096_v45 }
0x171a   :  { %v9146_v38 = vpack.c.bf16 %v4960_v35, %v4959_v37 }
0x171c   :  { %9148 = vmatpush3.bf16.xpose.msk.msra.mxu0 %vm9661_vm12, %v9146_v38 }
0x171d   :  { %9153 = vmatprep.subr.bf16.mxu0 %v9448_v33 }
0x1751   :  { %v4938_v39 = vpop.xlane.xlu0 %4937 }
0x1752   :  { %9359 = vrcp.f32 %v4938_v39 }
0x1755   :  { %v4944_v40 = vpop.xlane.xlu0 %4943 }
0x1759   :  { %v4935_v56 = vpop.xlane.xlu0 %4934  ;;  %v4941_v41 = vpop.xlane.xlu1 %4940 }
0x175a   :  { %9361 = vrcp.f32 %v4935_v56 }
0x175c   :  { %v9360_v42 = vpop.eup %9359 }
0x175d   :  { %v4432_v57 = vpop.permute.xlu0 %4431  ;;  %v4962_v55 = vmul.f32 %v9360_v42, %v9344_v9  ;;  %v4950_v54 = vpop.xlane.xlu1 %4949 }
0x175e   :  { %5064 = vxpose.xlu1.b32.end [2/2] (short) (narrow) %v4432_v57, 8 }
0x1761   :  { %v4947_v45 = vpop.xlane.xlu1 %4946 }
0x1762   :  { %9363 = vrcp.f32 %v4947_v45 }
0x1763   :  { %9365 = vrcp.f32 %v4950_v54 }
0x1764   :  { %v9362_v52 = vpop.eup %9361  ;;  %9367 = vrcp.f32 %v4941_v41 }
0x1765   :  { %v4961_v43 = vmul.f32 %v9362_v52, %v9348_v17  ;;  %9369 = vrcp.f32 %v4944_v40 }
0x1767   :  { %v9150_v44 = vpack.c.bf16 %v4962_v55, %v4961_v43 }
0x1769   :  { %9152 = vmatpush3.bf16.xpose.msk.msra.mxu1 %vm9661_vm12, %v9150_v44 }
0x176a   :  { %9157 = vmatprep.subr.bf16.mxu1 %v9448_v33 }
0x176c   :  { %v9364_v46 = vpop.eup %9363 }
0x176d   :  { %v9366_v47 = vpop.eup %9365  ;;  %v4965_v48 = vmul.f32 %v9364_v46, %v9354_v19 }
0x176e   :  { %v4966_v49 = vmul.f32 %v9366_v47, %v9352_v13  ;;  %v9368_v62 = vpop.eup %9367 }
0x176f   :  { %v9370_v53 = vpop.eup %9369  ;;  %v4963_v58 = vmul.f32 %v9368_v62, %v10105_v5 }
0x1770   :  { %v9158_v50 = vpack.c.bf16 %v4966_v49, %v4965_v48  ;;  %v4964_v59 = vmul.f32 %v9370_v53, %v10101_v15 }
0x1772   :  { %v9154_v63 = vpack.c.bf16 %v4964_v59, %v4963_v58 }
0x1780   :  { %v5015_v60 = vpop.trf.xlu0 }
0x1781   :  { %8841 = vmatmul.mubr.msk.f32.vlgmr.msra.gmra.mrb[38].mxu1 %vm900_vm10, %v5015_v60 }
0x1782   :  { %9160 = vmatpush3.bf16.xpose.msk.msra.mxu1 %vm9661_vm12, %v9158_v50  ;;  %8854 = vmatprep.mubr.msk.f32.mxu1 %vm9449_vm11, %v9450_v7 }
0x1787   :  { %v4983_v61 = vpop.trf.xlu1 }
0x1788   :  { %8834 = vmatmul.mubr.msk.f32.vlgmr.msra.gmra.mrb[28].mxu0 %vm900_vm10, %v4983_v61  ;;  %v5047_v0 = vpop.trf.xlu0 }
0x1789   :  { %9156 = vmatpush3.bf16.xpose.msk.msra.mxu0 %vm9661_vm12, %v9154_v63  ;;  %8847 = vmatprep.mubr.msk.f32.mxu0 %vm9449_vm11, %v9450_v7 }
0x1790   :  { %8848 = vmatmul.mubr.msk.f32.vlgmr.msra.gmra.mrb[30].mxu0 %vm900_vm10, %v5047_v0 }
0x17da   :  { %v5079_v1 = vpop.trf.xlu1 }
0x17db   :  { %8855 = vmatmul.mubr.msk.f32.vlgmr.msra.gmra.mrb[40].mxu1 %vm900_vm10, %v5079_v1 }
0x1854   :  { %v5249_v4 = vpop.f32.mrb[38].mxu1 }
0x1855   :  { %v8842_v6 = vpop.f32.mrb[39].mxu1  ;;  %5443 = vxpose.xlu1.b32.start.end [1/1] (short) (narrow) %v5249_v4, 16 }
0x185b   :  { %v5170_v8 = vpop.f32.mrb[28].mxu0 }
0x185c   :  { %5411 = vxpose.xlu0.b32.start.end [1/1] (short) (narrow) %v5170_v8, 16  ;;  %v8835_v9 = vpop.f32.mrb[29].mxu0 }
0x1863   :  { %v5328_v10 = vpop.f32.mrb[30].mxu0 }
0x1864   :  { %5475 = vxpose.xlu0.b32.start.end [1/1] (short) (narrow) %v5328_v10, 16  ;;  %v8849_v11 = vpop.f32.mrb[31].mxu0 }
0x18ae   :  { %v5407_v14 = vpop.f32.mrb[40].mxu1 }
0x18af   :  { %5507 = vxpose.xlu1.b32.start.end [1/1] (short) (narrow) %v5407_v14, 16  ;;  %v8856_v15 = vpop.f32.mrb[41].mxu1 }
0x18d5   :  { %v5459_v17 = vpop.trf.xlu1 }
0x18d9   :  { %v5460_v2 = vpop.trf.xlu1 }
0x18dc   :  { %v5427_v16 = vpop.trf.xlu0 }
0x18e0   :  { %v5428_v5 = vpop.trf.xlu0 }
0x18e4   :  { %v5491_v3 = vpop.trf.xlu0 }
0x18e5   :  { %v5539_v13 = vcombine.low %v5427_v16, %v5491_v3  ;;  %v5540_v18 = vcombine.high %v5427_v16, %v5491_v3 }
0x18e7   :  { %v5547_v25 = vrot.slane %v5539_v13, %v9687_v12  ;;  %v5554_v26 = vrot.slane %v5540_v18, %v9687_v12  ;;  %v4078_v13 = vld [vmem:[#allocation2 + $0x160] sm:$0xff] }
0x18e8   :  { %v5492_v22 = vpop.trf.xlu0 }
0x18e9   :  { %v5607_v29 = vcombine.low %v5428_v5, %v5492_v22  ;;  %v5608_v30 = vcombine.high %v5428_v5, %v5492_v22 }
0x18eb   :  { %v5615_v55 = vrot.slane %v5607_v29, %v9687_v12  ;;  %v5622_v43 = vrot.slane %v5608_v30, %v9687_v12 }
0x192f   :  { %v5523_v19 = vpop.trf.xlu1 }
0x1930   :  { %v5555_v23 = vcombine.low %v5459_v17, %v5523_v19  ;;  %v5556_v24 = vcombine.high %v5459_v17, %v5523_v19 }
0x1932   :  { %v5563_v27 = vrot.slane %v5555_v23, %v9687_v12  ;;  %v5570_v28 = vrot.slane %v5556_v24, %v9687_v12  ;;  %v4079_v24 = vld [vmem:[#allocation2 + $0x168] sm:$0xff] }
0x1933   :  { %v5524_v31 = vpop.trf.xlu1 }
0x1934   :  { %v5571_v35 = vcombine.low %v5547_v25, %v5563_v27  ;;  %v5572_v37 = vcombine.high %v5547_v25, %v5563_v27  ;;  %v5587_v38 = vcombine.low %v5554_v26, %v5570_v28  ;;  %v5588_v39 = vcombine.high %v5554_v26, %v5570_v28  ;;  %v4080_v25 = vld [vmem:[#allocation2 + $0x170] sm:$0xff]  ;;  %v4081_v26 = vld [vmem:[#allocation2 + $0x178] sm:$0xff] }
0x1935   :  { %v5623_v40 = vcombine.low %v5460_v2, %v5524_v31  ;;  %v5624_v56 = vcombine.high %v5460_v2, %v5524_v31 }
0x1936   :  { %v5579_v57 = vrot.slane %v5571_v35, %v9690_v21  ;;  %v5586_v41 = vrot.slane %v5572_v37, %v9690_v21  ;;  %v5595_v42 = vrot.slane %v5587_v38, %v9690_v21  ;;  %v5602_v52 = vrot.slane %v5588_v39, %v9690_v21 }
0x1937   :  { %v5631_v54 = vrot.slane %v5623_v40, %v9687_v12  ;;  %v5638_v44 = vrot.slane %v5624_v56, %v9687_v12  ;;  %v9161_v38 = vpack.c.bf16 %v4079_v24, %v4078_v13  ;;  %v9165_v39 = vpack.c.bf16 %v4081_v26, %v4080_v25 }
0x1938   :  { %v5675_v45 = vcombine.low %v5579_v57, %v5586_v41  ;;  %v8274_v46 = vcombine.high %v5579_v57, %v5586_v41  ;;  %v5691_v47 = vcombine.low %v5595_v42, %v5602_v52  ;;  %v8275_v48 = vcombine.high %v5595_v42, %v5602_v52 }
0x1939   :  { %v5639_v49 = vcombine.low %v5615_v55, %v5631_v54  ;;  %v5640_v62 = vcombine.high %v5615_v55, %v5631_v54  ;;  %v5655_v60 = vcombine.low %v5622_v43, %v5638_v44  ;;  %v5656_v50 = vcombine.high %v5622_v43, %v5638_v44  ;;  %9162 = vmatprep.subr.bf16.mxu0 %v9161_v38 }
0x193a   :  { %v5682_v53 = vrot.slane %v5675_v45, %v9687_v12  ;;  %v5690_v58 = vrot.slane %v8274_v46, %v9687_v12  ;;  %v5698_v59 = vrot.slane %v5691_v47, %v9687_v12  ;;  %v5706_v61 = vrot.slane %v8275_v48, %v9687_v12  ;;  %9164 = vmatpush3.bf16.msra.mxu0 %v9161_v38 }
0x193b   :  { %v5647_v63 = vrot.slane %v5639_v49, %v9690_v21  ;;  %v5654_v0 = vrot.slane %v5640_v62, %v9690_v21  ;;  %v5663_v1 = vrot.slane %v5655_v60, %v9690_v21  ;;  %v5670_v4 = vrot.slane %v5656_v50, %v9690_v21  ;;  %9166 = vmatprep.subr.bf16.mxu0 %v9165_v39 }
0x193c   :  { %v5708_v6 = vcombine.high %v5682_v53, %v5690_v58  ;;  %v5724_v8 = vcombine.high %v5698_v59, %v5706_v61  ;;  %v5707_v9 = vcombine.low %v5682_v53, %v5690_v58  ;;  %v5723_v10 = vcombine.low %v5698_v59, %v5706_v61  ;;  %v10187_v61 = vld [vmem:[%s10469_s1] sm:$0xff] }
0x193d   :  { %v5743_v11 = vcombine.low %v5647_v63, %v5654_v0  ;;  %v8276_v14 = vcombine.high %v5647_v63, %v5654_v0  ;;  %v5759_v15 = vcombine.low %v5663_v1, %v5670_v4  ;;  %v8277_v16 = vcombine.high %v5663_v1, %v5670_v4  ;;  %v8278_v63 = vld [vmem:[%s10474_s6 + $0x12] ss:$0 sm:$0xff] }
0x193e   :  { %v5722_v17 = vrot.slane %v5708_v6, %v9690_v21  ;;  %v5738_v5 = vrot.slane %v5724_v8, %v9690_v21  ;;  %v5715_v2 = vrot.slane %v5707_v9, %v9690_v21  ;;  %v5731_v3 = vrot.slane %v5723_v10, %v9690_v21  ;;  %9168 = vmatpush3.bf16.msra.mxu0 %v9165_v39 }
0x193f   :  { %v5750_v18 = vrot.slane %v5743_v11, %v9687_v12  ;;  %v5758_v19 = vrot.slane %v8276_v14, %v9687_v12  ;;  %v5766_v22 = vrot.slane %v5759_v15, %v9687_v12  ;;  %v5774_v23 = vrot.slane %v8277_v16, %v9687_v12  ;;  %v4086_v14 = vld [vmem:[#allocation2 + $0x1a0] sm:$0xff]  ;;  %v4087_v15 = vld [vmem:[#allocation2 + $0x1a8] sm:$0xff] }
0x1940   :  { %v5741_v27 = vcombine.low %v5722_v17, %v5738_v5  ;;  %v5740_v28 = vcombine.high %v5715_v2, %v5731_v3  ;;  %v5739_v29 = vcombine.low %v5715_v2, %v5731_v3  ;;  %v5742_v57 = vcombine.high %v5722_v17, %v5738_v5  ;;  %v4088_v17 = vld [vmem:[#allocation2 + $0x1b0] sm:$0xff]  ;;  %v4089_v5 = vld [vmem:[#allocation2 + $0x1b8] sm:$0xff] }
0x1941   :  { %v5775_v30 = vcombine.low %v5750_v18, %v5758_v19  ;;  %v5791_v31 = vcombine.low %v5766_v22, %v5774_v23  ;;  %v5776_v35 = vcombine.high %v5750_v18, %v5758_v19  ;;  %v5792_v37 = vcombine.high %v5766_v22, %v5774_v23 }
0x1942   :  { %5821 = vrot.lane.b32.xlu1 %v5741_v27, %s9453_s13  ;;  %5813 = vrot.lane.b32.xlu0 %v5740_v28, %s9443_s20  ;;  %v9177_v16 = vpack.c.bf16 %v4087_v15, %v4086_v14  ;;  %v9181_v2 = vpack.c.bf16 %v4089_v5, %v4088_v17  ;;  %v4082_v27 = vld [vmem:[#allocation2 + $0x180] sm:$0xff]  ;;  %v4083_v28 = vld [vmem:[#allocation2 + $0x188] sm:$0xff] }
0x1943   :  { %v5783_v40 = vrot.slane %v5775_v30, %v9690_v21  ;;  %v5799_v56 = vrot.slane %v5791_v31, %v9690_v21  ;;  %v5790_v42 = vrot.slane %v5776_v35, %v9690_v21  ;;  %v5806_v52 = vrot.slane %v5792_v37, %v9690_v21  ;;  %v4084_v30 = vld [vmem:[#allocation2 + $0x190] sm:$0xff]  ;;  %v4085_v31 = vld [vmem:[#allocation2 + $0x198] sm:$0xff] }
0x1944   :  { %9178 = vmatprep.subr.bf16.mxu0 %v9177_v16  ;;  %v9173_v35 = vpack.c.bf16 %v4085_v31, %v4084_v30  ;;  %v8286_v37 = vld [vmem:[%s10474_s6 + $0x14] ss:$0 sm:$0xff] }
0x1945   :  { %v5808_v41 = vcombine.high %v5783_v40, %v5799_v56  ;;  %v5807_v55 = vcombine.low %v5783_v40, %v5799_v56  ;;  %v5809_v43 = vcombine.low %v5790_v42, %v5806_v52  ;;  %v5810_v54 = vcombine.high %v5790_v42, %v5806_v52 }
0x1946   :  { %5829 = vrot.lane.b32.xlu0 %v5742_v57, %s9454_s14 }
0x1947   :  { %5815 = vrot.lane.b32.xlu1 %v5808_v41, %s9443_s20 }
0x194b   :  { %5823 = vrot.lane.b32.xlu1 %v5809_v43, %s9453_s13 }
0x194f   :  { %5831 = vrot.lane.b32.xlu1 %v5810_v54, %s9454_s14 }
0x19b4   :  { %v5814_v44 = vpop.permute.xlu0 %5813  ;;  %v5822_v45 = vpop.permute.xlu1 %5821 }
0x19b5   :  { %v5835_v46 = vsel %vm583_vm1, %v5739_v29, %v5814_v44  ;;  %v9169_v29 = vpack.c.bf16 %v4083_v28, %v4082_v27  ;;  %v8281_v44 = vld [vmem:[%s10474_s6 + $0x18] ss:$0 sm:$0xff] }
0x19b6   :  { %v5837_v47 = vsel %vm900_vm10, %v5835_v46, %v5822_v45  ;;  %v8282_v46 = vld [vmem:[%s10474_s6 + $0x19] ss:$0 sm:$0xff] }
0x19b7   :  { %9170 = vmatprep.subr.bf16.mxu1 %v9169_v29 }
0x19b8   :  { %v5830_v48 = vpop.permute.xlu0 %5829  ;;  %9172 = vmatpush3.bf16.msra.mxu1 %v9169_v29 }
0x19b9   :  { %v5839_v49 = vsel %vm1861_vm13, %v5837_v47, %v5830_v48  ;;  %v5816_v62 = vpop.permute.xlu1 %5815  ;;  %9174 = vmatprep.subr.bf16.mxu1 %v9173_v35 }
0x19ba   :  { %8865 = vmatprep.mubr.msk.f32.mxu0 %vm155_vm0, %v5839_v49  ;;  %v5836_v50 = vsel %vm583_vm1, %v5807_v55, %v5816_v62 }
0x19bc   :  { %9176 = vmatpush3.bf16.msra.mxu1 %v9173_v35 }
0x19bd   :  { %v5824_v60 = vpop.permute.xlu1 %5823 }
0x19be   :  { %v5838_v53 = vsel %vm900_vm10, %v5836_v50, %v5824_v60 }
0x19c1   :  { %v5832_v58 = vpop.permute.xlu1 %5831 }
0x19c2   :  { %v5840_v59 = vsel %vm1861_vm13, %v5838_v53, %v5832_v58 }
0x19c3   :  { %8866 = vmatmul.mubr.msk.f32.vlgmr.msra.gmra.mrb[32].mxu0 %vm155_vm0, %v5840_v59 }
0x19c4   :  { %8887 = vmatprep.mubr.msk.f32.mxu0 %vm155_vm0, %v10187_v61  ;;  %9180 = vmatpush3.bf16.msra.mxu0 %v9177_v16 }
0x19c5   :  { %9182 = vmatprep.subr.bf16.mxu0 %v9181_v2 }
0x19c8   :  { %9184 = vmatpush3.bf16.msra.mxu0 %v9181_v2 }
0x1a96   :  { %v8867_v0 = vpop.f32.mrb[32].mxu0 }
0x1a97   :  { %v5925_v1 = vadd.f32 %v8867_v0, %v8278_v63  ;;  %v5919_v4 = vpop.f32.mrb[33].mxu0  ;;  %v4091_v0 = vld [vmem:[#allocation2 + $0x1c8] sm:$0xff] }
0x1a98   :  { %v5920_v6 = vadd.f32 %v8278_v63, %v5919_v4  ;;  %v4090_v63 = vld [vmem:[#allocation2 + $0x1c0] sm:$0xff] }
0x1a99   :  { %v5929_v8 = vadd.f32 %v5925_v1, %v10007_v36  ;;  %v4092_v1 = vld [vmem:[#allocation2 + $0x1d0] sm:$0xff]  ;;  %v9185_v4 = vpack.c.bf16 %v4091_v0, %v4090_v63 }
0x1a9a   :  { %v5928_v9 = vadd.f32 %v5920_v6, %v10005_v51  ;;  %v10201_v51 = vld [vmem:[%s10469_s1 + $0x8] sm:$0xff]  ;;  %v4093_v6 = vld [vmem:[#allocation2 + $0x1d8] sm:$0xff] }
0x1a9b   :  { %v5933_v10 = vsel %vm155_vm0, %v5929_v8, 0.0  ;;  %8888 = vmatmul.mubr.msk.f32.vlgmr.msra.gmra.mrb[34].mxu0 %vm155_vm0, %v10201_v51  ;;  %9186 = vmatprep.subr.bf16.mxu1 %v9185_v4 }
0x1a9c   :  { %5934 = vadd.xlane.f32.xlu1 %v5933_v10  ;;  %v5930_v11 = vsel %vm155_vm0, %v5928_v9, 0.0 }
0x1a9d   :  { %5931 = vadd.xlane.f32.xlu0 %v5930_v11 }
0x1b29   :  { %v5935_v36 = vpop.xlane.xlu1 %5934 }
0x1b2a   :  { %v5937_v3 = vmul.f32 0.03125, %v5935_v36  ;;  %v5932_v13 = vpop.xlane.xlu0 %5931 }
0x1b2b   :  { %v5936_v18 = vmul.f32 0.03125, %v5932_v13 }
0x1b2c   :  { %v5939_v19 = vsub.f32 %v5929_v8, %v5937_v3  ;;  %v9189_v8 = vpack.c.bf16 %v4093_v6, %v4092_v1 }
0x1b2d   :  { %v5938_v22 = vsub.f32 %v5928_v9, %v5936_v18 }
0x1b2e   :  { %v5941_v25 = vmul.f32 %v5939_v19, %v5939_v19 }
0x1b2f   :  { %v5940_v23 = vmul.f32 %v5938_v22, %v5938_v22 }
0x1b30   :  { %v5945_v26 = vsel %vm155_vm0, %v5941_v25, 0.0 }
0x1b31   :  { %v5942_v24 = vsel %vm155_vm0, %v5940_v23, 0.0 }
0x1b32   :  { %5943 = vadd.xlane.f32.xlu0 %v5942_v24 }
0x1b36   :  { %5946 = vadd.xlane.f32.xlu0 %v5945_v26 }
0x1b6e   :  { %v8889_v38 = vpop.f32.mrb[34].mxu0 }
0x1b6f   :  { %v6139_v39 = vadd.f32 %v8889_v38, %v8286_v37  ;;  %v6133_v40 = vpop.f32.mrb[35].mxu0 }
0x1b70   :  { %v6134_v56 = vadd.f32 %v8286_v37, %v6133_v40 }
0x1b71   :  { %6241 = vrot.lane.b32.xlu0 %v6139_v39, %s9445_s30 }
0x1b72   :  { %6239 = vrot.lane.b32.xlu1 %v6134_v56, %s9445_s30 }
0x1b75   :  { %6247 = vrot.lane.b32.xlu0 %v6139_v39, %s9444_s29 }
0x1b76   :  { %6245 = vrot.lane.b32.xlu1 %v6134_v56, %s9444_s29 }
0x1b7a   :  { %6251 = vrot.lane.b32.xlu1 %v6134_v56, %s9446_s10 }
0x1b7e   :  { %6253 = vrot.lane.b32.xlu1 %v6139_v39, %s9446_s10 }
0x1b93   :  { %6277 = vxpose.xlu0.b32.start [1/2] (short) (narrow) %v6134_v56, 8 }
0x1b97   :  { %6278 = vxpose.xlu0.b32.end [2/2] (short) (narrow) %v6139_v39, 8 }
0x1bbf   :  { %v5944_v57 = vpop.xlane.xlu0 %5943 }
0x1bc0   :  { %v5948_v41 = vmul.f32 0.03125, %v5944_v57 }
0x1bc2   :  { %v5950_v42 = vadd.f32 1e-05, %v5948_v41 }
0x1bc3   :  { %v5947_v52 = vpop.xlane.xlu0 %5946 }
0x1bc4   :  { %9371 = vrsqrt.f32 %v5950_v42  ;;  %v5949_v55 = vmul.f32 0.03125, %v5947_v52 }
0x1bc6   :  { %v5951_v43 = vadd.f32 1e-05, %v5949_v55 }
0x1bc8   :  { %9373 = vrsqrt.f32 %v5951_v43 }
0x1bce   :  { %v9372_v54 = vpop.eup %9371 }
0x1bcf   :  { %v5954_v45 = vmul.f32 %v9372_v54, %v5938_v22 }
0x1bd1   :  { %v5962_v47 = vmul.f32 %v8281_v44, %v5954_v45 }
0x1bd2   :  { %v9374_v48 = vpop.eup %9373 }
0x1bd3   :  { %v5955_v49 = vmul.f32 %v9374_v48, %v5939_v19  ;;  %v10222_v62 = vadd.f32 %v8282_v46, %v5962_v47 }
0x1bd5   :  { %v5963_v60 = vmul.f32 %v8281_v44, %v5955_v49  ;;  %8876 = vmatprep.mubr.msk.f32.mxu1 %vm155_vm0, %v10222_v62 }
0x1bd7   :  { %v10226_v50 = vadd.f32 %v8282_v46, %v5963_v60 }
0x1bd9   :  { %8877 = vmatmul.mubr.msk.f32.vlgmr.msra.gmra.mrb[42].mxu1 %vm155_vm0, %v10226_v50 }
0x1bda   :  { %8898 = vmatprep.mubr.msk.f32.mxu1 %vm155_vm0, %v10187_v61  ;;  %9188 = vmatpush3.bf16.msra.mxu1 %v9185_v4  ;;  %v8283_v61 = vld [vmem:[%s10474_s6 + $0x13] ss:$0 sm:$0xff] }
0x1bdb   :  { %9190 = vmatprep.subr.bf16.mxu1 %v9189_v8 }
0x1bde   :  { %9192 = vmatpush3.bf16.msra.mxu1 %v9189_v8 }
0x1be1   :  { %8899 = vmatmul.mubr.msk.f32.vlgmr.msra.gmra.mrb[44].mxu1 %vm155_vm0, %v10201_v51 }
0x1be3   :  { %v6242_v53 = vpop.permute.xlu0 %6241 }
0x1be4   :  { %v6240_v17 = vpop.permute.xlu1 %6239 }
0x1be7   :  { %v6248_v58 = vpop.permute.xlu0 %6247 }
0x1be8   :  { %v6246_v5 = vpop.permute.xlu1 %6245 }
0x1bec   :  { %v6252_v2 = vpop.permute.xlu1 %6251 }
0x1bf0   :  { %v6254_v51 = vpop.permute.xlu1 %6253 }
0x1c13   :  { %v6293_v59 = vpop.trf.xlu0 }
0x1c14   :  { %8901 = vmatprep.subr.mxu0 %v6293_v59 }
0x1c15   :  { %8902 = vmatpush3.msra.mxu0 %v6293_v59 }
0x1cac   :  { %v8878_v9 = vpop.f32.mrb[42].mxu1 }
0x1cad   :  { %v6056_v10 = vadd.f32 %v8878_v9, %v8283_v61  ;;  %v6050_v11 = vpop.f32.mrb[43].mxu1 }
0x1cae   :  { %v6051_v14 = vadd.f32 %v8283_v61, %v6050_v11 }
0x1caf   :  { %v6060_v15 = vmul.f32 0.35355338, %v6056_v10 }
0x1cb0   :  { %v6059_v16 = vmul.f32 0.35355338, %v6051_v14 }
0x1cb1   :  { %6231 = vrot.lane.b32.xlu0 %v6060_v15, %s9444_s29  ;;  %6227 = vrot.lane.b32.xlu1 %v6060_v15, %s9445_s30 }
0x1cb2   :  { %8903 = vmatprep.mubr.msk.f32.mxu0 %vm583_vm1, %v6059_v16 }
0x1cb3   :  { %8904 = vmatmul.mubr.msk.f32.vlgmr.msra.gmra.mrb[36].mxu0 %vm583_vm1, %v6060_v15 }
0x1cb4   :  { %v8900_v35 = vpop.f32.mrb[44].mxu1 }
0x1cb5   :  { %6235 = vrot.lane.b32.xlu1 %v6060_v15, %s9446_s10  ;;  %6225 = vrot.lane.b32.xlu0 %v6059_v16, %s9445_s30  ;;  %v6214_v37 = vpop.f32.mrb[45].mxu1 }
0x1cb9   :  { %6233 = vrot.lane.b32.xlu1 %v6059_v16, %s9446_s10  ;;  %6229 = vrot.lane.b32.xlu0 %v6059_v16, %s9444_s29 }
0x1cd7   :  { %6341 = vxpose.xlu0.b32.start [1/2] (short) (narrow) %v6246_v5, 8 }
0x1cdb   :  { %6342 = vxpose.xlu0.b32.end [2/2] (short) (narrow) %v6248_v58, 8 }
0x1cdf   :  { %6373 = vxpose.xlu0.b32.start [1/2] (short) (narrow) %v6252_v2, 8 }
0x1ce2   :  { %6309 = vxpose.xlu1.b32.start [1/2] (short) (narrow) %v6240_v17, 8 }
0x1ce3   :  { %6374 = vxpose.xlu0.b32.end [2/2] (short) (narrow) %v6254_v51, 8 }
0x1ce6   :  { %6310 = vxpose.xlu1.b32.end [2/2] (short) (narrow) %v6242_v53, 8 }
0x1d23   :  { %v6232_v36 = vpop.permute.xlu0 %6231  ;;  %v6228_v18 = vpop.permute.xlu1 %6227 }
0x1d27   :  { %v6226_v3 = vpop.permute.xlu0 %6225  ;;  %v6236_v22 = vpop.permute.xlu1 %6235 }
0x1d28   :  { %8908 = vmatprep.mubr.msk.f32.mxu1 %vm583_vm1, %v6226_v3 }
0x1d2b   :  { %v6230_v13 = vpop.permute.xlu0 %6229  ;;  %v6234_v23 = vpop.permute.xlu1 %6233 }
0x1d2c   :  { %8913 = vmatprep.mubr.msk.f32.mxu0 %vm583_vm1, %v6230_v13 }
0x1d57   :  { %v6357_v19 = vpop.trf.xlu0 }
0x1d58   :  { %8911 = vmatprep.subr.mxu0 %v6357_v19 }
0x1d59   :  { %8912 = vmatpush3.msra.mxu0 %v6357_v19 }
0x1d5a   :  { %8914 = vmatmul.mubr.msk.f32.vlgmr.msra.gmra.mrb[38].mxu0 %vm583_vm1, %v6232_v36  ;;  %9193 = vmatprep.subr.bf16.mxu0 %v9448_v33 }
0x1d5b   :  { %8925 = vmatprep.mubr.msk.f32.mxu0 %vm9449_vm11, %v9450_v7 }
0x1d5f   :  { %v6389_v25 = vpop.trf.xlu0 }
0x1d62   :  { %v6325_v24 = vpop.trf.xlu1 }
0x1d63   :  { %8906 = vmatprep.subr.mxu1 %v6325_v24 }
0x1d64   :  { %8907 = vmatpush3.msra.mxu1 %v6325_v24 }
0x1d65   :  { %8909 = vmatmul.mubr.msk.f32.vlgmr.msra.gmra.mrb[46].mxu1 %vm583_vm1, %v6228_v18  ;;  %8916 = vmatprep.subr.mxu1 %v6389_v25 }
0x1d66   :  { %8918 = vmatprep.mubr.msk.f32.mxu1 %vm583_vm1, %v6234_v23  ;;  %8917 = vmatpush3.msra.mxu1 %v6389_v25 }
0x1d67   :  { %9197 = vmatprep.subr.bf16.mxu1 %v9448_v33 }
0x1d69   :  { %8919 = vmatmul.mubr.msk.f32.vlgmr.msra.gmra.mrb[48].mxu1 %vm583_vm1, %v6236_v22 }
0x1d6a   :  { %8932 = vmatprep.mubr.msk.f32.mxu1 %vm9449_vm11, %v9450_v7 }
0x1d86   :  { %v8905_v26 = vpop.f32.mrb[36].mxu0 }
0x1d87   :  { %v6481_v27 = vadd.f32 %v8905_v26, %v9810_v32  ;;  %v6475_v28 = vpop.f32.mrb[37].mxu0 }
0x1d88   :  { %v6476_v29 = vadd.f32 %v6475_v28, %v9815_v34 }
0x1d89   :  { %v6724_v30 = vsel %vm900_vm10, %v6481_v27, -inf }
0x1d8a   :  { %6725 = vmax.xlane.f32.xlu0 %v6724_v30  ;;  %v6721_v31 = vsel %vm900_vm10, %v6476_v29, -inf }
0x1d8b   :  { %6722 = vmax.xlane.f32.xlu1 %v6721_v31 }
0x1e18   :  { %v6723_v63 = vpop.xlane.xlu1 %6722 }
0x1e19   :  { %v6745_v1 = vsub.f32 %v6476_v29, %v6723_v63 }
0x1e1b   :  { %v6753_v4 = vmul.f32 1.442695, %v6745_v1 }
0x1e2d   :  { %v8915_v38 = vpop.f32.mrb[38].mxu0 }
0x1e2e   :  { %v6639_v39 = vadd.f32 %v8915_v38, %v9810_v32  ;;  %v6633_v40 = vpop.f32.mrb[39].mxu0 }
0x1e2f   :  { %v6634_v45 = vadd.f32 %v6633_v40, %v9815_v34 }
0x1e30   :  { %v6736_v56 = vsel %vm900_vm10, %v6639_v39, -inf }
0x1e31   :  { %6737 = vmax.xlane.f32.xlu0 %v6736_v56  ;;  %v6733_v49 = vsel %vm900_vm10, %v6634_v45, -inf }
0x1e38   :  { %v8910_v57 = vpop.f32.mrb[46].mxu1 }
0x1e39   :  { %v6560_v41 = vadd.f32 %v8910_v57, %v9810_v32  ;;  %v6554_v42 = vpop.f32.mrb[47].mxu1 }
0x1e3a   :  { %v6555_v52 = vadd.f32 %v6554_v42, %v9815_v34 }
0x1e3b   :  { %v6730_v55 = vsel %vm900_vm10, %v6560_v41, -inf }
0x1e3c   :  { %6731 = vmax.xlane.f32.xlu1 %v6730_v55  ;;  %v8920_v43 = vpop.f32.mrb[48].mxu1  ;;  %v6727_v46 = vsel %vm900_vm10, %v6555_v52, -inf }
0x1e3d   :  { %v6718_v54 = vadd.f32 %v8920_v43, %v9810_v32  ;;  %v6712_v44 = vpop.f32.mrb[49].mxu1  ;;  %v8289_v32 = vld [vmem:[%s10474_s6 + $0x15] ss:$0 sm:$0xff] }
0x1e3e   :  { %v6713_v48 = vadd.f32 %v6712_v44, %v9815_v34  ;;  %v10276_v53 = vadd.f32 %v8289_v32, %v6214_v37  ;;  %v10282_v58 = vadd.f32 %v8900_v35, %v8289_v32  ;;  %v6726_v34 = vpop.xlane.xlu0 %6725 }
0x1e3f   :  { %v6742_v47 = vsel %vm900_vm10, %v6718_v54, -inf  ;;  %v6746_v59 = vsub.f32 %v6481_v27, %v6726_v34 }
0x1e40   :  { %6728 = vmax.xlane.f32.xlu1 %v6727_v46  ;;  %6743 = vmax.xlane.f32.xlu0 %v6742_v47  ;;  %v6739_v60 = vsel %vm900_vm10, %v6713_v48, -inf }
0x1e41   :  { %v6755_v0 = vmul.f32 1.442695, %v6746_v59 }
0x1e43   :  { %9375 = vpow2.f32 %v6755_v0 }
0x1e44   :  { %6734 = vmax.xlane.f32.xlu1 %v6733_v49  ;;  %9377 = vpow2.f32 %v6753_v4 }
0x1e48   :  { %6740 = vmax.xlane.f32.xlu1 %v6739_v60 }
0x1e4d   :  { %v9376_v6 = vpop.eup %9375 }
0x1e4e   :  { %v6772_v8 = vsel %vm900_vm10, %v9376_v6, 0.0  ;;  %v9378_v61 = vpop.eup %9377 }
0x1e4f   :  { %v6769_v9 = vsel %vm900_vm10, %v9378_v61, 0.0 }
0x1e56   :  { %6265 = vrot.lane.b32.xlu0 %v10276_v53, %s9444_s29 }
0x1e59   :  { %6259 = vrot.lane.b32.xlu1 %v10276_v53, %s9445_s30 }
0x1e5d   :  { %6261 = vrot.lane.b32.xlu1 %v10282_v58, %s9445_s30 }
0x1e61   :  { %6271 = vrot.lane.b32.xlu1 %v10276_v53, %s9446_s10 }
0x1e65   :  { %6267 = vrot.lane.b32.xlu1 %v10282_v58, %s9444_s29 }
0x1e75   :  { %6773 = vadd.xlane.f32.xlu0 %v6772_v8 }
0x1e79   :  { %6770 = vadd.xlane.f32.xlu0 %v6769_v9 }
0x1ebe   :  { %v6738_v10 = vpop.xlane.xlu0 %6737 }
0x1ebf   :  { %v6750_v11 = vsub.f32 %v6639_v39, %v6738_v10 }
0x1ec1   :  { %v6763_v16 = vmul.f32 1.442695, %v6750_v11 }
0x1ec9   :  { %v6732_v14 = vpop.xlane.xlu1 %6731 }
0x1eca   :  { %v6748_v15 = vsub.f32 %v6560_v41, %v6732_v14 }
0x1ecc   :  { %v6759_v17 = vmul.f32 1.442695, %v6748_v15 }
0x1ecd   :  { %v6729_v5 = vpop.xlane.xlu1 %6728  ;;  %v6744_v2 = vpop.xlane.xlu0 %6743 }
0x1ece   :  { %9379 = vpow2.f32 %v6759_v17  ;;  %v6747_v51 = vsub.f32 %v6555_v52, %v6729_v5  ;;  %v6752_v3 = vsub.f32 %v6718_v54, %v6744_v2 }
0x1ecf   :  { %9381 = vpow2.f32 %v6763_v16 }
0x1ed0   :  { %v6757_v36 = vmul.f32 1.442695, %v6747_v51  ;;  %v6767_v19 = vmul.f32 1.442695, %v6752_v3 }
0x1ed1   :  { %v6735_v13 = vpop.xlane.xlu1 %6734  ;;  %v6266_v57 = vpop.permute.xlu0 %6265 }
0x1ed2   :  { %v6749_v18 = vsub.f32 %v6634_v45, %v6735_v13  ;;  %9383 = vpow2.f32 %v6757_v36 }
0x1ed4   :  { %v6761_v22 = vmul.f32 1.442695, %v6749_v18 }
0x1ed5   :  { %v6741_v23 = vpop.xlane.xlu1 %6740 }
0x1ed6   :  { %9385 = vpow2.f32 %v6761_v22  ;;  %v6751_v24 = vsub.f32 %v6713_v48, %v6741_v23 }
0x1ed7   :  { %9387 = vpow2.f32 %v6767_v19 }
0x1ed8   :  { %v9380_v25 = vpop.eup %9379  ;;  %v6765_v26 = vmul.f32 1.442695, %v6751_v24 }
0x1ed9   :  { %v6778_v27 = vsel %vm900_vm10, %v9380_v25, 0.0  ;;  %v10293_v28 = vpop.eup %9381  ;;  %v6260_v55 = vpop.permute.xlu1 %6259 }
0x1eda   :  { %6779 = vadd.xlane.f32.xlu0 %v6778_v27  ;;  %9389 = vpow2.f32 %v6765_v26  ;;  %v6784_v29 = vsel %vm900_vm10, %v10293_v28, 0.0 }
0x1edc   :  { %v9384_v30 = vpop.eup %9383 }
0x1edd   :  { %v6775_v37 = vsel %vm900_vm10, %v9384_v30, 0.0  ;;  %v6262_v46 = vpop.permute.xlu1 %6261 }
0x1ede   :  { %6785 = vadd.xlane.f32.xlu0 %v6784_v29 }
0x1ee0   :  { %v10297_v31 = vpop.eup %9385 }
0x1ee1   :  { %v6781_v35 = vsel %vm900_vm10, %v10297_v31, 0.0  ;;  %v9388_v38 = vpop.eup %9387  ;;  %v6272_v47 = vpop.permute.xlu1 %6271 }
0x1ee2   :  { %6782 = vadd.xlane.f32.xlu1 %v6781_v35  ;;  %6776 = vadd.xlane.f32.xlu0 %v6775_v37  ;;  %v6790_v39 = vsel %vm900_vm10, %v9388_v38, 0.0 }
0x1ee4   :  { %v9390_v40 = vpop.eup %9389 }
0x1ee5   :  { %v6787_v56 = vsel %vm900_vm10, %v9390_v40, 0.0  ;;  %v6268_v48 = vpop.permute.xlu1 %6267 }
0x1ee6   :  { %6791 = vadd.xlane.f32.xlu1 %v6790_v39 }
0x1eea   :  { %6788 = vadd.xlane.f32.xlu1 %v6787_v56 }
0x1ef8   :  { %6273 = vrot.lane.b32.xlu0 %v10282_v58, %s9446_s10 }
0x1f02   :  { %v6774_v41 = vpop.xlane.xlu0 %6773 }
0x1f03   :  { %9391 = vrcp.f32 %v6774_v41 }
0x1f06   :  { %v6771_v42 = vpop.xlane.xlu0 %6770 }
0x1f07   :  { %9393 = vrcp.f32 %v6771_v42 }
0x1f0d   :  { %v9392_v52 = vpop.eup %9391 }
0x1f0e   :  { %v6802_v54 = vmul.f32 %v9392_v52, %v9376_v6 }
0x1f11   :  { %v9394_v43 = vpop.eup %9393 }
0x1f12   :  { %v6801_v44 = vmul.f32 %v9394_v43, %v9378_v61 }
0x1f14   :  { %v9194_v45 = vpack.c.bf16 %v6802_v54, %v6801_v44 }
0x1f16   :  { %6841 = vxpose.xlu0.b32.start [1/2] (short) (narrow) %v6260_v55, 8  ;;  %9196 = vmatpush3.bf16.xpose.msk.msra.mxu0 %vm9661_vm12, %v9194_v45 }
0x1f17   :  { %9201 = vmatprep.subr.bf16.mxu0 %v9448_v33 }
0x1f1a   :  { %6842 = vxpose.xlu0.b32.end [2/2] (short) (narrow) %v6262_v46, 8 }
0x1f1d   :  { %6809 = vxpose.xlu1.b32.start [1/2] (short) (narrow) %v10276_v53, 8 }
0x1f1e   :  { %6873 = vxpose.xlu0.b32.start [1/2] (short) (narrow) %v6266_v57, 8 }
0x1f21   :  { %6810 = vxpose.xlu1.b32.end [2/2] (short) (narrow) %v10282_v58, 8 }
0x1f22   :  { %6874 = vxpose.xlu0.b32.end [2/2] (short) (narrow) %v6268_v48, 8 }
0x1f25   :  { %6905 = vxpose.xlu1.b32.start [1/2] (short) (narrow) %v6272_v47, 8 }
0x1f67   :  { %v6780_v49 = vpop.xlane.xlu0 %6779 }
0x1f68   :  { %9395 = vrcp.f32 %v6780_v49 }
0x1f6b   :  { %v6786_v60 = vpop.xlane.xlu0 %6785 }
0x1f6f   :  { %v6777_v32 = vpop.xlane.xlu0 %6776  ;;  %v6783_v59 = vpop.xlane.xlu1 %6782 }
0x1f70   :  { %9397 = vrcp.f32 %v6777_v32 }
0x1f72   :  { %v9396_v63 = vpop.eup %9395 }
0x1f73   :  { %v6274_v34 = vpop.permute.xlu0 %6273  ;;  %v6804_v1 = vmul.f32 %v9396_v63, %v9380_v25  ;;  %v6792_v6 = vpop.xlane.xlu1 %6791 }
0x1f74   :  { %6906 = vxpose.xlu1.b32.end [2/2] (short) (narrow) %v6274_v34, 8 }
0x1f77   :  { %v6789_v58 = vpop.xlane.xlu1 %6788 }
0x1f78   :  { %9399 = vrcp.f32 %v6789_v58 }
0x1f79   :  { %9401 = vrcp.f32 %v6792_v6 }
0x1f7a   :  { %v9398_v0 = vpop.eup %9397  ;;  %9403 = vrcp.f32 %v6783_v59 }
0x1f7b   :  { %v6803_v4 = vmul.f32 %v9398_v0, %v9384_v30  ;;  %9405 = vrcp.f32 %v6786_v60 }
0x1f7d   :  { %v9198_v53 = vpack.c.bf16 %v6804_v1, %v6803_v4 }
0x1f7f   :  { %9200 = vmatpush3.bf16.xpose.msk.msra.mxu1 %vm9661_vm12, %v9198_v53 }
0x1f80   :  { %9205 = vmatprep.subr.bf16.mxu1 %v9448_v33 }
0x1f82   :  { %v9400_v8 = vpop.eup %9399 }
0x1f83   :  { %v9402_v61 = vpop.eup %9401  ;;  %v6807_v9 = vmul.f32 %v9400_v8, %v9390_v40 }
0x1f84   :  { %v6808_v10 = vmul.f32 %v9402_v61, %v9388_v38  ;;  %v9404_v11 = vpop.eup %9403 }
0x1f85   :  { %v9406_v16 = vpop.eup %9405  ;;  %v6805_v33 = vmul.f32 %v9404_v11, %v10297_v31 }
0x1f86   :  { %v9206_v15 = vpack.c.bf16 %v6808_v10, %v6807_v9  ;;  %v6806_v17 = vmul.f32 %v9406_v16, %v10293_v28 }
0x1f88   :  { %v9202_v2 = vpack.c.bf16 %v6806_v17, %v6805_v33 }
0x1f96   :  { %v6857_v14 = vpop.trf.xlu0 }
0x1f97   :  { %8933 = vmatmul.mubr.msk.f32.vlgmr.msra.gmra.mrb[50].mxu1 %vm900_vm10, %v6857_v14 }
0x1f98   :  { %9208 = vmatpush3.bf16.xpose.msk.msra.mxu1 %vm9661_vm12, %v9206_v15  ;;  %8946 = vmatprep.mubr.msk.f32.mxu1 %vm9449_vm11, %v9450_v7 }
0x1f9d   :  { %v6825_v5 = vpop.trf.xlu1 }
0x1f9e   :  { %8926 = vmatmul.mubr.msk.f32.vlgmr.msra.gmra.mrb[40].mxu0 %vm900_vm10, %v6825_v5  ;;  %v6889_v51 = vpop.trf.xlu0 }
0x1f9f   :  { %9204 = vmatpush3.bf16.xpose.msk.msra.mxu0 %vm9661_vm12, %v9202_v2  ;;  %8939 = vmatprep.mubr.msk.f32.mxu0 %vm9449_vm11, %v9450_v7 }
0x1fa6   :  { %8940 = vmatmul.mubr.msk.f32.vlgmr.msra.gmra.mrb[42].mxu0 %vm900_vm10, %v6889_v51 }
0x1ff0   :  { %v6921_v36 = vpop.trf.xlu1 }
0x1ff1   :  { %8947 = vmatmul.mubr.msk.f32.vlgmr.msra.gmra.mrb[52].mxu1 %vm900_vm10, %v6921_v36 }
0x206a   :  { %v7091_v3 = vpop.f32.mrb[50].mxu1 }
0x206b   :  { %7285 = vxpose.xlu1.b32.start.end [1/1] (short) (narrow) %v7091_v3, 16  ;;  %v8934_v13 = vpop.f32.mrb[51].mxu1 }
0x2071   :  { %v7012_v18 = vpop.f32.mrb[40].mxu0 }
0x2072   :  { %7253 = vxpose.xlu0.b32.start.end [1/1] (short) (narrow) %v7012_v18, 16  ;;  %v8927_v19 = vpop.f32.mrb[41].mxu0 }
0x2079   :  { %v7170_v22 = vpop.f32.mrb[42].mxu0 }
0x207a   :  { %7317 = vxpose.xlu0.b32.start.end [1/1] (short) (narrow) %v7170_v22, 16  ;;  %v8941_v23 = vpop.f32.mrb[43].mxu0 }
0x20c4   :  { %v7249_v20 = vpop.f32.mrb[52].mxu1 }
0x20c5   :  { %7349 = vxpose.xlu1.b32.start.end [1/1] (short) (narrow) %v7249_v20, 16  ;;  %v8948_v24 = vpop.f32.mrb[53].mxu1 }
0x20eb   :  { %v7301_v7 = vpop.trf.xlu1 }
0x20ef   :  { %v7302_v27 = vpop.trf.xlu1 }
0x20f2   :  { %v7269_v25 = vpop.trf.xlu0 }
0x20f6   :  { %v7270_v26 = vpop.trf.xlu0 }
0x20fa   :  { %v7333_v28 = vpop.trf.xlu0 }
0x20fb   :  { %v7381_v29 = vcombine.low %v7269_v25, %v7333_v28  ;;  %v7382_v30 = vcombine.high %v7269_v25, %v7333_v28  ;;  %v4094_v25 = vld [vmem:[#allocation2 + $0x1e0] sm:$0xff] }
0x20fd   :  { %v7389_v39 = vrot.slane %v7381_v29, %v9687_v12  ;;  %v7396_v40 = vrot.slane %v7382_v30, %v9687_v12  ;;  %v4095_v29 = vld [vmem:[#allocation2 + $0x1e8] sm:$0xff]  ;;  %v4096_v30 = vld [vmem:[#allocation2 + $0x1f0] sm:$0xff] }
0x20fe   :  { %v7334_v35 = vpop.trf.xlu0 }
0x20ff   :  { %v7449_v41 = vcombine.low %v7270_v26, %v7334_v35  ;;  %v7450_v42 = vcombine.high %v7270_v26, %v7334_v35 }
0x2101   :  { %v7457_v32 = vrot.slane %v7449_v41, %v9687_v12  ;;  %v7464_v34 = vrot.slane %v7450_v42, %v9687_v12  ;;  %v9209_v41 = vpack.c.bf16 %v4095_v29, %v4094_v25  ;;  %v8237_v25 = vld [vmem:[%s10472_s4 + $0x48] sm:$0xff]  ;;  %v8240_v29 = vld [vmem:[%s10472_s4 + $0x60] sm:$0xff] }
0x2103   :  { %9210 = vmatprep.subr.bf16.mxu0 %v9209_v41 }
0x2104   :  { %9212 = vmatpush3.bf16.msra.mxu0 %v9209_v41  ;;  %v8319_v41 = vld [vmem:[%s10474_s6 + $0x1a] ss:$0 sm:$0xff] }
0x2145   :  { %v7365_v31 = vpop.trf.xlu1 }
0x2146   :  { %v7397_v37 = vcombine.low %v7301_v7, %v7365_v31  ;;  %v7398_v38 = vcombine.high %v7301_v7, %v7365_v31  ;;  %v4097_v31 = vld [vmem:[#allocation2 + $0x1f8] sm:$0xff] }
0x2147   :  { %v9213_v42 = vpack.c.bf16 %v4097_v31, %v4096_v30  ;;  %v8241_v30 = vld [vmem:[%s10472_s4 + $0x68] sm:$0xff] }
0x2148   :  { %v7405_v56 = vrot.slane %v7397_v37, %v9687_v12  ;;  %v7412_v57 = vrot.slane %v7398_v38, %v9687_v12  ;;  %v9233_v31 = vpack.c.bf16 %v8241_v30, %v8240_v29  ;;  %v8328_v30 = vld [vmem:[%s10474_s6 + $0x1d] ss:$0 sm:$0xff] }
0x2149   :  { %v7366_v52 = vpop.trf.xlu1  ;;  %9214 = vmatprep.subr.bf16.mxu0 %v9213_v42 }
0x214a   :  { %v7413_v55 = vcombine.low %v7389_v39, %v7405_v56  ;;  %v7414_v43 = vcombine.high %v7389_v39, %v7405_v56  ;;  %v7429_v54 = vcombine.low %v7396_v40, %v7412_v57  ;;  %v7430_v44 = vcombine.high %v7396_v40, %v7412_v57  ;;  %9216 = vmatpush3.bf16.msra.mxu0 %v9213_v42 }
0x214b   :  { %v7465_v45 = vcombine.low %v7302_v27, %v7366_v52  ;;  %v7466_v46 = vcombine.high %v7302_v27, %v7366_v52 }
0x214c   :  { %v7421_v47 = vrot.slane %v7413_v55, %v9690_v21  ;;  %v7428_v48 = vrot.slane %v7414_v43, %v9690_v21  ;;  %v7437_v49 = vrot.slane %v7429_v54, %v9690_v21  ;;  %v7444_v60 = vrot.slane %v7430_v44, %v9690_v21 }
0x214d   :  { %v7473_v59 = vrot.slane %v7465_v45, %v9687_v12  ;;  %v7480_v63 = vrot.slane %v7466_v46, %v9687_v12 }
0x214e   :  { %v7517_v0 = vcombine.low %v7421_v47, %v7428_v48  ;;  %v8312_v1 = vcombine.high %v7421_v47, %v7428_v48  ;;  %v7533_v4 = vcombine.low %v7437_v49, %v7444_v60  ;;  %v8313_v6 = vcombine.high %v7437_v49, %v7444_v60 }
0x214f   :  { %v7481_v53 = vcombine.low %v7457_v32, %v7473_v59  ;;  %v7482_v58 = vcombine.high %v7457_v32, %v7473_v59  ;;  %v7497_v8 = vcombine.low %v7464_v34, %v7480_v63  ;;  %v7498_v61 = vcombine.high %v7464_v34, %v7480_v63 }
0x2150   :  { %v7524_v9 = vrot.slane %v7517_v0, %v9687_v12  ;;  %v7532_v10 = vrot.slane %v8312_v1, %v9687_v12  ;;  %v7540_v11 = vrot.slane %v7533_v4, %v9687_v12  ;;  %v7548_v14 = vrot.slane %v8313_v6, %v9687_v12 }
0x2151   :  { %v7489_v15 = vrot.slane %v7481_v53, %v9690_v21  ;;  %v7496_v16 = vrot.slane %v7482_v58, %v9690_v21  ;;  %v7505_v33 = vrot.slane %v7497_v8, %v9690_v21  ;;  %v7512_v17 = vrot.slane %v7498_v61, %v9690_v21  ;;  %v8316_v53 = vld [vmem:[%s10474_s6 + $0x16] ss:$0 sm:$0xff] }
0x2152   :  { %v7550_v5 = vcombine.high %v7524_v9, %v7532_v10  ;;  %v7566_v2 = vcombine.high %v7540_v11, %v7548_v14  ;;  %v7549_v51 = vcombine.low %v7524_v9, %v7532_v10  ;;  %v7565_v36 = vcombine.low %v7540_v11, %v7548_v14 }
0x2153   :  { %v7585_v3 = vcombine.low %v7489_v15, %v7496_v16  ;;  %v8314_v13 = vcombine.high %v7489_v15, %v7496_v16  ;;  %v7601_v18 = vcombine.low %v7505_v33, %v7512_v17  ;;  %v8315_v19 = vcombine.high %v7505_v33, %v7512_v17 }
0x2154   :  { %v7564_v22 = vrot.slane %v7550_v5, %v9690_v21  ;;  %v7580_v23 = vrot.slane %v7566_v2, %v9690_v21  ;;  %v7557_v20 = vrot.slane %v7549_v51, %v9690_v21  ;;  %v7573_v24 = vrot.slane %v7565_v36, %v9690_v21 }
0x2155   :  { %v7592_v7 = vrot.slane %v7585_v3, %v9687_v12  ;;  %v7600_v26 = vrot.slane %v8314_v13, %v9687_v12  ;;  %v7608_v27 = vrot.slane %v7601_v18, %v9687_v12  ;;  %v7616_v28 = vrot.slane %v8315_v19, %v9687_v12  ;;  %v8233_v18 = vld [vmem:[%s10471_s3 + $0x28] sm:$0xff] }
0x2156   :  { %v7583_v35 = vcombine.low %v7564_v22, %v7580_v23  ;;  %v7582_v37 = vcombine.high %v7557_v20, %v7573_v24  ;;  %v7581_v38 = vcombine.low %v7557_v20, %v7573_v24  ;;  %v7584_v55 = vcombine.high %v7564_v22, %v7580_v23  ;;  %v8234_v22 = vld [vmem:[%s10471_s3 + $0x30] sm:$0xff]  ;;  %v8235_v23 = vld [vmem:[%s10471_s3 + $0x38] sm:$0xff]  ;;  %v8236_v24 = vld [vmem:[%s10472_s4 + $0x40] sm:$0xff] }
0x2157   :  { %v7617_v39 = vcombine.low %v7592_v7, %v7600_v26  ;;  %v7633_v40 = vcombine.low %v7608_v27, %v7616_v28  ;;  %v7618_v56 = vcombine.high %v7592_v7, %v7600_v26  ;;  %v7634_v57 = vcombine.high %v7608_v27, %v7616_v28  ;;  %v8238_v7 = vld [vmem:[%s10472_s4 + $0x50] sm:$0xff]  ;;  %v8239_v27 = vld [vmem:[%s10472_s4 + $0x58] sm:$0xff] }
0x2158   :  { %7663 = vrot.lane.b32.xlu1 %v7583_v35, %s9453_s13  ;;  %7655 = vrot.lane.b32.xlu0 %v7582_v37, %s9443_s20  ;;  %v9221_v20 = vpack.c.bf16 %v8235_v23, %v8234_v22  ;;  %v9225_v26 = vpack.c.bf16 %v8237_v25, %v8236_v24  ;;  %v9229_v28 = vpack.c.bf16 %v8239_v27, %v8238_v7 }
0x2159   :  { %v7625_v52 = vrot.slane %v7617_v39, %v9690_v21  ;;  %v7641_v12 = vrot.slane %v7633_v40, %v9690_v21  ;;  %v7632_v54 = vrot.slane %v7618_v56, %v9690_v21  ;;  %v7648_v44 = vrot.slane %v7634_v57, %v9690_v21 }
0x215a   :  { %9226 = vmatprep.subr.bf16.mxu0 %v9225_v26 }
0x215b   :  { %v7650_v43 = vcombine.high %v7625_v52, %v7641_v12  ;;  %v7649_v45 = vcombine.low %v7625_v52, %v7641_v12  ;;  %v7651_v46 = vcombine.low %v7632_v54, %v7648_v44  ;;  %v7652_v47 = vcombine.high %v7632_v54, %v7648_v44  ;;  %v8320_v52 = vld [vmem:[%s10474_s6 + $0x1b] ss:$0 sm:$0xff] }
0x215c   :  { %7671 = vrot.lane.b32.xlu0 %v7584_v55, %s9454_s14 }
0x215d   :  { %7657 = vrot.lane.b32.xlu1 %v7650_v43, %s9443_s20 }
0x2161   :  { %7665 = vrot.lane.b32.xlu1 %v7651_v46, %s9453_s13  ;;  %v8242_v46 = vld [vmem:[%s10472_s4 + $0x70] sm:$0xff] }
0x2165   :  { %7673 = vrot.lane.b32.xlu1 %v7652_v47, %s9454_s14  ;;  %v8243_v47 = vld [vmem:[%s10472_s4 + $0x78] sm:$0xff] }
0x21ca   :  { %v7664_v48 = vpop.permute.xlu1 %7663  ;;  %v7656_v49 = vpop.permute.xlu0 %7655 }
0x21cb   :  { %v7677_v60 = vsel %vm583_vm1, %v7581_v38, %v7656_v49  ;;  %v8321_v49 = vld [vmem:[%s10473_s5 + $0x1] ss:$0 sm:$0xff] }
0x21cc   :  { %v7679_v21 = vsel %vm900_vm10, %v7677_v60, %v7664_v48  ;;  %v9237_v48 = vpack.c.bf16 %v8243_v47, %v8242_v46 }
0x21ce   :  { %v7672_v32 = vpop.permute.xlu0 %7671 }
0x21cf   :  { %v7658_v34 = vpop.permute.xlu1 %7657  ;;  %v7681_v59 = vsel %vm1861_vm13, %v7679_v21, %v7672_v32 }
0x21d0   :  { %8957 = vmatprep.mubr.msk.f32.mxu0 %vm155_vm0, %v7681_v59  ;;  %v7678_v0 = vsel %vm583_vm1, %v7649_v45, %v7658_v34 }
0x21d3   :  { %v7666_v63 = vpop.permute.xlu1 %7665 }
0x21d4   :  { %v7680_v1 = vsel %vm900_vm10, %v7678_v0, %v7666_v63  ;;  %v8324_v0 = vld [vmem:[%s10474_s6 + $0x17] ss:$0 sm:$0xff] }
0x21d7   :  { %v7674_v4 = vpop.permute.xlu1 %7673 }
0x21d8   :  { %v7682_v6 = vsel %vm1861_vm13, %v7680_v1, %v7674_v4 }
0x21d9   :  { %8958 = vmatmul.mubr.msk.f32.vlgmr.msra.gmra.mrb[44].mxu0 %vm155_vm0, %v7682_v6 }
0x21da   :  { %9228 = vmatpush3.bf16.msra.mxu0 %v9225_v26  ;;  %v8327_v26 = vld [vmem:[%s10474_s6 + $0x1c] ss:$0 sm:$0xff] }
0x21db   :  { %9230 = vmatprep.subr.bf16.mxu0 %v9229_v28 }
0x21de   :  { %9232 = vmatpush3.bf16.msra.mxu0 %v9229_v28 }
0x21df   :  { %9234 = vmatprep.subr.bf16.mxu0 %v9233_v31 }
0x21e2   :  { %9236 = vmatpush3.bf16.msra.mxu0 %v9233_v31 }
0x21e3   :  { %9238 = vmatprep.subr.bf16.mxu0 %v9237_v48 }
0x21e6   :  { %9240 = vmatpush3.bf16.msra.mxu0 %v9237_v48 }
0x22ac   :  { %v8959_v58 = vpop.f32.mrb[44].mxu0 }
0x22ad   :  { %v7767_v8 = vadd.f32 %v8959_v58, %v8316_v53  ;;  %v7761_v61 = vpop.f32.mrb[45].mxu0 }
0x22ae   :  { %v7762_v9 = vadd.f32 %v8316_v53, %v7761_v61 }
0x22af   :  { %v7771_v10 = vadd.f32 %v7767_v8, %v10226_v50 }
0x22b0   :  { %v7770_v11 = vadd.f32 %v7762_v9, %v10222_v62  ;;  %v8232_v62 = vld [vmem:[%s10471_s3 + $0x20] sm:$0xff] }
0x22b1   :  { %v7775_v14 = vsel %vm155_vm0, %v7771_v10, 0.0  ;;  %v9217_v19 = vpack.c.bf16 %v8233_v18, %v8232_v62  ;;  %v8037_v62 = vld [vmem:[%s10475_s7 + $0x18] sm:$0xff] }
0x22b2   :  { %7776 = vadd.xlane.f32.xlu1 %v7775_v14  ;;  %v7772_v15 = vsel %vm155_vm0, %v7770_v11, 0.0 }
0x22b3   :  { %7773 = vadd.xlane.f32.xlu0 %v7772_v15  ;;  %9218 = vmatprep.subr.bf16.mxu1 %v9217_v19 }
0x22b4   :  { %9220 = vmatpush3.bf16.msra.mxu1 %v9217_v19 }
0x22b5   :  { %9222 = vmatprep.subr.bf16.mxu1 %v9221_v20 }
0x22b8   :  { %9224 = vmatpush3.bf16.msra.mxu1 %v9221_v20 }
0x233f   :  { %v7777_v16 = vpop.xlane.xlu1 %7776 }
0x2340   :  { %v7779_v33 = vmul.f32 0.03125, %v7777_v16  ;;  %v7774_v17 = vpop.xlane.xlu0 %7773 }
0x2341   :  { %v7778_v5 = vmul.f32 0.03125, %v7774_v17 }
0x2342   :  { %v7781_v2 = vsub.f32 %v7771_v10, %v7779_v33 }
0x2343   :  { %v7780_v51 = vsub.f32 %v7770_v11, %v7778_v5 }
0x2344   :  { %v7783_v13 = vmul.f32 %v7781_v2, %v7781_v2 }
0x2345   :  { %v7782_v36 = vmul.f32 %v7780_v51, %v7780_v51 }
0x2346   :  { %v7787_v50 = vsel %vm155_vm0, %v7783_v13, 0.0 }
0x2347   :  { %v7784_v3 = vsel %vm155_vm0, %v7782_v36, 0.0  ;;  %v8034_v36 = vld [vmem:[%s10475_s7] sm:$0xff] }
0x2348   :  { %7785 = vadd.xlane.f32.xlu0 %v7784_v3  ;;  %v8035_v3 = vld [vmem:[%s10475_s7 + $0x8] sm:$0xff] }
0x2349   :  { %v9241_v13 = vpack.c.bf16 %v8035_v3, %v8034_v36 }
0x234b   :  { %9242 = vmatprep.subr.bf16.mxu1 %v9241_v13 }
0x234c   :  { %7788 = vadd.xlane.f32.xlu0 %v7787_v50  ;;  %v8036_v50 = vld [vmem:[%s10475_s7 + $0x10] sm:$0xff] }
0x234d   :  { %v9245_v18 = vpack.c.bf16 %v8037_v62, %v8036_v50 }
0x23d5   :  { %v7786_v35 = vpop.xlane.xlu0 %7785 }
0x23d6   :  { %v7790_v37 = vmul.f32 0.03125, %v7786_v35 }
0x23d8   :  { %v7792_v38 = vadd.f32 1e-05, %v7790_v37 }
0x23d9   :  { %v7789_v39 = vpop.xlane.xlu0 %7788 }
0x23da   :  { %9407 = vrsqrt.f32 %v7792_v38  ;;  %v7791_v40 = vmul.f32 0.03125, %v7789_v39  ;;  %v8329_v39 = vld [vmem:[%s10476_s8] ss:$0 sm:$0xff] }
0x23dc   :  { %v7793_v56 = vadd.f32 1e-05, %v7791_v40 }
0x23de   :  { %9409 = vrsqrt.f32 %v7793_v56 }
0x23e4   :  { %v9408_v57 = vpop.eup %9407 }
0x23e5   :  { %v7796_v42 = vmul.f32 %v9408_v57, %v7780_v51 }
0x23e7   :  { %v7804_v12 = vmul.f32 %v8319_v41, %v7796_v42 }
0x23e8   :  { %v9410_v55 = vpop.eup %9409 }
0x23e9   :  { %v7797_v43 = vmul.f32 %v9410_v55, %v7781_v2  ;;  %v7812_v54 = vadd.f32 %v8320_v52, %v7804_v12 }
0x23eb   :  { %v7805_v44 = vmul.f32 %v8319_v41, %v7797_v43  ;;  %8968 = vmatprep.mubr.msk.f32.mxu1 %vm155_vm0, %v7812_v54 }
0x23ed   :  { %v7813_v45 = vadd.f32 %v8320_v52, %v7805_v44 }
0x23ef   :  { %8969 = vmatmul.mubr.msk.f32.vlgmr.msra.gmra.mrb[54].mxu1 %vm155_vm0, %v7813_v45 }
0x23f0   :  { %9244 = vmatpush3.bf16.msra.mxu1 %v9241_v13 }
0x23f1   :  { %9246 = vmatprep.subr.bf16.mxu1 %v9245_v18 }
0x23f4   :  { %9248 = vmatpush3.bf16.msra.mxu1 %v9245_v18 }
0x24c2   :  { %v8970_v60 = vpop.f32.mrb[54].mxu1 }
0x24c3   :  { %v7898_v21 = vadd.f32 %v8970_v60, %v8321_v49  ;;  %v7892_v32 = vpop.f32.mrb[55].mxu1 }
0x24c4   :  { %v7893_v34 = vadd.f32 %v8321_v49, %v7892_v32 }
0x24c5   :  { %v7902_v63 = vmax.f32 %v7898_v21, 0.0 }
0x24c6   :  { %v7901_v59 = vmax.f32 %v7893_v34, 0.0 }
0x24c8   :  { %8987 = vmatprep.mubr.msk.f32.mxu0 %vm3939_vm14, %v7901_v59 }
0x24c9   :  { %8988 = vmatmul.mubr.msk.f32.vlgmr.msra.gmra.mrb[46].mxu0 %vm3939_vm14, %v7902_v63 }
0x259c   :  { %v8989_v1 = vpop.f32.mrb[46].mxu0 }
0x259d   :  { %v7987_v4 = vadd.f32 %v8989_v1, %v8324_v0  ;;  %v7981_v6 = vpop.f32.mrb[47].mxu0 }
0x259e   :  { %v7982_v53 = vadd.f32 %v8324_v0, %v7981_v6 }
0x259f   :  { %v7991_v58 = vadd.f32 %v7987_v4, %v7813_v45 }
0x25a0   :  { %v7990_v8 = vadd.f32 %v7982_v53, %v7812_v54 }
0x25a1   :  { %v7995_v61 = vsel %vm155_vm0, %v7991_v58, 0.0 }
0x25a2   :  { %7996 = vadd.xlane.f32.xlu0 %v7995_v61  ;;  %v7992_v9 = vsel %vm155_vm0, %v7990_v8, 0.0 }
0x25a3   :  { %7993 = vadd.xlane.f32.xlu1 %v7992_v9 }
0x262f   :  { %v7997_v10 = vpop.xlane.xlu0 %7996 }
0x2630   :  { %v7999_v11 = vmul.f32 0.03125, %v7997_v10  ;;  %v7994_v14 = vpop.xlane.xlu1 %7993 }
0x2631   :  { %v7998_v15 = vmul.f32 0.03125, %v7994_v14 }
0x2632   :  { %v8001_v16 = vsub.f32 %v7991_v58, %v7999_v11 }
0x2633   :  { %v8000_v33 = vsub.f32 %v7990_v8, %v7998_v15 }
0x2634   :  { %v8003_v17 = vmul.f32 %v8001_v16, %v8001_v16 }
0x2635   :  { %v8002_v5 = vmul.f32 %v8000_v33, %v8000_v33 }
0x2636   :  { %v8007_v2 = vsel %vm155_vm0, %v8003_v17, 0.0 }
0x2637   :  { %8008 = vadd.xlane.f32.xlu0 %v8007_v2  ;;  %v8004_v51 = vsel %vm155_vm0, %v8002_v5, 0.0 }
0x2638   :  { %8005 = vadd.xlane.f32.xlu1 %v8004_v51 }
0x26c4   :  { %v8009_v19 = vpop.xlane.xlu0 %8008 }
0x26c5   :  { %v8011_v22 = vmul.f32 0.03125, %v8009_v19  ;;  %v8006_v23 = vpop.xlane.xlu1 %8005 }
0x26c6   :  { %v8010_v20 = vmul.f32 0.03125, %v8006_v23 }
0x26c7   :  { %v8013_v24 = vadd.f32 1e-05, %v8011_v22 }
0x26c8   :  { %v8012_v25 = vadd.f32 1e-05, %v8010_v20 }
0x26c9   :  { %9411 = vrsqrt.f32 %v8013_v24 }
0x26ca   :  { %9413 = vrsqrt.f32 %v8012_v25 }
0x26d3   :  { %v9412_v7 = vpop.eup %9411 }
0x26d4   :  { %v9414_v27 = vpop.eup %9413  ;;  %v8017_v28 = vmul.f32 %v9412_v7, %v8001_v16 }
0x26d5   :  { %v8016_v29 = vmul.f32 %v9414_v27, %v8000_v33 }
0x26d6   :  { %v8025_v31 = vmul.f32 %v8327_v26, %v8017_v28 }
0x26d7   :  { %v8024_v35 = vmul.f32 %v8327_v26, %v8016_v29 }
0x26d8   :  { %v8033_v38 = vadd.f32 %v8328_v30, %v8025_v31 }
0x26d9   :  { %v8032_v37 = vadd.f32 %v8328_v30, %v8024_v35 }
0x26db   :  { %8998 = vmatprep.mubr.msk.f32.mxu1 %vm155_vm0, %v8032_v37 }
0x26dc   :  { %8999 = vmatmul.mubr.msk.f32.vlgmr.msra.gmra.mrb[56].mxu1 %vm155_vm0, %v8033_v38 }
0x27af   :  { %v9000_v40 = vpop.f32.mrb[56].mxu1 }
0x27b0   :  { %v8123_v56 = vadd.f32 %v9000_v40, %v8329_v39  ;;  %v8117_v57 = vpop.f32.mrb[57].mxu1 }
0x27b1   :  { %v8118_v41 = vadd.f32 %v8329_v39, %v8117_v57 }
0x27b2   :  { %8127 = vst [vmem:[%s10477_s9 + $0x8] sm:$0xff] %v8123_v56 }
0x27b3   :  { %8126 = vst [vmem:[%s10477_s9] sm:$0xff] %v8118_v41 }
0x27b4   :  { %8132 = vsyncpa [#allocation3], 1 }

</bundles_post_ra>
